<compile_context>
chip_gen: v7x
topology: tpu7x:2x2x1
jax: 0.10.0
libtpu: 0.0.40
codegen_flags: <defaults>
</compile_context>

<pallas_src>
import functools

import jax
import jax.numpy as jnp
from jax.experimental import pallas as pl
from jax.experimental.pallas import tpu as pltpu

_LANE = 128
_VMEM_LIMIT = 32 * 1024 * 1024   # explicit scoped-VMEM budget; safe on v5e/v6e/v7x


def _round_up(x, m):
    return ((x + m - 1) // m) * m


# --------------------------------------------------------------------------- #
# Kernel 1: all 1x1 branches in one fused matmul + BN + (gated) ReLU            #
# --------------------------------------------------------------------------- #

def _fused_1x1_kernel(x_ref, wa_ref, sa_ref, ga_ref, wb_ref, sb_ref,
                      oa_ref, ob_ref):
    # x_ref: (tm, Cin) bf16; wa/wb: (Cin, 128) bf16 (BN scale folded in);
    # sa/sb: (1, 128) f32 BN shifts; ga: (1, 128) f32 ReLU gate.
    # oa: (tm, 128) f32 [conv1x1 | pool_proj(linear) | pad]
    # ob: (tm, 128) bf16 [conv3x3_reduce | conv5x5_reduce | pad]   (ReLU'd)
    x = x_ref[...]
    za = jnp.dot(x, wa_ref[...], preferred_element_type=jnp.float32)
    zb = jnp.dot(x, wb_ref[...], preferred_element_type=jnp.float32)
    za_shifted = za + sa_ref[...]
    # gate==1 -> conv+BN+ReLU output; gate==0 -> raw linear map (pool_proj before
    # the average pool; its shift/ReLU is applied after pooling).
    oa_ref[...] = jnp.where(ga_ref[...] > 0.0, jnp.maximum(za_shifted, 0.0), za)
    ob_ref[...] = jnp.maximum(zb + sb_ref[...], 0.0).astype(ob_ref.dtype)


def _choose_tm(M):
    # >=4 grid steps at small M (keeps both v7x TensorCores busy with >=2 steps),
    # large lane-dense tiles (up to 1024 rows) at realistic M.
    if M <= 4 * _LANE:
        return max(8, min(_LANE, _round_up(M, 8)))
    return min(1024, max(_LANE, _round_up(M // 4, _LANE)))


def fused_pointwise(x_nhwc, w_a, shift_a, gate_a, w_b, shift_b):
    """One MXU pass computing every 1x1 branch of the block (dual 128-wide outputs)."""
    N, H, W, Cin = x_nhwc.shape
    M = N * H * W
    CA = w_a.shape[1]
    CB = w_b.shape[1]

    x_flat = x_nhwc.reshape(M, Cin).astype(jnp.bfloat16)
    tm = _choose_tm(M)
    Mp = _round_up(M, tm)
    if Mp != M:
        x_flat = jnp.pad(x_flat, ((0, Mp - M), (0, 0)))

    ya, yb = pl.pallas_call(
        _fused_1x1_kernel,
        out_shape=(jax.ShapeDtypeStruct((Mp, CA), jnp.float32),
                   jax.ShapeDtypeStruct((Mp, CB), jnp.bfloat16)),
        grid_spec=pltpu.PrefetchScalarGridSpec(
            num_scalar_prefetch=0,
            grid=(Mp // tm,),
            in_specs=[
                pl.BlockSpec((tm, Cin), lambda i: (i, 0)),     # pixel rows
                pl.BlockSpec((Cin, CA), lambda i: (0, 0)),     # group-A weights
                pl.BlockSpec((1, CA), lambda i: (0, 0)),       # group-A shift
                pl.BlockSpec((1, CA), lambda i: (0, 0)),       # group-A ReLU gate
                pl.BlockSpec((Cin, CB), lambda i: (0, 0)),     # group-B weights
                pl.BlockSpec((1, CB), lambda i: (0, 0)),       # group-B shift
            ],
            out_specs=[pl.BlockSpec((tm, CA), lambda i: (i, 0)),
                       pl.BlockSpec((tm, CB), lambda i: (i, 0))],
        ),
        compiler_params=pltpu.CompilerParams(
            dimension_semantics=("parallel",),
            vmem_limit_bytes=_VMEM_LIMIT),
    )(x_flat, w_a.astype(jnp.bfloat16), shift_a.reshape(1, CA),
      gate_a.reshape(1, CA), w_b.astype(jnp.bfloat16), shift_b.reshape(1, CB))
    return ya[:M].reshape(N, H, W, CA), yb[:M].reshape(N, H, W, CB)


# --------------------------------------------------------------------------- #
# Kernel 2: KxK conv + BN + ReLU (kw merged into contraction, scratch acc)      #
# --------------------------------------------------------------------------- #

def _conv_rows_kernel(xs_ref, w_ref, b_ref, o_ref, acc_ref, *, kh, h):
    # xs_ref: (h + kh - 1, W, kw*Cin) bf16 -- zero-padded, column-shift-merged slab rows.
    # w_ref:  (kh, kw*Cin, Coutp) bf16 (BN scale folded);  b_ref: (1, Coutp) f32.
    # o_ref:  (h*W, Coutp) f32;  acc_ref: VMEM scratch (h*W, Coutp) f32.
    W = xs_ref.shape[1]
    K = xs_ref.shape[2]
    acc_ref[...] = jnp.zeros_like(acc_ref)
    for dy in range(kh):
        patch = xs_ref[dy:dy + h].reshape(h * W, K)      # outer-dim slice only
        acc_ref[...] += jnp.dot(patch, w_ref[dy],
                                preferred_element_type=jnp.float32)
    o_ref[...] = jnp.maximum(acc_ref[...] + b_ref[...], 0.0)


def _pick_row_groups(N, H, min_steps=4):
    g = 1
    while N * g < min_steps and H % (2 * g) == 0 and H // (2 * g) >= 8:
        g *= 2
    return g


def conv_kxk_bn_relu(x_nhwc, w, scale, shift, pad):
    """Conv2d(k, stride=1, padding=pad, bias=False) + BN(eval) + ReLU."""
    Cout, Cin, kh, kw = w.shape
    N, H, W, C = x_nhwc.shape
    assert C == Cin
    Coutp = _round_up(Cout, _LANE)

    # Zero-pad spatially, then merge kw column shifts into the contraction dim:
    # xs[n, y, x, dx*Cin + c] = xpad[n, y, x + dx, c]   -> kh matmuls with K = kw*Cin.
    xp = jnp.pad(x_nhwc.astype(jnp.bfloat16),
                 ((0, 0), (pad, pad), (pad, pad), (0, 0)))
    xs = jnp.concatenate([xp[:, :, dx:dx + W, :] for dx in range(kw)], axis=-1)

    # Row-group tiling so small batches still give every TensorCore >= 2 steps.
    G = _pick_row_groups(N, H)
    h = H // G
    hb = h + 2 * pad
    xs = jnp.stack([xs[:, g * h:g * h + hb] for g in range(G)], axis=1)
    xs = xs.reshape(N * G * hb, W, kw * Cin)

    # (Cout, Cin, kh, kw) -> (kh, kw*Cin, Coutp): tap-row major, scale folded, 128-padded.
    w_t = jnp.transpose(w, (2, 3, 1, 0)) * scale
    w_t = jnp.pad(w_t, ((0, 0), (0, 0), (0, 0), (0, Coutp - Cout)))
    w_t = w_t.reshape(kh, kw * Cin, Coutp).astype(jnp.bfloat16)
    shift_p = jnp.pad(shift, (0, Coutp - Cout)).reshape(1, Coutp)

    out = pl.pallas_call(
        functools.partial(_conv_rows_kernel, kh=kh, h=h),
        out_shape=jax.ShapeDtypeStruct((N * G * h * W, Coutp), jnp.float32),
        grid_spec=pltpu.PrefetchScalarGridSpec(
            num_scalar_prefetch=0,
            grid=(N * G,),
            in_specs=[
                pl.BlockSpec((hb, W, kw * Cin), lambda i: (i, 0, 0)),
                pl.BlockSpec((kh, kw * Cin, Coutp), lambda i: (0, 0, 0)),
                pl.BlockSpec((1, Coutp), lambda i: (0, 0)),
            ],
            out_specs=pl.BlockSpec((h * W, Coutp), lambda i: (i, 0)),
            scratch_shapes=[pltpu.VMEM((h * W, Coutp), jnp.float32)]),
        compiler_params=pltpu.CompilerParams(
            dimension_semantics=("parallel",),
            vmem_limit_bytes=_VMEM_LIMIT),
    )(xs, w_t, shift_p)
    return out.reshape(N, H, W, Coutp)[..., :Cout]


# --------------------------------------------------------------------------- #
# Kernel 3: fused conv3x3_1 + BN + ReLU + conv3x3_2 + BN + ReLU                 #
# --------------------------------------------------------------------------- #

def _double_conv3x3_kernel(xs_ref, w1_ref, s1_ref, w2_ref, s2_ref, o_ref,
                           b3s_ref, acc_ref, *, H):
    # xs_ref : (H+2, W, 3*C1) bf16 -- column-shift-merged, zero-padded slab of r3.
    # w1_ref : (3, 3*C1, Cp) bf16;  s1_ref: (1, Cp) f32.
    # w2_ref : (3, 3*Cp, Cp) bf16;  s2_ref: (1, Cp) f32.
    # o_ref  : (H*W, Cp) f32.
    # b3s_ref: VMEM (H+2, W, 3*Cp) bf16 -- shifted slab of the conv3x3_1 output.
    # acc_ref: VMEM (H*W, Cp) f32 accumulator (reused by both convs).
    W = xs_ref.shape[1]
    K1 = xs_ref.shape[2]
    Cp = o_ref.shape[1]

    # ---- conv3x3_1 + BN + ReLU (intermediate lives only in VMEM) ----
    acc_ref[...] = jnp.zeros_like(acc_ref)
    for dy in range(3):
        patch = xs_ref[dy:dy + H].reshape(H * W, K1)
        acc_ref[...] += jnp.dot(patch, w1_ref[dy],
                                preferred_element_type=jnp.float32)
    b3 = jnp.maximum(acc_ref[...] + s1_ref[...], 0.0).reshape(H, W, Cp)   # f32

    # ---- build zero-padded, column-shift-merged slab of b3 in VMEM ----
    # slot dx at column x holds b3_padded[:, x + dx, :]  (zero outside the image).
    col = jax.lax.broadcasted_iota(jnp.int32, (1, W, Cp), 1)
    left = jnp.where(col >= 1, pltpu.roll(b3, shift=1, axis=1),
                     jnp.zeros_like(b3))                  # dx = 0
    right = jnp.where(col <= W - 2, pltpu.roll(b3, shift=W - 1, axis=1),
                      jnp.zeros_like(b3))                 # dx = 2
    zero_row = jnp.zeros((1, W, 3 * Cp), jnp.bfloat16)
    b3s_ref[0:1] = zero_row                               # top spatial zero-pad row
    b3s_ref[H + 1:H + 2] = zero_row                       # bottom spatial zero-pad row
    b3s_ref[1:H + 1, :, 0:Cp] = left.astype(jnp.bfloat16)
    b3s_ref[1:H + 1, :, Cp:2 * Cp] = b3.astype(jnp.bfloat16)
    b3s_ref[1:H + 1, :, 2 * Cp:3 * Cp] = right.astype(jnp.bfloat16)

    # ---- conv3x3_2 + BN + ReLU ----
    acc_ref[...] = jnp.zeros_like(acc_ref)
    for dy in range(3):
        patch = b3s_ref[dy:dy + H].reshape(H * W, 3 * Cp)
        acc_ref[...] += jnp.dot(patch, w2_ref[dy],
                                preferred_element_type=jnp.float32)
    o_ref[...] = jnp.maximum(acc_ref[...] + s2_ref[...], 0.0)


def double_conv3x3_bn_relu(x_nhwc, p1, p2):
    """conv3x3_1 + BN + ReLU + conv3x3_2 + BN + ReLU in one pallas_call.

    The 96(->128)-channel intermediate never leaves VMEM (no HBM round trip).
    """
    w1, s1, t1 = p1
    w2, s2, t2 = p2
    N, H, W, C1 = x_nhwc.shape
    Cmid = w1.shape[0]
    Cout = w2.shape[0]
    assert w1.shape[1] == C1 and w2.shape[1] == Cmid
    Cp = _round_up(max(Cmid, Cout), _LANE)

    xp = jnp.pad(x_nhwc.astype(jnp.bfloat16), ((0, 0), (1, 1), (1, 1), (0, 0)))
    xs = jnp.concatenate([xp[:, :, dx:dx + W, :] for dx in range(3)], axis=-1)
    xs = xs.reshape(N * (H + 2), W, 3 * C1)

    w1t = jnp.transpose(w1, (2, 3, 1, 0)) * s1                        # (3,3,C1,Cmid)
    w1t = jnp.pad(w1t, ((0, 0), (0, 0), (0, 0), (0, Cp - Cmid)))
    w1t = w1t.reshape(3, 3 * C1, Cp).astype(jnp.bfloat16)
    t1p = jnp.pad(t1, (0, Cp - Cmid)).reshape(1, Cp)

    w2t = jnp.transpose(w2, (2, 3, 1, 0)) * s2                        # (3,3,Cmid,Cout)
    w2t = jnp.pad(w2t, ((0, 0), (0, 0), (0, Cp - Cmid), (0, Cp - Cout)))
    w2t = w2t.reshape(3, 3 * Cp, Cp).astype(jnp.bfloat16)
    t2p = jnp.pad(t2, (0, Cp - Cout)).reshape(1, Cp)

    # TODO(synk): for v7x with very small batch, row-tile this grid (1-row halo
    # recompute) so each TensorCore gets >= 2 pipeline steps.
    out = pl.pallas_call(
        functools.partial(_double_conv3x3_kernel, H=H),
        out_shape=jax.ShapeDtypeStruct((N * H * W, Cp), jnp.float32),
        grid_spec=pltpu.PrefetchScalarGridSpec(
            num_scalar_prefetch=0,
            grid=(N,),                                    # one image per step
            in_specs=[
                pl.BlockSpec((H + 2, W, 3 * C1), lambda n: (n, 0, 0)),
                pl.BlockSpec((3, 3 * C1, Cp), lambda n: (0, 0, 0)),
                pl.BlockSpec((1, Cp), lambda n: (0, 0)),
                pl.BlockSpec((3, 3 * Cp, Cp), lambda n: (0, 0, 0)),
                pl.BlockSpec((1, Cp), lambda n: (0, 0)),
            ],
            out_specs=pl.BlockSpec((H * W, Cp), lambda n: (n, 0)),
            scratch_shapes=[pltpu.VMEM((H + 2, W, 3 * Cp), jnp.bfloat16),
                            pltpu.VMEM((H * W, Cp), jnp.float32)]),
        compiler_params=pltpu.CompilerParams(
            dimension_semantics=("parallel",),
            vmem_limit_bytes=_VMEM_LIMIT),
    )(xs, w1t, t1p, w2t, t2p)
    return out.reshape(N, H, W, Cp)[..., :Cout]


# --------------------------------------------------------------------------- #
# Pool-branch epilogue (tiny, VPU): avgpool(3,1,1) on the projected map         #
# --------------------------------------------------------------------------- #

def _avgpool3x3_shift_relu(z_nhwc, shift):
    # AvgPool2d(3, stride=1, padding=1, count_include_pad=True) applied AFTER the
    # (linear, scale-folded) 1x1 pool projection, then BN shift + ReLU.  Exact,
    # because the 1x1 conv commutes with zero-padded spatial averaging.  Nine
    # shifted adds on 32 channels -- left to XLA's VPU per perf review.
    N, H, W, C = z_nhwc.shape
    zp = jnp.pad(z_nhwc, ((0, 0), (1, 1), (1, 1), (0, 0)))
    acc = jnp.zeros_like(z_nhwc)
    for dy in range(3):
        for dx in range(3):
            acc = acc + zp[:, dy:dy + H, dx:dx + W, :]
    return jnp.maximum(acc * (1.0 / 9.0) + shift, 0.0)


# --------------------------------------------------------------------------- #
# InceptionBlockA forward                                                       #
# --------------------------------------------------------------------------- #

def inception_block_a(x_nchw, params):
    x = jnp.transpose(x_nchw, (0, 2, 3, 1)).astype(jnp.float32)   # NCHW -> NHWC

    w1, s1, t1 = params["conv1x1"]
    wp, sp, tp = params["pool_proj"]
    w3r, s3r, t3r = params["conv3x3_reduce"]
    w5r, s5r, t5r = params["conv5x5_reduce"]
    c1, cpj, c3r, c5r = w1.shape[0], wp.shape[0], w3r.shape[0], w5r.shape[0]

    def fold_1x1(w, s):        # (Cout, Cin, 1, 1) -> (Cin, Cout), BN scale folded
        return (w[:, :, 0, 0] * s[:, None]).T

    # Group A (f32 out): conv1x1 | pool_proj (linear; shift/ReLU after the avg pool).
    CA = _round_up(c1 + cpj, _LANE)
    w_a = jnp.concatenate([fold_1x1(w1, s1), fold_1x1(wp, sp)], axis=1)
    w_a = jnp.pad(w_a, ((0, 0), (0, CA - (c1 + cpj))))
    shift_a = jnp.pad(t1, (0, CA - c1))
    gate_a = jnp.pad(jnp.ones((c1,), jnp.float32), (0, CA - c1))
    # Group B (bf16 out): conv3x3_reduce | conv5x5_reduce (ReLU'd, feed the big convs).
    CB = _round_up(c3r + c5r, _LANE)
    w_b = jnp.concatenate([fold_1x1(w3r, s3r), fold_1x1(w5r, s5r)], axis=1)
    w_b = jnp.pad(w_b, ((0, 0), (0, CB - (c3r + c5r))))
    shift_b = jnp.pad(jnp.concatenate([t3r, t5r]), (0, CB - (c3r + c5r)))

    ya, yb = fused_pointwise(x, w_a, shift_a, gate_a, w_b, shift_b)
    out_1x1 = ya[..., :c1]                       # f32
    pool_lin = ya[..., c1:c1 + cpj]              # f32, linear pool projection
    r3 = yb[..., :c3r]                           # bf16
    r5 = yb[..., c3r:c3r + c5r]                  # bf16

    out_3x3 = double_conv3x3_bn_relu(r3, params["conv3x3_1"], params["conv3x3_2"])
    out_5x5 = conv_kxk_bn_relu(r5, *params["conv5x5"], pad=2)
    out_pool = _avgpool3x3_shift_relu(pool_lin, tp)

    out = jnp.concatenate([out_1x1, out_3x3, out_5x5, out_pool], axis=-1)
    return jnp.transpose(out, (0, 3, 1, 2))      # back to NCHW


# --------------------------------------------------------------------------- #
# Parameters                                                                    #
# --------------------------------------------------------------------------- #

def _make_conv_bn_params(key, cout, cin, k):
    w = 0.05 * jax.random.normal(key, (cout, cin, k, k), jnp.float32)
    eps = 1e-5
    gamma = jnp.ones((cout,), jnp.float32)
    beta = jnp.zeros((cout,), jnp.float32)
    running_mean = jnp.zeros((cout,), jnp.float32)
    running_var = jnp.ones((cout,), jnp.float32)
    scale = gamma / jnp.sqrt(running_var + eps)
    shift = beta - running_mean * scale
    return w, scale, shift


def make_params(key, in_channels, filters_pool_proj):
    keys = jax.random.split(key, 7)
    return {
        "conv1x1":        _make_conv_bn_params(keys[0], 64, in_channels, 1),
        "pool_proj":      _make_conv_bn_params(keys[1], filters_pool_proj, in_channels, 1),
        "conv3x3_reduce": _make_conv_bn_params(keys[2], 64, in_channels, 1),
        "conv3x3_1":      _make_conv_bn_params(keys[3], 96, 64, 3),
        "conv3x3_2":      _make_conv_bn_params(keys[4], 96, 96, 3),
        "conv5x5_reduce": _make_conv_bn_params(keys[5], 48, in_channels, 1),
        "conv5x5":        _make_conv_bn_params(keys[6], 64, 48, 5),
    }


# --------------------------------------------------------------------------- #
# Pure-JAX reference (f32 XLA convs) for a correctness check                    #
# --------------------------------------------------------------------------- #

def _ref_conv_bn_relu(x_nhwc, w, scale, shift, pad):
    out = jax.lax.conv_general_dilated(
        x_nhwc, jnp.transpose(w, (2, 3, 1, 0)),
        window_strides=(1, 1), padding=[(pad, pad), (pad, pad)],
        dimension_numbers=("NHWC", "HWIO", "NHWC"))
    return jnp.maximum(out * scale + shift, 0.0)


def _ref_avgpool3(x):
    N, H, W, C = x.shape
    xp = jnp.pad(x, ((0, 0), (1, 1), (1, 1), (0, 0)))
    acc = jnp.zeros_like(x)
    for dy in range(3):
        for dx in range(3):
            acc = acc + xp[:, dy:dy + H, dx:dx + W, :]
    return acc / 9.0


def inception_block_a_ref(x_nchw, params):
    x = jnp.transpose(x_nchw, (0, 2, 3, 1)).astype(jnp.float32)
    o1 = _ref_conv_bn_relu(x, *params["conv1x1"], 0)
    op = _ref_conv_bn_relu(_ref_avgpool3(x), *params["pool_proj"], 0)
    r3 = _ref_conv_bn_relu(x, *params["conv3x3_reduce"], 0)
    b3 = _ref_conv_bn_relu(r3, *params["conv3x3_1"], 1)
    o3 = _ref_conv_bn_relu(b3, *params["conv3x3_2"], 1)
    r5 = _ref_conv_bn_relu(x, *params["conv5x5_reduce"], 0)
    o5 = _ref_conv_bn_relu(r5, *params["conv5x5"], 2)
    out = jnp.concatenate([o1, o3, o5, op], axis=-1)
    return jnp.transpose(out, (0, 3, 1, 2))


# --------------------------------------------------------------------------- #
# Main                                                                          #
# --------------------------------------------------------------------------- #

if __name__ == "__main__":
    key = jax.random.PRNGKey(0)
    k_x, k_p = jax.random.split(key)

    N, C, H, W = 2, 4, 16, 16              # small NCHW input
    filters_pool_proj = 32

    x = jax.random.normal(k_x, (N, C, H, W), jnp.float32)
    params = make_params(k_p, C, filters_pool_proj)

    fwd = jax.jit(inception_block_a)
    out = jax.block_until_ready(fwd(x, params))

    expected_channels = 64 + 96 + 64 + filters_pool_proj
    assert out.shape == (N, expected_channels, H, W), out.shape
    assert bool(jnp.all(jnp.isfinite(out)))
    assert bool(jnp.all(out >= 0.0))        # every branch ends in ReLU

    # Correctness vs. pure-JAX reference (bf16 MXU inputs -> loose tolerance).
    ref = jax.block_until_ready(jax.jit(inception_block_a_ref)(x, params))
    assert bool(jnp.allclose(out, ref, rtol=5e-2, atol=5e-2)), \
        float(jnp.max(jnp.abs(out - ref)))

    print("KERNEL_OK")
</pallas_src>

<mosaic_0001>
module attributes {stable_mosaic.version = 11 : i64} {
  func.func @_fused_1x1_kernel(%arg0: i32, %arg1: memref<128x4xbf16, #tpu.memory_space<vmem>>, %arg2: memref<4x128xbf16, #tpu.memory_space<vmem>>, %arg3: memref<1x128xf32, #tpu.memory_space<vmem>>, %arg4: memref<1x128xf32, #tpu.memory_space<vmem>>, %arg5: memref<4x128xbf16, #tpu.memory_space<vmem>>, %arg6: memref<1x128xf32, #tpu.memory_space<vmem>>, %arg7: memref<128x128xf32, #tpu.memory_space<vmem>>, %arg8: memref<128x128xbf16, #tpu.memory_space<vmem>>) attributes {dimension_semantics = [#tpu.dimension_semantics<parallel>], iteration_bounds = array<i64: 4>, scalar_prefetch = 0 : i64, scratch_operands = 0 : i64, tpu.core_type = #tpu.core_type<tc>, window_params = [{transform_indices = @transform_0, window_bounds = array<i64: 128, 4>}, {pipeline_mode = #tpu.pipeline_mode<synchronous>, transform_indices = @transform_1, window_bounds = array<i64: 4, 128>}, {pipeline_mode = #tpu.pipeline_mode<synchronous>, transform_indices = @transform_2, window_bounds = array<i64: 1, 128>}, {pipeline_mode = #tpu.pipeline_mode<synchronous>, transform_indices = @transform_3, window_bounds = array<i64: 1, 128>}, {pipeline_mode = #tpu.pipeline_mode<synchronous>, transform_indices = @transform_4, window_bounds = array<i64: 4, 128>}, {pipeline_mode = #tpu.pipeline_mode<synchronous>, transform_indices = @transform_5, window_bounds = array<i64: 1, 128>}, {transform_indices = @transform_6, window_bounds = array<i64: 128, 128>}, {transform_indices = @transform_7, window_bounds = array<i64: 128, 128>}]} {
    %c0 = arith.constant 0 : index
    %c0_0 = arith.constant 0 : index
    %0 = vector.load %arg1[%c0, %c0_0] : memref<128x4xbf16, #tpu.memory_space<vmem>>, vector<128x4xbf16>
    %c0_1 = arith.constant 0 : index
    %c0_2 = arith.constant 0 : index
    %1 = vector.load %arg2[%c0_1, %c0_2] : memref<4x128xbf16, #tpu.memory_space<vmem>>, vector<4x128xbf16>
    %cst = arith.constant dense<0.000000e+00> : vector<128x128xf32>
    %2 = tpu.matmul %0, %1, %cst {dimension_numbers = #tpu.dot_dimension_numbers<[1], [0], [0], [1], [0, 0, 1, 1], [], []>} : vector<128x4xbf16>, vector<4x128xbf16>, vector<128x128xf32> -> vector<128x128xf32>
    %c0_3 = arith.constant 0 : index
    %c0_4 = arith.constant 0 : index
    %3 = vector.load %arg5[%c0_3, %c0_4] : memref<4x128xbf16, #tpu.memory_space<vmem>>, vector<4x128xbf16>
    %cst_5 = arith.constant dense<0.000000e+00> : vector<128x128xf32>
    %4 = tpu.matmul %0, %3, %cst_5 {dimension_numbers = #tpu.dot_dimension_numbers<[1], [0], [0], [1], [0, 0, 1, 1], [], []>} : vector<128x4xbf16>, vector<4x128xbf16>, vector<128x128xf32> -> vector<128x128xf32>
    %c0_6 = arith.constant 0 : index
    %c0_7 = arith.constant 0 : index
    %5 = vector.load %arg3[%c0_6, %c0_7] : memref<1x128xf32, #tpu.memory_space<vmem>>, vector<1x128xf32>
    %6 = vector.broadcast %5 : vector<1x128xf32> to vector<128x128xf32>
    %7 = arith.addf %2, %6 : vector<128x128xf32>
    %c0_8 = arith.constant 0 : index
    %c0_9 = arith.constant 0 : index
    %8 = vector.load %arg4[%c0_8, %c0_9] : memref<1x128xf32, #tpu.memory_space<vmem>>, vector<1x128xf32>
    %cst_10 = arith.constant 0.000000e+00 : f32
    %9 = vector.broadcast %cst_10 : f32 to vector<1x128xf32>
    %10 = arith.cmpf ogt, %8, %9 : vector<1x128xf32>
    %cst_11 = arith.constant 0.000000e+00 : f32
    %11 = vector.broadcast %cst_11 : f32 to vector<128x128xf32>
    %12 = arith.maximumf %7, %11 : vector<128x128xf32>
    %13 = vector.shape_cast %10 : vector<1x128xi1> to vector<1x128xi1>
    %14 = vector.broadcast %13 : vector<1x128xi1> to vector<128x128xi1>
    %15 = arith.select %14, %12, %2 : vector<128x128xi1>, vector<128x128xf32>
    %c0_12 = arith.constant 0 : index
    %c0_13 = arith.constant 0 : index
    %16 = vector.load %arg7[%c0_12, %c0_13] : memref<128x128xf32, #tpu.memory_space<vmem>>, vector<128x128xf32>
    tpu.vector_store %arg7[%c0_12, %c0_13], %15 {strides = array<i32>} : memref<128x128xf32, #tpu.memory_space<vmem>>, vector<128x128xf32>,
    %c0_14 = arith.constant 0 : index
    %c0_15 = arith.constant 0 : index
    %17 = vector.load %arg6[%c0_14, %c0_15] : memref<1x128xf32, #tpu.memory_space<vmem>>, vector<1x128xf32>
    %18 = vector.broadcast %17 : vector<1x128xf32> to vector<128x128xf32>
    %19 = arith.addf %4, %18 : vector<128x128xf32>
    %cst_16 = arith.constant 0.000000e+00 : f32
    %20 = vector.broadcast %cst_16 : f32 to vector<128x128xf32>
    %21 = arith.maximumf %19, %20 : vector<128x128xf32>
    %22 = arith.truncf %21 : vector<128x128xf32> to vector<128x128xbf16>
    %c0_17 = arith.constant 0 : index
    %c0_18 = arith.constant 0 : index
    %23 = vector.load %arg8[%c0_17, %c0_18] : memref<128x128xbf16, #tpu.memory_space<vmem>>, vector<128x128xbf16>
    tpu.vector_store %arg8[%c0_17, %c0_18], %22 {strides = array<i32>} : memref<128x128xbf16, #tpu.memory_space<vmem>>, vector<128x128xbf16>,
    return
  }
  func.func @transform_0(%arg0: i32) -> (i32, i32) {
    %c0_i32 = arith.constant 0 : i32
    %c0_i32_0 = arith.constant 0 : i32
    return %arg0, %c0_i32 : i32, i32
  }
  func.func @transform_1(%arg0: i32) -> (i32, i32) {
    %c0_i32 = arith.constant 0 : i32
    %c0_i32_0 = arith.constant 0 : i32
    %c0_i32_1 = arith.constant 0 : i32
    return %c0_i32, %c0_i32_0 : i32, i32
  }
  func.func @transform_2(%arg0: i32) -> (i32, i32) {
    %c0_i32 = arith.constant 0 : i32
    %c0_i32_0 = arith.constant 0 : i32
    %c0_i32_1 = arith.constant 0 : i32
    return %c0_i32, %c0_i32_0 : i32, i32
  }
  func.func @transform_3(%arg0: i32) -> (i32, i32) {
    %c0_i32 = arith.constant 0 : i32
    %c0_i32_0 = arith.constant 0 : i32
    %c0_i32_1 = arith.constant 0 : i32
    return %c0_i32, %c0_i32_0 : i32, i32
  }
  func.func @transform_4(%arg0: i32) -> (i32, i32) {
    %c0_i32 = arith.constant 0 : i32
    %c0_i32_0 = arith.constant 0 : i32
    %c0_i32_1 = arith.constant 0 : i32
    return %c0_i32, %c0_i32_0 : i32, i32
  }
  func.func @transform_5(%arg0: i32) -> (i32, i32) {
    %c0_i32 = arith.constant 0 : i32
    %c0_i32_0 = arith.constant 0 : i32
    %c0_i32_1 = arith.constant 0 : i32
    return %c0_i32, %c0_i32_0 : i32, i32
  }
  func.func @transform_6(%arg0: i32) -> (i32, i32) {
    %c0_i32 = arith.constant 0 : i32
    %c0_i32_0 = arith.constant 0 : i32
    return %arg0, %c0_i32 : i32, i32
  }
  func.func @transform_7(%arg0: i32) -> (i32, i32) {
    %c0_i32 = arith.constant 0 : i32
    %c0_i32_0 = arith.constant 0 : i32
    return %arg0, %c0_i32 : i32, i32
  }
}

module attributes {stable_mosaic.version = 11 : i64} {
  func.func @_conv_rows_kernel(%arg0: i32, %arg1: memref<12x16x240xbf16, #tpu.memory_space<vmem>>, %arg2: memref<5x240x128xbf16, #tpu.memory_space<vmem>>, %arg3: memref<1x128xf32, #tpu.memory_space<vmem>>, %arg4: memref<128x128xf32, #tpu.memory_space<vmem>>, %arg5: memref<128x128xf32, #tpu.memory_space<vmem>>) attributes {dimension_semantics = [#tpu.dimension_semantics<parallel>], iteration_bounds = array<i64: 4>, scalar_prefetch = 0 : i64, scratch_operands = 1 : i64, tpu.core_type = #tpu.core_type<tc>, window_params = [{transform_indices = @transform_0, window_bounds = array<i64: 12, 16, 240>}, {pipeline_mode = #tpu.pipeline_mode<synchronous>, transform_indices = @transform_1, window_bounds = array<i64: 5, 240, 128>}, {pipeline_mode = #tpu.pipeline_mode<synchronous>, transform_indices = @transform_2, window_bounds = array<i64: 1, 128>}, {transform_indices = @transform_3, window_bounds = array<i64: 128, 128>}]} {
    %cst = arith.constant 0.000000e+00 : f32
    %0 = vector.broadcast %cst : f32 to vector<128x128xf32>
    %c0 = arith.constant 0 : index
    %c0_0 = arith.constant 0 : index
    %1 = vector.load %arg5[%c0, %c0_0] : memref<128x128xf32, #tpu.memory_space<vmem>>, vector<128x128xf32>
    tpu.vector_store %arg5[%c0, %c0_0], %0 {strides = array<i32>} : memref<128x128xf32, #tpu.memory_space<vmem>>, vector<128x128xf32>,
    %c0_1 = arith.constant 0 : index
    %c0_2 = arith.constant 0 : index
    %c0_3 = arith.constant 0 : index
    %2 = vector.load %arg1[%c0_1, %c0_2, %c0_3] : memref<12x16x240xbf16, #tpu.memory_space<vmem>>, vector<8x16x240xbf16>
    %3 = vector.shape_cast %2 : vector<8x16x240xbf16> to vector<128x240xbf16>
    %c0_4 = arith.constant 0 : index
    %c0_5 = arith.constant 0 : index
    %4 = vector.load %arg5[%c0_4, %c0_5] : memref<128x128xf32, #tpu.memory_space<vmem>>, vector<128x128xf32>
    %c0_6 = arith.constant 0 : index
    %c0_7 = arith.constant 0 : index
    %c0_8 = arith.constant 0 : index
    %5 = vector.load %arg2[%c0_6, %c0_7, %c0_8] : memref<5x240x128xbf16, #tpu.memory_space<vmem>>, vector<1x240x128xbf16>
    %6 = vector.shape_cast %5 : vector<1x240x128xbf16> to vector<240x128xbf16>
    %cst_9 = arith.constant dense<0.000000e+00> : vector<128x128xf32>
    %7 = tpu.matmul %3, %6, %cst_9 {dimension_numbers = #tpu.dot_dimension_numbers<[1], [0], [0], [1], [0, 0, 1, 1], [], []>} : vector<128x240xbf16>, vector<240x128xbf16>, vector<128x128xf32> -> vector<128x128xf32>
    %8 = arith.addf %4, %7 : vector<128x128xf32>
    %c0_10 = arith.constant 0 : index
    %c0_11 = arith.constant 0 : index
    %9 = vector.load %arg5[%c0_10, %c0_11] : memref<128x128xf32, #tpu.memory_space<vmem>>, vector<128x128xf32>
    tpu.vector_store %arg5[%c0_10, %c0_11], %8 {strides = array<i32>} : memref<128x128xf32, #tpu.memory_space<vmem>>, vector<128x128xf32>,
    %c1 = arith.constant 1 : index
    %c0_12 = arith.constant 0 : index
    %c0_13 = arith.constant 0 : index
    %10 = vector.load %arg1[%c1, %c0_12, %c0_13] : memref<12x16x240xbf16, #tpu.memory_space<vmem>>, vector<8x16x240xbf16>
    %11 = vector.shape_cast %10 : vector<8x16x240xbf16> to vector<128x240xbf16>
    %c0_14 = arith.constant 0 : index
    %c0_15 = arith.constant 0 : index
    %12 = vector.load %arg5[%c0_14, %c0_15] : memref<128x128xf32, #tpu.memory_space<vmem>>, vector<128x128xf32>
    %c1_16 = arith.constant 1 : index
    %c0_17 = arith.constant 0 : index
    %c0_18 = arith.constant 0 : index
    %13 = vector.load %arg2[%c1_16, %c0_17, %c0_18] : memref<5x240x128xbf16, #tpu.memory_space<vmem>>, vector<1x240x128xbf16>
    %14 = vector.shape_cast %13 : vector<1x240x128xbf16> to vector<240x128xbf16>
    %cst_19 = arith.constant dense<0.000000e+00> : vector<128x128xf32>
    %15 = tpu.matmul %11, %14, %cst_19 {dimension_numbers = #tpu.dot_dimension_numbers<[1], [0], [0], [1], [0, 0, 1, 1], [], []>} : vector<128x240xbf16>, vector<240x128xbf16>, vector<128x128xf32> -> vector<128x128xf32>
    %16 = arith.addf %12, %15 : vector<128x128xf32>
    %c0_20 = arith.constant 0 : index
    %c0_21 = arith.constant 0 : index
    %17 = vector.load %arg5[%c0_20, %c0_21] : memref<128x128xf32, #tpu.memory_space<vmem>>, vector<128x128xf32>
    tpu.vector_store %arg5[%c0_20, %c0_21], %16 {strides = array<i32>} : memref<128x128xf32, #tpu.memory_space<vmem>>, vector<128x128xf32>,
    %c2 = arith.constant 2 : index
    %c0_22 = arith.constant 0 : index
    %c0_23 = arith.constant 0 : index
    %18 = vector.load %arg1[%c2, %c0_22, %c0_23] : memref<12x16x240xbf16, #tpu.memory_space<vmem>>, vector<8x16x240xbf16>
    %19 = vector.shape_cast %18 : vector<8x16x240xbf16> to vector<128x240xbf16>
    %c0_24 = arith.constant 0 : index
    %c0_25 = arith.constant 0 : index
    %20 = vector.load %arg5[%c0_24, %c0_25] : memref<128x128xf32, #tpu.memory_space<vmem>>, vector<128x128xf32>
    %c2_26 = arith.constant 2 : index
    %c0_27 = arith.constant 0 : index
    %c0_28 = arith.constant 0 : index
    %21 = vector.load %arg2[%c2_26, %c0_27, %c0_28] : memref<5x240x128xbf16, #tpu.memory_space<vmem>>, vector<1x240x128xbf16>
    %22 = vector.shape_cast %21 : vector<1x240x128xbf16> to vector<240x128xbf16>
    %cst_29 = arith.constant dense<0.000000e+00> : vector<128x128xf32>
    %23 = tpu.matmul %19, %22, %cst_29 {dimension_numbers = #tpu.dot_dimension_numbers<[1], [0], [0], [1], [0, 0, 1, 1], [], []>} : vector<128x240xbf16>, vector<240x128xbf16>, vector<128x128xf32> -> vector<128x128xf32>
    %24 = arith.addf %20, %23 : vector<128x128xf32>
    %c0_30 = arith.constant 0 : index
    %c0_31 = arith.constant 0 : index
    %25 = vector.load %arg5[%c0_30, %c0_31] : memref<128x128xf32, #tpu.memory_space<vmem>>, vector<128x128xf32>
    tpu.vector_store %arg5[%c0_30, %c0_31], %24 {strides = array<i32>} : memref<128x128xf32, #tpu.memory_space<vmem>>, vector<128x128xf32>,
    %c3 = arith.constant 3 : index
    %c0_32 = arith.constant 0 : index
    %c0_33 = arith.constant 0 : index
    %26 = vector.load %arg1[%c3, %c0_32, %c0_33] : memref<12x16x240xbf16, #tpu.memory_space<vmem>>, vector<8x16x240xbf16>
    %27 = vector.shape_cast %26 : vector<8x16x240xbf16> to vector<128x240xbf16>
    %c0_34 = arith.constant 0 : index
    %c0_35 = arith.constant 0 : index
    %28 = vector.load %arg5[%c0_34, %c0_35] : memref<128x128xf32, #tpu.memory_space<vmem>>, vector<128x128xf32>
    %c3_36 = arith.constant 3 : index
    %c0_37 = arith.constant 0 : index
    %c0_38 = arith.constant 0 : index
    %29 = vector.load %arg2[%c3_36, %c0_37, %c0_38] : memref<5x240x128xbf16, #tpu.memory_space<vmem>>, vector<1x240x128xbf16>
    %30 = vector.shape_cast %29 : vector<1x240x128xbf16> to vector<240x128xbf16>
    %cst_39 = arith.constant dense<0.000000e+00> : vector<128x128xf32>
    %31 = tpu.matmul %27, %30, %cst_39 {dimension_numbers = #tpu.dot_dimension_numbers<[1], [0], [0], [1], [0, 0, 1, 1], [], []>} : vector<128x240xbf16>, vector<240x128xbf16>, vector<128x128xf32> -> vector<128x128xf32>
    %32 = arith.addf %28, %31 : vector<128x128xf32>
    %c0_40 = arith.constant 0 : index
    %c0_41 = arith.constant 0 : index
    %33 = vector.load %arg5[%c0_40, %c0_41] : memref<128x128xf32, #tpu.memory_space<vmem>>, vector<128x128xf32>
    tpu.vector_store %arg5[%c0_40, %c0_41], %32 {strides = array<i32>} : memref<128x128xf32, #tpu.memory_space<vmem>>, vector<128x128xf32>,
    %c4 = arith.constant 4 : index
    %c0_42 = arith.constant 0 : index
    %c0_43 = arith.constant 0 : index
    %34 = vector.load %arg1[%c4, %c0_42, %c0_43] : memref<12x16x240xbf16, #tpu.memory_space<vmem>>, vector<8x16x240xbf16>
    %35 = vector.shape_cast %34 : vector<8x16x240xbf16> to vector<128x240xbf16>
    %c0_44 = arith.constant 0 : index
    %c0_45 = arith.constant 0 : index
    %36 = vector.load %arg5[%c0_44, %c0_45] : memref<128x128xf32, #tpu.memory_space<vmem>>, vector<128x128xf32>
    %c4_46 = arith.constant 4 : index
    %c0_47 = arith.constant 0 : index
    %c0_48 = arith.constant 0 : index
    %37 = vector.load %arg2[%c4_46, %c0_47, %c0_48] : memref<5x240x128xbf16, #tpu.memory_space<vmem>>, vector<1x240x128xbf16>
    %38 = vector.shape_cast %37 : vector<1x240x128xbf16> to vector<240x128xbf16>
    %cst_49 = arith.constant dense<0.000000e+00> : vector<128x128xf32>
    %39 = tpu.matmul %35, %38, %cst_49 {dimension_numbers = #tpu.dot_dimension_numbers<[1], [0], [0], [1], [0, 0, 1, 1], [], []>} : vector<128x240xbf16>, vector<240x128xbf16>, vector<128x128xf32> -> vector<128x128xf32>
    %40 = arith.addf %36, %39 : vector<128x128xf32>
    %c0_50 = arith.constant 0 : index
    %c0_51 = arith.constant 0 : index
    %41 = vector.load %arg5[%c0_50, %c0_51] : memref<128x128xf32, #tpu.memory_space<vmem>>, vector<128x128xf32>
    tpu.vector_store %arg5[%c0_50, %c0_51], %40 {strides = array<i32>} : memref<128x128xf32, #tpu.memory_space<vmem>>, vector<128x128xf32>,
    %c0_52 = arith.constant 0 : index
    %c0_53 = arith.constant 0 : index
    %42 = vector.load %arg5[%c0_52, %c0_53] : memref<128x128xf32, #tpu.memory_space<vmem>>, vector<128x128xf32>
    %c0_54 = arith.constant 0 : index
    %c0_55 = arith.constant 0 : index
    %43 = vector.load %arg3[%c0_54, %c0_55] : memref<1x128xf32, #tpu.memory_space<vmem>>, vector<1x128xf32>
    %44 = vector.broadcast %43 : vector<1x128xf32> to vector<128x128xf32>
    %45 = arith.addf %42, %44 : vector<128x128xf32>
    %cst_56 = arith.constant 0.000000e+00 : f32
    %46 = vector.broadcast %cst_56 : f32 to vector<128x128xf32>
    %47 = arith.maximumf %45, %46 : vector<128x128xf32>
    %c0_57 = arith.constant 0 : index
    %c0_58 = arith.constant 0 : index
    %48 = vector.load %arg4[%c0_57, %c0_58] : memref<128x128xf32, #tpu.memory_space<vmem>>, vector<128x128xf32>
    tpu.vector_store %arg4[%c0_57, %c0_58], %47 {strides = array<i32>} : memref<128x128xf32, #tpu.memory_space<vmem>>, vector<128x128xf32>,
    return
  }
  func.func @transform_0(%arg0: i32) -> (i32, i32, i32) {
    %c0_i32 = arith.constant 0 : i32
    %c0_i32_0 = arith.constant 0 : i32
    %c0_i32_1 = arith.constant 0 : i32
    return %arg0, %c0_i32, %c0_i32_0 : i32, i32, i32
  }
  func.func @transform_1(%arg0: i32) -> (i32, i32, i32) {
    %c0_i32 = arith.constant 0 : i32
    %c0_i32_0 = arith.constant 0 : i32
    %c0_i32_1 = arith.constant 0 : i32
    %c0_i32_2 = arith.constant 0 : i32
    return %c0_i32, %c0_i32_0, %c0_i32_1 : i32, i32, i32
  }
  func.func @transform_2(%arg0: i32) -> (i32, i32) {
    %c0_i32 = arith.constant 0 : i32
    %c0_i32_0 = arith.constant 0 : i32
    %c0_i32_1 = arith.constant 0 : i32
    return %c0_i32, %c0_i32_0 : i32, i32
  }
  func.func @transform_3(%arg0: i32) -> (i32, i32) {
    %c0_i32 = arith.constant 0 : i32
    %c0_i32_0 = arith.constant 0 : i32
    return %arg0, %c0_i32 : i32, i32
  }
}

module attributes {stable_mosaic.version = 11 : i64} {
  func.func @_double_conv3x3_kernel(%arg0: i32, %arg1: memref<18x16x192xbf16, #tpu.memory_space<vmem>>, %arg2: memref<3x192x128xbf16, #tpu.memory_space<vmem>>, %arg3: memref<1x128xf32, #tpu.memory_space<vmem>>, %arg4: memref<3x384x128xbf16, #tpu.memory_space<vmem>>, %arg5: memref<1x128xf32, #tpu.memory_space<vmem>>, %arg6: memref<256x128xf32, #tpu.memory_space<vmem>>, %arg7: memref<18x16x384xbf16, #tpu.memory_space<vmem>>, %arg8: memref<256x128xf32, #tpu.memory_space<vmem>>) attributes {dimension_semantics = [#tpu.dimension_semantics<parallel>], iteration_bounds = array<i64: 2>, scalar_prefetch = 0 : i64, scratch_operands = 2 : i64, tpu.core_type = #tpu.core_type<tc>, window_params = [{transform_indices = @transform_0, window_bounds = array<i64: 18, 16, 192>}, {pipeline_mode = #tpu.pipeline_mode<synchronous>, transform_indices = @transform_1, window_bounds = array<i64: 3, 192, 128>}, {pipeline_mode = #tpu.pipeline_mode<synchronous>, transform_indices = @transform_2, window_bounds = array<i64: 1, 128>}, {pipeline_mode = #tpu.pipeline_mode<synchronous>, transform_indices = @transform_3, window_bounds = array<i64: 3, 384, 128>}, {pipeline_mode = #tpu.pipeline_mode<synchronous>, transform_indices = @transform_4, window_bounds = array<i64: 1, 128>}, {transform_indices = @transform_5, window_bounds = array<i64: 256, 128>}]} {
    %cst = arith.constant 0.000000e+00 : f32
    %0 = vector.broadcast %cst : f32 to vector<256x128xf32>
    %c0 = arith.constant 0 : index
    %c0_0 = arith.constant 0 : index
    %1 = vector.load %arg8[%c0, %c0_0] : memref<256x128xf32, #tpu.memory_space<vmem>>, vector<256x128xf32>
    tpu.vector_store %arg8[%c0, %c0_0], %0 {strides = array<i32>} : memref<256x128xf32, #tpu.memory_space<vmem>>, vector<256x128xf32>,
    %c0_1 = arith.constant 0 : index
    %c0_2 = arith.constant 0 : index
    %c0_3 = arith.constant 0 : index
    %2 = vector.load %arg1[%c0_1, %c0_2, %c0_3] : memref<18x16x192xbf16, #tpu.memory_space<vmem>>, vector<16x16x192xbf16>
    %3 = vector.shape_cast %2 : vector<16x16x192xbf16> to vector<256x192xbf16>
    %c0_4 = arith.constant 0 : index
    %c0_5 = arith.constant 0 : index
    %4 = vector.load %arg8[%c0_4, %c0_5] : memref<256x128xf32, #tpu.memory_space<vmem>>, vector<256x128xf32>
    %c0_6 = arith.constant 0 : index
    %c0_7 = arith.constant 0 : index
    %c0_8 = arith.constant 0 : index
    %5 = vector.load %arg2[%c0_6, %c0_7, %c0_8] : memref<3x192x128xbf16, #tpu.memory_space<vmem>>, vector<1x192x128xbf16>
    %6 = vector.shape_cast %5 : vector<1x192x128xbf16> to vector<192x128xbf16>
    %cst_9 = arith.constant dense<0.000000e+00> : vector<256x128xf32>
    %7 = tpu.matmul %3, %6, %cst_9 {dimension_numbers = #tpu.dot_dimension_numbers<[1], [0], [0], [1], [0, 0, 1, 1], [], []>} : vector<256x192xbf16>, vector<192x128xbf16>, vector<256x128xf32> -> vector<256x128xf32>
    %8 = arith.addf %4, %7 : vector<256x128xf32>
    %c0_10 = arith.constant 0 : index
    %c0_11 = arith.constant 0 : index
    %9 = vector.load %arg8[%c0_10, %c0_11] : memref<256x128xf32, #tpu.memory_space<vmem>>, vector<256x128xf32>
    tpu.vector_store %arg8[%c0_10, %c0_11], %8 {strides = array<i32>} : memref<256x128xf32, #tpu.memory_space<vmem>>, vector<256x128xf32>,
    %c1 = arith.constant 1 : index
    %c0_12 = arith.constant 0 : index
    %c0_13 = arith.constant 0 : index
    %10 = vector.load %arg1[%c1, %c0_12, %c0_13] : memref<18x16x192xbf16, #tpu.memory_space<vmem>>, vector<16x16x192xbf16>
    %11 = vector.shape_cast %10 : vector<16x16x192xbf16> to vector<256x192xbf16>
    %c0_14 = arith.constant 0 : index
    %c0_15 = arith.constant 0 : index
    %12 = vector.load %arg8[%c0_14, %c0_15] : memref<256x128xf32, #tpu.memory_space<vmem>>, vector<256x128xf32>
    %c1_16 = arith.constant 1 : index
    %c0_17 = arith.constant 0 : index
    %c0_18 = arith.constant 0 : index
    %13 = vector.load %arg2[%c1_16, %c0_17, %c0_18] : memref<3x192x128xbf16, #tpu.memory_space<vmem>>, vector<1x192x128xbf16>
    %14 = vector.shape_cast %13 : vector<1x192x128xbf16> to vector<192x128xbf16>
    %cst_19 = arith.constant dense<0.000000e+00> : vector<256x128xf32>
    %15 = tpu.matmul %11, %14, %cst_19 {dimension_numbers = #tpu.dot_dimension_numbers<[1], [0], [0], [1], [0, 0, 1, 1], [], []>} : vector<256x192xbf16>, vector<192x128xbf16>, vector<256x128xf32> -> vector<256x128xf32>
    %16 = arith.addf %12, %15 : vector<256x128xf32>
    %c0_20 = arith.constant 0 : index
    %c0_21 = arith.constant 0 : index
    %17 = vector.load %arg8[%c0_20, %c0_21] : memref<256x128xf32, #tpu.memory_space<vmem>>, vector<256x128xf32>
    tpu.vector_store %arg8[%c0_20, %c0_21], %16 {strides = array<i32>} : memref<256x128xf32, #tpu.memory_space<vmem>>, vector<256x128xf32>,
    %c2 = arith.constant 2 : index
    %c0_22 = arith.constant 0 : index
    %c0_23 = arith.constant 0 : index
    %18 = vector.load %arg1[%c2, %c0_22, %c0_23] : memref<18x16x192xbf16, #tpu.memory_space<vmem>>, vector<16x16x192xbf16>
    %19 = vector.shape_cast %18 : vector<16x16x192xbf16> to vector<256x192xbf16>
    %c0_24 = arith.constant 0 : index
    %c0_25 = arith.constant 0 : index
    %20 = vector.load %arg8[%c0_24, %c0_25] : memref<256x128xf32, #tpu.memory_space<vmem>>, vector<256x128xf32>
    %c2_26 = arith.constant 2 : index
    %c0_27 = arith.constant 0 : index
    %c0_28 = arith.constant 0 : index
    %21 = vector.load %arg2[%c2_26, %c0_27, %c0_28] : memref<3x192x128xbf16, #tpu.memory_space<vmem>>, vector<1x192x128xbf16>
    %22 = vector.shape_cast %21 : vector<1x192x128xbf16> to vector<192x128xbf16>
    %cst_29 = arith.constant dense<0.000000e+00> : vector<256x128xf32>
    %23 = tpu.matmul %19, %22, %cst_29 {dimension_numbers = #tpu.dot_dimension_numbers<[1], [0], [0], [1], [0, 0, 1, 1], [], []>} : vector<256x192xbf16>, vector<192x128xbf16>, vector<256x128xf32> -> vector<256x128xf32>
    %24 = arith.addf %20, %23 : vector<256x128xf32>
    %c0_30 = arith.constant 0 : index
    %c0_31 = arith.constant 0 : index
    %25 = vector.load %arg8[%c0_30, %c0_31] : memref<256x128xf32, #tpu.memory_space<vmem>>, vector<256x128xf32>
    tpu.vector_store %arg8[%c0_30, %c0_31], %24 {strides = array<i32>} : memref<256x128xf32, #tpu.memory_space<vmem>>, vector<256x128xf32>,
    %c0_32 = arith.constant 0 : index
    %c0_33 = arith.constant 0 : index
    %26 = vector.load %arg8[%c0_32, %c0_33] : memref<256x128xf32, #tpu.memory_space<vmem>>, vector<256x128xf32>
    %c0_34 = arith.constant 0 : index
    %c0_35 = arith.constant 0 : index
    %27 = vector.load %arg3[%c0_34, %c0_35] : memref<1x128xf32, #tpu.memory_space<vmem>>, vector<1x128xf32>
    %28 = vector.broadcast %27 : vector<1x128xf32> to vector<256x128xf32>
    %29 = arith.addf %26, %28 : vector<256x128xf32>
    %cst_36 = arith.constant 0.000000e+00 : f32
    %30 = vector.broadcast %cst_36 : f32 to vector<256x128xf32>
    %31 = arith.maximumf %29, %30 : vector<256x128xf32>
    %32 = vector.shape_cast %31 : vector<256x128xf32> to vector<16x16x128xf32>
    %33 = tpu.iota {dimensions = array<i32: 1>} : vector<1x16x128xi32>
    %c1_i32 = arith.constant 1 : i32
    %34 = vector.broadcast %c1_i32 : i32 to vector<1x16x128xi32>
    %35 = arith.cmpi sge, %33, %34 : vector<1x16x128xi32>
    %c1_i32_37 = arith.constant 1 : i32
    %36 = tpu.dynamic_rotate %32 by %c1_i32_37 dim 1 : vector<16x16x128xf32>, i32 -> vector<16x16x128xf32>
    %cst_38 = arith.constant 0.000000e+00 : f32
    %37 = vector.broadcast %cst_38 : f32 to vector<16x16x128xf32>
    %38 = vector.shape_cast %35 : vector<1x16x128xi1> to vector<1x16x128xi1>
    %39 = vector.broadcast %38 : vector<1x16x128xi1> to vector<16x16x128xi1>
    %40 = arith.select %39, %36, %37 : vector<16x16x128xi1>, vector<16x16x128xf32>
    %c14_i32 = arith.constant 14 : i32
    %41 = vector.broadcast %c14_i32 : i32 to vector<1x16x128xi32>
    %42 = arith.cmpi sle, %33, %41 : vector<1x16x128xi32>
    %c15_i32 = arith.constant 15 : i32
    %43 = tpu.dynamic_rotate %32 by %c15_i32 dim 1 : vector<16x16x128xf32>, i32 -> vector<16x16x128xf32>
    %cst_39 = arith.constant 0.000000e+00 : f32
    %44 = vector.broadcast %cst_39 : f32 to vector<16x16x128xf32>
    %45 = vector.shape_cast %42 : vector<1x16x128xi1> to vector<1x16x128xi1>
    %46 = vector.broadcast %45 : vector<1x16x128xi1> to vector<16x16x128xi1>
    %47 = arith.select %46, %43, %44 : vector<16x16x128xi1>, vector<16x16x128xf32>
    %cst_40 = arith.constant 0.000000e+00 : bf16
    %48 = vector.broadcast %cst_40 : bf16 to vector<1x16x384xbf16>
    %c0_41 = arith.constant 0 : index
    %c0_42 = arith.constant 0 : index
    %c0_43 = arith.constant 0 : index
    %49 = vector.load %arg7[%c0_41, %c0_42, %c0_43] : memref<18x16x384xbf16, #tpu.memory_space<vmem>>, vector<1x16x384xbf16>
    tpu.vector_store %arg7[%c0_41, %c0_42, %c0_43], %48 {strides = array<i32>} : memref<18x16x384xbf16, #tpu.memory_space<vmem>>, vector<1x16x384xbf16>,
    %c17 = arith.constant 17 : index
    %c0_44 = arith.constant 0 : index
    %c0_45 = arith.constant 0 : index
    %50 = vector.load %arg7[%c17, %c0_44, %c0_45] : memref<18x16x384xbf16, #tpu.memory_space<vmem>>, vector<1x16x384xbf16>
    tpu.vector_store %arg7[%c17, %c0_44, %c0_45], %48 {strides = array<i32>} : memref<18x16x384xbf16, #tpu.memory_space<vmem>>, vector<1x16x384xbf16>,
    %51 = arith.truncf %40 : vector<16x16x128xf32> to vector<16x16x128xbf16>
    %c1_46 = arith.constant 1 : index
    %c0_47 = arith.constant 0 : index
    %c0_48 = arith.constant 0 : index
    %52 = vector.load %arg7[%c1_46, %c0_47, %c0_48] : memref<18x16x384xbf16, #tpu.memory_space<vmem>>, vector<16x16x128xbf16>
    tpu.vector_store %arg7[%c1_46, %c0_47, %c0_48], %51 {strides = array<i32>} : memref<18x16x384xbf16, #tpu.memory_space<vmem>>, vector<16x16x128xbf16>,
    %53 = arith.truncf %32 : vector<16x16x128xf32> to vector<16x16x128xbf16>
    %c1_49 = arith.constant 1 : index
    %c0_50 = arith.constant 0 : index
    %c128 = arith.constant 128 : index
    %54 = vector.load %arg7[%c1_49, %c0_50, %c128] : memref<18x16x384xbf16, #tpu.memory_space<vmem>>, vector<16x16x128xbf16>
    tpu.vector_store %arg7[%c1_49, %c0_50, %c128], %53 {strides = array<i32>} : memref<18x16x384xbf16, #tpu.memory_space<vmem>>, vector<16x16x128xbf16>,
    %55 = arith.truncf %47 : vector<16x16x128xf32> to vector<16x16x128xbf16>
    %c1_51 = arith.constant 1 : index
    %c0_52 = arith.constant 0 : index
    %c256 = arith.constant 256 : index
    %56 = vector.load %arg7[%c1_51, %c0_52, %c256] : memref<18x16x384xbf16, #tpu.memory_space<vmem>>, vector<16x16x128xbf16>
    tpu.vector_store %arg7[%c1_51, %c0_52, %c256], %55 {strides = array<i32>} : memref<18x16x384xbf16, #tpu.memory_space<vmem>>, vector<16x16x128xbf16>,
    %cst_53 = arith.constant 0.000000e+00 : f32
    %57 = vector.broadcast %cst_53 : f32 to vector<256x128xf32>
    %c0_54 = arith.constant 0 : index
    %c0_55 = arith.constant 0 : index
    %58 = vector.load %arg8[%c0_54, %c0_55] : memref<256x128xf32, #tpu.memory_space<vmem>>, vector<256x128xf32>
    tpu.vector_store %arg8[%c0_54, %c0_55], %57 {strides = array<i32>} : memref<256x128xf32, #tpu.memory_space<vmem>>, vector<256x128xf32>,
    %c0_56 = arith.constant 0 : index
    %c0_57 = arith.constant 0 : index
    %c0_58 = arith.constant 0 : index
    %59 = vector.load %arg7[%c0_56, %c0_57, %c0_58] : memref<18x16x384xbf16, #tpu.memory_space<vmem>>, vector<16x16x384xbf16>
    %60 = vector.shape_cast %59 : vector<16x16x384xbf16> to vector<256x384xbf16>
    %c0_59 = arith.constant 0 : index
    %c0_60 = arith.constant 0 : index
    %61 = vector.load %arg8[%c0_59, %c0_60] : memref<256x128xf32, #tpu.memory_space<vmem>>, vector<256x128xf32>
    %c0_61 = arith.constant 0 : index
    %c0_62 = arith.constant 0 : index
    %c0_63 = arith.constant 0 : index
    %62 = vector.load %arg4[%c0_61, %c0_62, %c0_63] : memref<3x384x128xbf16, #tpu.memory_space<vmem>>, vector<1x384x128xbf16>
    %63 = vector.shape_cast %62 : vector<1x384x128xbf16> to vector<384x128xbf16>
    %cst_64 = arith.constant dense<0.000000e+00> : vector<256x128xf32>
    %64 = tpu.matmul %60, %63, %cst_64 {dimension_numbers = #tpu.dot_dimension_numbers<[1], [0], [0], [1], [0, 0, 1, 1], [], []>} : vector<256x384xbf16>, vector<384x128xbf16>, vector<256x128xf32> -> vector<256x128xf32>
    %65 = arith.addf %61, %64 : vector<256x128xf32>
    %c0_65 = arith.constant 0 : index
    %c0_66 = arith.constant 0 : index
    %66 = vector.load %arg8[%c0_65, %c0_66] : memref<256x128xf32, #tpu.memory_space<vmem>>, vector<256x128xf32>
    tpu.vector_store %arg8[%c0_65, %c0_66], %65 {strides = array<i32>} : memref<256x128xf32, #tpu.memory_space<vmem>>, vector<256x128xf32>,
    %c1_67 = arith.constant 1 : index
    %c0_68 = arith.constant 0 : index
    %c0_69 = arith.constant 0 : index
    %67 = vector.load %arg7[%c1_67, %c0_68, %c0_69] : memref<18x16x384xbf16, #tpu.memory_space<vmem>>, vector<16x16x384xbf16>
    %68 = vector.shape_cast %67 : vector<16x16x384xbf16> to vector<256x384xbf16>
    %c0_70 = arith.constant 0 : index
    %c0_71 = arith.constant 0 : index
    %69 = vector.load %arg8[%c0_70, %c0_71] : memref<256x128xf32, #tpu.memory_space<vmem>>, vector<256x128xf32>
    %c1_72 = arith.constant 1 : index
    %c0_73 = arith.constant 0 : index
    %c0_74 = arith.constant 0 : index
    %70 = vector.load %arg4[%c1_72, %c0_73, %c0_74] : memref<3x384x128xbf16, #tpu.memory_space<vmem>>, vector<1x384x128xbf16>
    %71 = vector.shape_cast %70 : vector<1x384x128xbf16> to vector<384x128xbf16>
    %cst_75 = arith.constant dense<0.000000e+00> : vector<256x128xf32>
    %72 = tpu.matmul %68, %71, %cst_75 {dimension_numbers = #tpu.dot_dimension_numbers<[1], [0], [0], [1], [0, 0, 1, 1], [], []>} : vector<256x384xbf16>, vector<384x128xbf16>, vector<256x128xf32> -> vector<256x128xf32>
    %73 = arith.addf %69, %72 : vector<256x128xf32>
    %c0_76 = arith.constant 0 : index
    %c0_77 = arith.constant 0 : index
    %74 = vector.load %arg8[%c0_76, %c0_77] : memref<256x128xf32, #tpu.memory_space<vmem>>, vector<256x128xf32>
    tpu.vector_store %arg8[%c0_76, %c0_77], %73 {strides = array<i32>} : memref<256x128xf32, #tpu.memory_space<vmem>>, vector<256x128xf32>,
    %c2_78 = arith.constant 2 : index
    %c0_79 = arith.constant 0 : index
    %c0_80 = arith.constant 0 : index
    %75 = vector.load %arg7[%c2_78, %c0_79, %c0_80] : memref<18x16x384xbf16, #tpu.memory_space<vmem>>, vector<16x16x384xbf16>
    %76 = vector.shape_cast %75 : vector<16x16x384xbf16> to vector<256x384xbf16>
    %c0_81 = arith.constant 0 : index
    %c0_82 = arith.constant 0 : index
    %77 = vector.load %arg8[%c0_81, %c0_82] : memref<256x128xf32, #tpu.memory_space<vmem>>, vector<256x128xf32>
    %c2_83 = arith.constant 2 : index
    %c0_84 = arith.constant 0 : index
    %c0_85 = arith.constant 0 : index
    %78 = vector.load %arg4[%c2_83, %c0_84, %c0_85] : memref<3x384x128xbf16, #tpu.memory_space<vmem>>, vector<1x384x128xbf16>
    %79 = vector.shape_cast %78 : vector<1x384x128xbf16> to vector<384x128xbf16>
    %cst_86 = arith.constant dense<0.000000e+00> : vector<256x128xf32>
    %80 = tpu.matmul %76, %79, %cst_86 {dimension_numbers = #tpu.dot_dimension_numbers<[1], [0], [0], [1], [0, 0, 1, 1], [], []>} : vector<256x384xbf16>, vector<384x128xbf16>, vector<256x128xf32> -> vector<256x128xf32>
    %81 = arith.addf %77, %80 : vector<256x128xf32>
    %c0_87 = arith.constant 0 : index
    %c0_88 = arith.constant 0 : index
    %82 = vector.load %arg8[%c0_87, %c0_88] : memref<256x128xf32, #tpu.memory_space<vmem>>, vector<256x128xf32>
    tpu.vector_store %arg8[%c0_87, %c0_88], %81 {strides = array<i32>} : memref<256x128xf32, #tpu.memory_space<vmem>>, vector<256x128xf32>,
    %c0_89 = arith.constant 0 : index
    %c0_90 = arith.constant 0 : index
    %83 = vector.load %arg8[%c0_89, %c0_90] : memref<256x128xf32, #tpu.memory_space<vmem>>, vector<256x128xf32>
    %c0_91 = arith.constant 0 : index
    %c0_92 = arith.constant 0 : index
    %84 = vector.load %arg5[%c0_91, %c0_92] : memref<1x128xf32, #tpu.memory_space<vmem>>, vector<1x128xf32>
    %85 = vector.broadcast %84 : vector<1x128xf32> to vector<256x128xf32>
    %86 = arith.addf %83, %85 : vector<256x128xf32>
    %cst_93 = arith.constant 0.000000e+00 : f32
    %87 = vector.broadcast %cst_93 : f32 to vector<256x128xf32>
    %88 = arith.maximumf %86, %87 : vector<256x128xf32>
    %c0_94 = arith.constant 0 : index
    %c0_95 = arith.constant 0 : index
    %89 = vector.load %arg6[%c0_94, %c0_95] : memref<256x128xf32, #tpu.memory_space<vmem>>, vector<256x128xf32>
    tpu.vector_store %arg6[%c0_94, %c0_95], %88 {strides = array<i32>} : memref<256x128xf32, #tpu.memory_space<vmem>>, vector<256x128xf32>,
    return
  }
  func.func @transform_0(%arg0: i32) -> (i32, i32, i32) {
    %c0_i32 = arith.constant 0 : i32
    %c0_i32_0 = arith.constant 0 : i32
    %c0_i32_1 = arith.constant 0 : i32
    return %arg0, %c0_i32, %c0_i32_0 : i32, i32, i32
  }
  func.func @transform_1(%arg0: i32) -> (i32, i32, i32) {
    %c0_i32 = arith.constant 0 : i32
    %c0_i32_0 = arith.constant 0 : i32
    %c0_i32_1 = arith.constant 0 : i32
    %c0_i32_2 = arith.constant 0 : i32
    return %c0_i32, %c0_i32_0, %c0_i32_1 : i32, i32, i32
  }
  func.func @transform_2(%arg0: i32) -> (i32, i32) {
    %c0_i32 = arith.constant 0 : i32
    %c0_i32_0 = arith.constant 0 : i32
    %c0_i32_1 = arith.constant 0 : i32
    return %c0_i32, %c0_i32_0 : i32, i32
  }
  func.func @transform_3(%arg0: i32) -> (i32, i32, i32) {
    %c0_i32 = arith.constant 0 : i32
    %c0_i32_0 = arith.constant 0 : i32
    %c0_i32_1 = arith.constant 0 : i32
    %c0_i32_2 = arith.constant 0 : i32
    return %c0_i32, %c0_i32_0, %c0_i32_1 : i32, i32, i32
  }
  func.func @transform_4(%arg0: i32) -> (i32, i32) {
    %c0_i32 = arith.constant 0 : i32
    %c0_i32_0 = arith.constant 0 : i32
    %c0_i32_1 = arith.constant 0 : i32
    return %c0_i32, %c0_i32_0 : i32, i32
  }
  func.func @transform_5(%arg0: i32) -> (i32, i32) {
    %c0_i32 = arith.constant 0 : i32
    %c0_i32_0 = arith.constant 0 : i32
    return %arg0, %c0_i32 : i32, i32
  }
}

</mosaic_0001>

<bundles_post_ra>
// kernel: inception_block_a.3
= control target key start
LH: loop header
LB: loop body
LE: loop exit
PB: predicated region body
PF: predicated region fallthrough
CT: control target
= control target key end

     0   :  { %s1093_s24 = smov 0   ;;  %s1251_s0 = inlined_call_operand.vmem [shape: bf16[512,4], index: 0, kind: input, shape index: {}]   ;;  %s1252_s1 = inlined_call_operand.vmem [shape: bf16[4,128], index: 1, kind: input, shape index: {}]   ;;  %s1253_s2 = inlined_call_operand.vmem [shape: f32[1,128], index: 2, kind: input, shape index: {}]   ;;  %s1254_s3 = inlined_call_operand.vmem [shape: f32[1,128], index: 3, kind: input, shape index: {}]   ;;  %s1255_s4 = inlined_call_operand.vmem [shape: bf16[4,128], index: 4, kind: input, shape index: {}]   ;;  %s1256_s5 = inlined_call_operand.vmem [shape: f32[1,128], index: 5, kind: input, shape index: {}]   ;;  %s1257_s6 = inlined_call_operand.vmem [shape: f32[512,128], index: 6, kind: output, shape index: {0}]   ;;  %s1258_s7 = inlined_call_operand.vmem [shape: bf16[512,128], index: 7, kind: output, shape index: {1}]  }
   0x1 LB: > { %s853_s25 = sadd.s32 4294967295, %s1050_s24   ;;  %p857_p0 = scmp.ge.s32.totalorder %s1050_s24, 1  ;;  %s1050_s24 = sphi %s1093_s24, %s18_s24  }
   0x2   : > { %p241_p1 = scmp.lt.s32.totalorder %s1050_s24, 5 }
   0x4   : > { %p242_p2 = pnand %p857_p0, %p241_p1 }
   0x5   : > { %v313_v0 = vld [vmem:[%s1252_s1] sm:$0x3] (!%p242_p2)  ;;  %vm379_vm0 = vcmask (!%p242_p2), 1041408   ;;  %s858_s30 = sshll.u32 (!%p242_p2), %s853_s25, 4  ;;  %vm354_vm1 = vcmask (!%p242_p2), 31744   ;;  %v523_v12 = vlaneseq (!%p242_p2)  ;;  %v1052_v16 = vmov (!%p242_p2), 0  }
   0x6   : > { %245 = sbr.rel (%p242_p2) target bundleno = 264 (0x108), region = 44  ;;  %v480_v1 = vld [vmem:[%s1255_s4] sm:$0x3] (!%p242_p2)  ;;  %1025 = vmatprep.subr.msk.bf16.mxu0 (!%p242_p2), %vm379_vm0, %v313_v0  ;;  %v381_v2 = vsel (!%p242_p2), %vm379_vm0, %v313_v0, 0  ;;  %p279_p3 = scmp.lt.s32.totalorder (!%p242_p2), %s858_s30, 63 }
   0x7   : > { %1026 = vmatprep.subr.msk.bf16.mxu1 (!%p242_p2), %vm379_vm0, %v480_v1  ;;  %v568_v3 = vsel (!%p242_p2), %vm379_vm0, %v480_v1, 0  ;;  %990 = vmatpush3.bf16.msra.mxu0 (!%p242_p2), %v381_v2  ;;  %v504_v13 = vld [vmem:[%s1254_s3] sm:$0x1] (!%p242_p2)  ;;  %v524_v14 = vshrl.u32 (!%p242_p2), %v523_v12, 7 }
   0x8   : > { %1008 = vmatpush3.bf16.msra.mxu1 (!%p242_p2), %v568_v3  ;;  %vm505_vm2 = vcmp.gt.f32.partialorder (!%p242_p2), %v504_v13, 0.0  ;;  %v1137_v18 = vld [vmem:[%s1253_s2] ss:$0 sm:$0xff] (!%p242_p2) }
   0x9   : > { %v525_v15 = vsub.s32 (!%p242_p2), 0, %v524_v14  ;;  %v522_v17 = vsel (!%p242_p2), %vm505_vm2, 1, %v1052_v16  ;;  %v1144_v20 = vld [vmem:[%s1256_s5] ss:$0 sm:$0xff] (!%p242_p2) }
   0xb   : > { %v1139_v19 = vrot.slane (!%p242_p2), %v522_v17, %v525_v15 }
   0xd   : > { %s1260_s30 = smov (!%p279_p3, %s858_s30), 63  ;;  %vm527_vm3 = vcmp.eq.s32.totalorder %v1139_v19, 1 }
   0xe   : > { %s859_s8 = sshll.u32 %s1260_s30, 2  ;;  %s861_s18 = sshll.u32 %s1260_s30, 3 }
   0xf   : > { %s282_s11 = scalar_lea.vmem %s1251_s0, %s859_s8  ;;  %s1155_s21 = scalar_lea.vmem %s1257_s6, %s861_s18 }
  0x10   : > { %v1036_v4 = vld [vmem:[%s282_s11] sm:$0xff]   ;;  %v1037_v5 = vld [vmem:[%s282_s11 + $0x8] sm:$0xff]   ;;  %v1038_v6 = vld [vmem:[%s282_s11 + $0x10] sm:$0xff]   ;;  %s1171_s25 = scalar_lea.vmem %s1258_s7, %s859_s8 }
  0x11   : > { %991 = vmatprep.mubr.msk.bf16.mxu0 %vm354_vm1, %v1036_v4  ;;  %1009 = vmatprep.mubr.msk.bf16.mxu1 %vm354_vm1, %v1036_v4  ;;  %v1039_v7 = vld [vmem:[%s282_s11 + $0x18] sm:$0xff]   ;;  %v1040_v8 = vld [vmem:[%s282_s11 + $0x20] sm:$0xff]   ;;  %v1041_v9 = vld [vmem:[%s282_s11 + $0x28] sm:$0xff]  }
  0x12   : > { %992 = vmatmul.mubr.msk.bf16.vlgmr.msra.gmra.mrb[0].mxu0 %vm354_vm1, %v1037_v5  ;;  %1010 = vmatmul.mubr.msk.bf16.vlgmr.msra.gmra.mrb[0].mxu1 %vm354_vm1, %v1037_v5  ;;  %v1042_v10 = vld [vmem:[%s282_s11 + $0x30] sm:$0xff]   ;;  %v1043_v11 = vld [vmem:[%s282_s11 + $0x38] sm:$0xff]  }
  0x13   : > { %995 = vmatprep.mubr.msk.bf16.mxu0 %vm354_vm1, %v1038_v6  ;;  %1013 = vmatprep.mubr.msk.bf16.mxu1 %vm354_vm1, %v1038_v6 }
  0x1a   : > { %996 = vmatmul.mubr.msk.bf16.gmra.mrb[4].mxu0 %vm354_vm1, %v1039_v7  ;;  %1014 = vmatmul.mubr.msk.bf16.gmra.mrb[4].mxu1 %vm354_vm1, %v1039_v7 }
  0x1b   : > { %999 = vmatprep.mubr.msk.bf16.mxu0 %vm354_vm1, %v1040_v8  ;;  %1017 = vmatprep.mubr.msk.bf16.mxu1 %vm354_vm1, %v1040_v8 }
  0x22   : > { %1000 = vmatmul.mubr.msk.bf16.gmra.mrb[8].mxu0 %vm354_vm1, %v1041_v9  ;;  %1018 = vmatmul.mubr.msk.bf16.gmra.mrb[8].mxu1 %vm354_vm1, %v1041_v9 }
  0x23   : > { %1003 = vmatprep.mubr.msk.bf16.mxu0 %vm354_vm1, %v1042_v10  ;;  %1021 = vmatprep.mubr.msk.bf16.mxu1 %vm354_vm1, %v1042_v10 }
  0x2a   : > { %1004 = vmatmul.mubr.msk.bf16.gmra.mrb[12].mxu0 %vm354_vm1, %v1043_v11  ;;  %1022 = vmatmul.mubr.msk.bf16.gmra.mrb[12].mxu1 %vm354_vm1, %v1043_v11 }
  0xe5   : > { %v993_v21 = vpop.f32.mrb[0].mxu0  ;;  %v1011_v22 = vpop.f32.mrb[0].mxu1 }
  0xe6   : > { %v490_v23 = vadd.f32 %v993_v21, %v1137_v18  ;;  %v613_v24 = vadd.f32 %v1011_v22, %v1144_v20  ;;  %v417_v25 = vpop.f32.mrb[1].mxu0  ;;  %v604_v26 = vpop.f32.mrb[1].mxu1 }
  0xe7   : > { %v488_v27 = vadd.f32 %v1137_v18, %v417_v25  ;;  %v605_v28 = vadd.f32 %v1144_v20, %v604_v26  ;;  %v994_v29 = vpop.f32.mrb[2].mxu0  ;;  %v1012_v30 = vpop.f32.mrb[2].mxu1 }
  0xe8   : > { %v508_v31 = vmax.f32 %v490_v23, 0.0  ;;  %v491_v32 = vadd.f32 %v994_v29, %v1137_v18  ;;  %v616_v33 = vadd.f32 %v1012_v30, %v1144_v20  ;;  %v420_v34 = vpop.f32.mrb[3].mxu0  ;;  %v607_v35 = vpop.f32.mrb[3].mxu1  ;;  %v669_v40 = vmax.f32 %v613_v24, 0.0 }
  0xe9   : > { %v506_v36 = vmax.f32 %v488_v27, 0.0  ;;  %v489_v37 = vadd.f32 %v1137_v18, %v420_v34  ;;  %v608_v38 = vadd.f32 %v1144_v20, %v607_v35  ;;  %v667_v44 = vmax.f32 %v605_v28, 0.0 }
  0xea   : > { %v530_v39 = vsel %vm527_vm3, %v508_v31, %v993_v21  ;;  %v509_v41 = vmax.f32 %v491_v32, 0.0  ;;  %v670_v42 = vmax.f32 %v616_v33, 0.0 }
  0xeb   : > { %546 = vst [vmem:[%s1155_s21 + $0x10] sm:$0xff] %v530_v39  ;;  %v528_v43 = vsel %vm527_vm3, %v506_v36, %v417_v25  ;;  %v507_v45 = vmax.f32 %v489_v37, 0.0  ;;  %v668_v46 = vmax.f32 %v608_v38, 0.0 }
  0xec   : > { %544 = vst [vmem:[%s1155_s21] sm:$0xff] %v528_v43  ;;  %v531_v47 = vsel %vm527_vm3, %v509_v41, %v994_v29  ;;  %v932_v48 = vpack.c.bf16 %v670_v42, %v669_v40 }
  0xed   : > { %547 = vst [vmem:[%s1155_s21 + $0x18] sm:$0xff] %v531_v47  ;;  %v529_v49 = vsel %vm527_vm3, %v507_v45, %v420_v34  ;;  %v927_v50 = vpack.c.bf16 %v668_v46, %v667_v44  ;;  %v997_v51 = vpop.f32.mrb[4].mxu0  ;;  %v1015_v52 = vpop.f32.mrb[4].mxu1 }
  0xee   : > { %964 = vst [vmem:[%s1171_s25 + $0x8] sm:$0xff] %v932_v48   ;;  %545 = vst [vmem:[%s1155_s21 + $0x8] sm:$0xff] %v529_v49  ;;  %v494_v53 = vadd.f32 %v997_v51, %v1137_v18  ;;  %v629_v54 = vadd.f32 %v1015_v52, %v1144_v20  ;;  %v433_v55 = vpop.f32.mrb[5].mxu0  ;;  %v620_v56 = vpop.f32.mrb[5].mxu1 }
  0xef   : > { %928 = vst [vmem:[%s1171_s25] sm:$0xff] %v927_v50   ;;  %v492_v57 = vadd.f32 %v1137_v18, %v433_v55  ;;  %v621_v58 = vadd.f32 %v1144_v20, %v620_v56  ;;  %v998_v59 = vpop.f32.mrb[6].mxu0  ;;  %v1016_v60 = vpop.f32.mrb[6].mxu1 }
  0xf0   : > { %v512_v61 = vmax.f32 %v494_v53, 0.0  ;;  %v495_v62 = vadd.f32 %v998_v59, %v1137_v18  ;;  %v632_v63 = vadd.f32 %v1016_v60, %v1144_v20  ;;  %v436_v0 = vpop.f32.mrb[7].mxu0  ;;  %v623_v1 = vpop.f32.mrb[7].mxu1  ;;  %v673_v6 = vmax.f32 %v629_v54, 0.0 }
  0xf1   : > { %v510_v2 = vmax.f32 %v492_v57, 0.0  ;;  %v493_v3 = vadd.f32 %v1137_v18, %v436_v0  ;;  %v624_v4 = vadd.f32 %v1144_v20, %v623_v1  ;;  %v671_v10 = vmax.f32 %v621_v58, 0.0 }
  0xf2   : > { %v534_v5 = vsel %vm527_vm3, %v512_v61, %v997_v51  ;;  %v513_v7 = vmax.f32 %v495_v62, 0.0  ;;  %v674_v8 = vmax.f32 %v632_v63, 0.0 }
  0xf3   : > { %550 = vst [vmem:[%s1155_s21 + $0x30] sm:$0xff] %v534_v5  ;;  %v532_v9 = vsel %vm527_vm3, %v510_v2, %v433_v55  ;;  %v511_v11 = vmax.f32 %v493_v3, 0.0  ;;  %v672_v12 = vmax.f32 %v624_v4, 0.0 }
  0xf4   : > { %548 = vst [vmem:[%s1155_s21 + $0x20] sm:$0xff] %v532_v9  ;;  %v535_v13 = vsel %vm527_vm3, %v513_v7, %v998_v59  ;;  %v942_v14 = vpack.c.bf16 %v674_v8, %v673_v6 }
  0xf5   : > { %551 = vst [vmem:[%s1155_s21 + $0x38] sm:$0xff] %v535_v13  ;;  %v533_v15 = vsel %vm527_vm3, %v511_v11, %v436_v0  ;;  %v937_v16 = vpack.c.bf16 %v672_v12, %v671_v10  ;;  %v1001_v17 = vpop.f32.mrb[8].mxu0  ;;  %v1019_v21 = vpop.f32.mrb[8].mxu1 }
  0xf6   : > { %966 = vst [vmem:[%s1171_s25 + $0x18] sm:$0xff] %v942_v14   ;;  %549 = vst [vmem:[%s1155_s21 + $0x28] sm:$0xff] %v533_v15  ;;  %v498_v22 = vadd.f32 %v1001_v17, %v1137_v18  ;;  %v645_v23 = vadd.f32 %v1019_v21, %v1144_v20  ;;  %v449_v24 = vpop.f32.mrb[9].mxu0  ;;  %v636_v25 = vpop.f32.mrb[9].mxu1 }
  0xf7   : > { %965 = vst [vmem:[%s1171_s25 + $0x10] sm:$0xff] %v937_v16   ;;  %v496_v26 = vadd.f32 %v1137_v18, %v449_v24  ;;  %v637_v27 = vadd.f32 %v1144_v20, %v636_v25  ;;  %v1002_v28 = vpop.f32.mrb[10].mxu0  ;;  %v1020_v29 = vpop.f32.mrb[10].mxu1 }
  0xf8   : > { %v516_v30 = vmax.f32 %v498_v22, 0.0  ;;  %v499_v31 = vadd.f32 %v1002_v28, %v1137_v18  ;;  %v648_v32 = vadd.f32 %v1020_v29, %v1144_v20  ;;  %v452_v33 = vpop.f32.mrb[11].mxu0  ;;  %v639_v34 = vpop.f32.mrb[11].mxu1  ;;  %v677_v39 = vmax.f32 %v645_v23, 0.0 }
  0xf9   : > { %v514_v35 = vmax.f32 %v496_v26, 0.0  ;;  %v497_v36 = vadd.f32 %v1137_v18, %v452_v33  ;;  %v640_v37 = vadd.f32 %v1144_v20, %v639_v34  ;;  %v675_v43 = vmax.f32 %v637_v27, 0.0 }
  0xfa   : > { %v538_v38 = vsel %vm527_vm3, %v516_v30, %v1001_v17  ;;  %v517_v40 = vmax.f32 %v499_v31, 0.0  ;;  %v678_v41 = vmax.f32 %v648_v32, 0.0 }
  0xfb   : > { %554 = vst [vmem:[%s1155_s21 + $0x50] sm:$0xff] %v538_v38  ;;  %v536_v42 = vsel %vm527_vm3, %v514_v35, %v449_v24  ;;  %v515_v44 = vmax.f32 %v497_v36, 0.0  ;;  %v676_v45 = vmax.f32 %v640_v37, 0.0 }
  0xfc   : > { %552 = vst [vmem:[%s1155_s21 + $0x40] sm:$0xff] %v536_v42  ;;  %v539_v46 = vsel %vm527_vm3, %v517_v40, %v1002_v28  ;;  %v952_v47 = vpack.c.bf16 %v678_v41, %v677_v39 }
  0xfd   : > { %555 = vst [vmem:[%s1155_s21 + $0x58] sm:$0xff] %v539_v46  ;;  %v537_v48 = vsel %vm527_vm3, %v515_v44, %v452_v33  ;;  %v947_v49 = vpack.c.bf16 %v676_v45, %v675_v43  ;;  %v1005_v50 = vpop.f32.mrb[12].mxu0  ;;  %v1023_v51 = vpop.f32.mrb[12].mxu1 }
  0xfe   : > { %968 = vst [vmem:[%s1171_s25 + $0x28] sm:$0xff] %v952_v47   ;;  %553 = vst [vmem:[%s1155_s21 + $0x48] sm:$0xff] %v537_v48  ;;  %v502_v52 = vadd.f32 %v1005_v50, %v1137_v18  ;;  %v661_v53 = vadd.f32 %v1023_v51, %v1144_v20  ;;  %v465_v54 = vpop.f32.mrb[13].mxu0  ;;  %v652_v55 = vpop.f32.mrb[13].mxu1 }
  0xff   : > { %967 = vst [vmem:[%s1171_s25 + $0x20] sm:$0xff] %v947_v49   ;;  %v500_v56 = vadd.f32 %v1137_v18, %v465_v54  ;;  %v653_v57 = vadd.f32 %v1144_v20, %v652_v55  ;;  %v1006_v58 = vpop.f32.mrb[14].mxu0  ;;  %v1024_v59 = vpop.f32.mrb[14].mxu1 }
 0x100   : > { %v520_v60 = vmax.f32 %v502_v52, 0.0  ;;  %v503_v61 = vadd.f32 %v1006_v58, %v1137_v18  ;;  %v664_v62 = vadd.f32 %v1024_v59, %v1144_v20  ;;  %v468_v63 = vpop.f32.mrb[15].mxu0  ;;  %v655_v0 = vpop.f32.mrb[15].mxu1  ;;  %v681_v5 = vmax.f32 %v661_v53, 0.0 }
 0x101   : > { %v518_v1 = vmax.f32 %v500_v56, 0.0  ;;  %v501_v2 = vadd.f32 %v1137_v18, %v468_v63  ;;  %v656_v3 = vadd.f32 %v1144_v20, %v655_v0  ;;  %v679_v9 = vmax.f32 %v653_v57, 0.0 }
 0x102   : > { %v542_v4 = vsel %vm527_vm3, %v520_v60, %v1005_v50  ;;  %v521_v6 = vmax.f32 %v503_v61, 0.0  ;;  %v682_v7 = vmax.f32 %v664_v62, 0.0 }
 0x103   : > { %558 = vst [vmem:[%s1155_s21 + $0x70] sm:$0xff] %v542_v4  ;;  %v540_v8 = vsel %vm527_vm3, %v518_v1, %v465_v54  ;;  %v519_v10 = vmax.f32 %v501_v2, 0.0  ;;  %v680_v11 = vmax.f32 %v656_v3, 0.0 }
 0x104   : > { %556 = vst [vmem:[%s1155_s21 + $0x60] sm:$0xff] %v540_v8  ;;  %v543_v18 = vsel %vm527_vm3, %v521_v6, %v1006_v58  ;;  %v962_v20 = vpack.c.bf16 %v682_v7, %v681_v5 }
 0x105   : > { %559 = vst [vmem:[%s1155_s21 + $0x78] sm:$0xff] %v543_v18  ;;  %v541_v12 = vsel %vm527_vm3, %v519_v10, %v468_v63  ;;  %v957_v13 = vpack.c.bf16 %v680_v11, %v679_v9 }
 0x106   : > { %970 = vst [vmem:[%s1171_s25 + $0x38] sm:$0xff] %v962_v20   ;;  %557 = vst [vmem:[%s1155_s21 + $0x68] sm:$0xff] %v541_v12 }
 0x107   : > { %969 = vst [vmem:[%s1171_s25 + $0x30] sm:$0xff] %v957_v13  }
 0x108 PF: > { %s18_s24 = sadd.s32 1, %s1050_s24  }
 0x109   : > { %p15_p4 = scmp.ge.s32.totalorder %s18_s24, 6  }
 0x10b   :  { %17 = sbr.rel (!%p15_p4) target bundleno = 1 (0x1), region = 86 }

// kernel: inception_block_a.5
= control target key start
LH: loop header
LB: loop body
LE: loop exit
PB: predicated region body
PF: predicated region fallthrough
CT: control target
= control target key end

     0   :  { %s2786_s12 = smov 0   ;;  %s3407_s0 = inlined_call_operand.vmem [shape: bf16[48,16,240], index: 0, kind: input, shape index: {}]   ;;  %s3408_s1 = inlined_call_operand.vmem [shape: bf16[5,240,128], index: 1, kind: input, shape index: {}]   ;;  %s3409_s2 = inlined_call_operand.vmem [shape: f32[1,128], index: 2, kind: input, shape index: {}]   ;;  %s3410_s3 = inlined_call_operand.vmem [shape: f32[512,128], index: 3, kind: output, shape index: {}]  }
   0x1 LB: > { %s2215_s13 = sadd.s32 4294967295, %s2763_s12   ;;  %p2219_p0 = scmp.ge.s32.totalorder %s2763_s12, 1  ;;  %s2763_s12 = sphi %s2786_s12, %s13_s12  }
   0x2   : > { %p139_p1 = scmp.lt.s32.totalorder %s2763_s12, 5 }
   0x4   : > { %p140_p2 = pnand %p2219_p0, %p139_p1 }
   0x5   : > { %v2646_v0 = vld [vmem:[%s3408_s1] sm:$0xff] (!%p140_p2)   ;;  %v2765_v1 = vmov (!%p140_p2), 0   ;;  %v2647_v2 = vld [vmem:[%s3408_s1 + $0x78] sm:$0xff] (!%p140_p2)   ;;  %v2648_v3 = vld [vmem:[%s3408_s1 + $0x8] sm:$0xff] (!%p140_p2)   ;;  %s164_s30 = smul.u32 (!%p140_p2), 12, %s2215_s13  ;;  %vm418_vm0 = vcmask (!%p140_p2), 916480  }
   0x6   : > { %143 = sbr.rel (%p140_p2) target bundleno = 439 (0x1b7), region = 32  ;;  %443 = vmatprep.subr.bf16.mxu0 (!%p140_p2), %v2765_v1  ;;  %822 = vmatprep.subr.bf16.mxu1 (!%p140_p2), %v2765_v1  ;;  %v2649_v4 = vld [vmem:[%s3408_s1 + $0x80] sm:$0xff] (!%p140_p2)   ;;  %v2650_v5 = vld [vmem:[%s3408_s1 + $0x10] sm:$0xff] (!%p140_p2)   ;;  %v2651_v6 = vld [vmem:[%s3408_s1 + $0x88] sm:$0xff] (!%p140_p2)  }
   0x7   : > { %444 = vmatpush1.bf16.msra.mxu0 (!%p140_p2), %v2646_v0  ;;  %823 = vmatpush1.bf16.msra.mxu1 (!%p140_p2), %v2647_v2  ;;  %v2652_v7 = vld [vmem:[%s3408_s1 + $0x18] sm:$0xff] (!%p140_p2)   ;;  %v2653_v8 = vld [vmem:[%s3408_s1 + $0x90] sm:$0xff] (!%p140_p2)   ;;  %v2654_v9 = vld [vmem:[%s3408_s1 + $0x20] sm:$0xff] (!%p140_p2)   ;;  %p165_p3 = scmp.lt.s32.totalorder (!%p140_p2), %s164_s30, 47 }
   0x8   : > { %445 = vmatprep.subr.bf16.mxu0 (!%p140_p2), %v2765_v1  ;;  %824 = vmatprep.subr.bf16.mxu1 (!%p140_p2), %v2765_v1  ;;  %v2655_v10 = vld [vmem:[%s3408_s1 + $0x98] sm:$0xff] (!%p140_p2)   ;;  %v2656_v11 = vld [vmem:[%s3408_s1 + $0x28] sm:$0xff] (!%p140_p2)   ;;  %v2657_v12 = vld [vmem:[%s3408_s1 + $0xa0] sm:$0xff] (!%p140_p2)  }
   0x9   : > { %v2658_v13 = vld [vmem:[%s3408_s1 + $0x30] sm:$0xff] (!%p140_p2)   ;;  %v2659_v14 = vld [vmem:[%s3408_s1 + $0xa8] sm:$0xff] (!%p140_p2)   ;;  %v2660_v15 = vld [vmem:[%s3408_s1 + $0x38] sm:$0xff] (!%p140_p2)  }
   0xa   : > { %v2661_v16 = vld [vmem:[%s3408_s1 + $0xb0] sm:$0xff] (!%p140_p2)   ;;  %v2662_v17 = vld [vmem:[%s3408_s1 + $0x40] sm:$0xff] (!%p140_p2)   ;;  %v2663_v18 = vld [vmem:[%s3408_s1 + $0xb8] sm:$0xff] (!%p140_p2)  }
   0xb   : > { %446 = vmatpush1.bf16.msra.mxu0 (!%p140_p2), %v2648_v3  ;;  %825 = vmatpush1.bf16.msra.mxu1 (!%p140_p2), %v2649_v4  ;;  %v2664_v21 = vld [vmem:[%s3408_s1 + $0x48] sm:$0xff] (!%p140_p2)   ;;  %v2665_v22 = vld [vmem:[%s3408_s1 + $0xc0] sm:$0xff] (!%p140_p2)   ;;  %v2666_v23 = vld [vmem:[%s3408_s1 + $0x50] sm:$0xff] (!%p140_p2)  }
   0xc   : > { %447 = vmatprep.subr.bf16.mxu0 (!%p140_p2), %v2765_v1  ;;  %826 = vmatprep.subr.bf16.mxu1 (!%p140_p2), %v2765_v1  ;;  %v2667_v24 = vld [vmem:[%s3408_s1 + $0xc8] sm:$0xff] (!%p140_p2)   ;;  %v2668_v25 = vld [vmem:[%s3408_s1 + $0x58] sm:$0xff] (!%p140_p2)   ;;  %v2669_v26 = vld [vmem:[%s3408_s1 + $0xd0] sm:$0xff] (!%p140_p2)  }
   0xd   : > { %s3412_s30 = smov (!%p165_p3, %s164_s30), 47  ;;  %v2670_v27 = vld [vmem:[%s3408_s1 + $0x60] sm:$0xff]   ;;  %v2671_v28 = vld [vmem:[%s3408_s1 + $0xd8] sm:$0xff]   ;;  %v2672_v29 = vld [vmem:[%s3408_s1 + $0x68] sm:$0xff]  }
   0xe   : > { %s2606_s18 = sshll.u32 %s3412_s30, 4  ;;  %v2673_v30 = vld [vmem:[%s3408_s1 + $0xe0] sm:$0xff]   ;;  %v2674_v31 = vld [vmem:[%s3408_s1 + $0x70] sm:$0xff]   ;;  %v2675_v32 = vld [vmem:[%s3408_s1 + $0xe8] sm:$0xff]  }
   0xf   : > { %448 = vmatpush1.bf16.msra.mxu0 %v2650_v5  ;;  %827 = vmatpush1.bf16.msra.mxu1 %v2651_v6  ;;  %s2863_s25 = scalar_lea.vmem %s3407_s0, %s2606_s18  ;;  %v2682_v35 = vld [vmem:[%s3408_s1 + $0xf0] sm:$0xff]   ;;  %v2683_v36 = vld [vmem:[%s3408_s1 + $0x168] sm:$0xff]   ;;  %v2684_v38 = vld [vmem:[%s3408_s1 + $0xf8] sm:$0xff]  }
  0x10   : > { %449 = vmatprep.subr.bf16.mxu0 %v2765_v1  ;;  %828 = vmatprep.subr.bf16.mxu1 %v2765_v1  ;;  %v2678_v19 = vld [vmem:[%s2863_s25 + $0x4] ss:$8 sps:$4 sm:$0xff]   ;;  %v2681_v20 = vld [vmem:[%s2863_s25 + $0x14] ss:$8 sps:$4 sm:$0xff]   ;;  %v2676_v33 = vld [vmem:[%s2863_s25] ss:$8 sps:$4 sm:$0xff]  }
  0x11   : > { %2255 = vmatprep.mubr.msk.bf16.mxu0 %vm418_vm0, %v2678_v19  ;;  %2340 = vmatprep.mubr.msk.bf16.mxu1 %vm418_vm0, %v2681_v20  ;;  %v2679_v34 = vld [vmem:[%s2863_s25 + $0x10] ss:$8 sps:$4 sm:$0xff]   ;;  %v2936_v37 = vld [vmem:[%s2863_s25 + $0x24] ss:$8 sps:$4 sm:$0xff]   ;;  %v2950_v40 = vld [vmem:[%s2863_s25 + $0x20] ss:$8 sps:$4 sm:$0xff]  }
  0x12   : > { %v2685_v39 = vld [vmem:[%s3408_s1 + $0x170] sm:$0xff]   ;;  %v2689_v41 = vld [vmem:[%s3408_s1 + $0x100] sm:$0xff]   ;;  %v2690_v42 = vld [vmem:[%s3408_s1 + $0x178] sm:$0xff]  }
  0x13   : > { %450 = vmatpush1.bf16.msra.mxu0 %v2652_v7  ;;  %829 = vmatpush1.bf16.msra.mxu1 %v2653_v8  ;;  %v2961_v43 = vld [vmem:[%s2863_s25 + $0x34] ss:$8 sps:$4 sm:$0xff]   ;;  %v2691_v44 = vld [vmem:[%s3408_s1 + $0x108] sm:$0xff]   ;;  %v2692_v45 = vld [vmem:[%s3408_s1 + $0x180] sm:$0xff]  }
  0x14   : > { %451 = vmatprep.subr.bf16.mxu0 %v2765_v1  ;;  %830 = vmatprep.subr.bf16.mxu1 %v2765_v1  ;;  %v2977_v46 = vld [vmem:[%s2863_s25 + $0x30] ss:$8 sps:$4 sm:$0xff]   ;;  %v2697_v48 = vld [vmem:[%s3408_s1 + $0x188] sm:$0xff]   ;;  %v2703_v53 = vld [vmem:[%s3408_s1 + $0x120] sm:$0xff]  }
  0x15   : > { %v2696_v47 = vld [vmem:[%s3408_s1 + $0x110] sm:$0xff]   ;;  %v2989_v49 = vld [vmem:[%s2863_s25 + $0x44] ss:$8 sps:$4 sm:$0xff]   ;;  %v2700_v50 = vld [vmem:[%s3408_s1 + $0x118] sm:$0xff]  }
  0x16   : > { %v2701_v51 = vld [vmem:[%s3408_s1 + $0x190] sm:$0xff]   ;;  %v3005_v52 = vld [vmem:[%s2863_s25 + $0x40] ss:$8 sps:$4 sm:$0xff]   ;;  %v2704_v54 = vld [vmem:[%s3408_s1 + $0x198] sm:$0xff]  }
  0x17   : > { %452 = vmatpush1.bf16.msra.mxu0 %v2654_v9  ;;  %831 = vmatpush1.bf16.msra.mxu1 %v2655_v10  ;;  %v3017_v55 = vld [vmem:[%s2863_s25 + $0x54] ss:$8 sps:$4 sm:$0xff]   ;;  %v2707_v56 = vld [vmem:[%s3408_s1 + $0x128] sm:$0xff]   ;;  %v2708_v57 = vld [vmem:[%s3408_s1 + $0x1a0] sm:$0xff]  }
  0x18   : > { %453 = vmatprep.subr.bf16.mxu0 %v2765_v1  ;;  %832 = vmatprep.subr.bf16.mxu1 %v2765_v1  ;;  %v3033_v58 = vld [vmem:[%s2863_s25 + $0x50] ss:$8 sps:$4 sm:$0xff]   ;;  %v2711_v60 = vld [vmem:[%s3408_s1 + $0x1a8] sm:$0xff]   ;;  %v2717_v2 = vld [vmem:[%s3408_s1 + $0x140] sm:$0xff]  }
  0x19   : > { %v2710_v59 = vld [vmem:[%s3408_s1 + $0x130] sm:$0xff]   ;;  %v3044_v61 = vld [vmem:[%s2863_s25 + $0x64] ss:$8 sps:$4 sm:$0xff]   ;;  %v2715_v62 = vld [vmem:[%s3408_s1 + $0x138] sm:$0xff]  }
  0x1a   : > { %v2716_v63 = vld [vmem:[%s3408_s1 + $0x1b0] sm:$0xff]   ;;  %v3061_v0 = vld [vmem:[%s2863_s25 + $0x60] ss:$8 sps:$4 sm:$0xff]   ;;  %v2718_v3 = vld [vmem:[%s3408_s1 + $0x1b8] sm:$0xff]  }
  0x1b   : > { %454 = vmatpush1.bf16.msra.mxu0 %v2656_v11  ;;  %833 = vmatpush1.bf16.msra.mxu1 %v2657_v12  ;;  %v3072_v4 = vld [vmem:[%s2863_s25 + $0x74] ss:$8 sps:$4 sm:$0xff]   ;;  %v2722_v5 = vld [vmem:[%s3408_s1 + $0x148] sm:$0xff]   ;;  %v2723_v6 = vld [vmem:[%s3408_s1 + $0x1c0] sm:$0xff]  }
  0x1c   : > { %455 = vmatprep.subr.bf16.mxu0 %v2765_v1  ;;  %834 = vmatprep.subr.bf16.mxu1 %v2765_v1  ;;  %v3089_v7 = vld [vmem:[%s2863_s25 + $0x70] ss:$8 sps:$4 sm:$0xff]   ;;  %v2725_v9 = vld [vmem:[%s3408_s1 + $0x1c8] sm:$0xff]  }
  0x1d   : > { %v2724_v8 = vld [vmem:[%s3408_s1 + $0x150] sm:$0xff]   ;;  %v3100_v10 = vld [vmem:[%s2863_s25 + $0x84] ss:$8 sps:$4 sm:$0xff]   ;;  %v2729_v11 = vld [vmem:[%s3408_s1 + $0x158] sm:$0xff]  }
  0x1e   : > { %v2730_v12 = vld [vmem:[%s3408_s1 + $0x1d0] sm:$0xff]   ;;  %v2736_v19 = vld [vmem:[%s3408_s1 + $0x1f8] sm:$0xff]  }
  0x1f   : > { %456 = vmatpush1.bf16.msra.mxu0 %v2658_v13  ;;  %835 = vmatpush1.bf16.msra.mxu1 %v2659_v14  ;;  %v3117_v13 = vld [vmem:[%s2863_s25 + $0x80] ss:$8 sps:$4 sm:$0xff]  }
  0x20   : > { %457 = vmatprep.subr.bf16.mxu0 %v2765_v1  ;;  %836 = vmatprep.subr.bf16.mxu1 %v2765_v1  ;;  %v2731_v14 = vld [vmem:[%s3408_s1 + $0x160] sm:$0xff]  }
  0x23   : > { %458 = vmatpush1.bf16.msra.mxu0 %v2660_v15  ;;  %837 = vmatpush1.bf16.msra.mxu1 %v2661_v16  ;;  %v2732_v15 = vld [vmem:[%s3408_s1 + $0x1d8] sm:$0xff]   ;;  %v2733_v16 = vld [vmem:[%s3408_s1 + $0x1e0] sm:$0xff]  }
  0x24   : > { %459 = vmatprep.subr.bf16.mxu0 %v2765_v1  ;;  %838 = vmatprep.subr.bf16.mxu1 %v2765_v1 }
  0x27   : > { %460 = vmatpush1.bf16.msra.mxu0 %v2662_v17  ;;  %839 = vmatpush1.bf16.msra.mxu1 %v2663_v18  ;;  %v2734_v17 = vld [vmem:[%s3408_s1 + $0x1e8] sm:$0xff]   ;;  %v2735_v18 = vld [vmem:[%s3408_s1 + $0x1f0] sm:$0xff]  }
  0x28   : > { %461 = vmatprep.subr.bf16.mxu0 %v2765_v1  ;;  %840 = vmatprep.subr.bf16.mxu1 %v2765_v1 }
  0x2b   : > { %462 = vmatpush1.bf16.msra.mxu0 %v2664_v21  ;;  %841 = vmatpush1.bf16.msra.mxu1 %v2665_v22  ;;  %v2738_v21 = vld [vmem:[%s3408_s1 + $0x208] sm:$0xff]   ;;  %v2739_v22 = vld [vmem:[%s3408_s1 + $0x210] sm:$0xff]  }
  0x2c   : > { %463 = vmatprep.subr.bf16.mxu0 %v2765_v1  ;;  %842 = vmatprep.subr.bf16.mxu1 %v2765_v1 }
  0x2f   : > { %464 = vmatpush1.bf16.msra.mxu0 %v2666_v23  ;;  %843 = vmatpush1.bf16.msra.mxu1 %v2667_v24  ;;  %v2740_v23 = vld [vmem:[%s3408_s1 + $0x218] sm:$0xff]   ;;  %v2741_v24 = vld [vmem:[%s3408_s1 + $0x220] sm:$0xff]  }
  0x30   : > { %465 = vmatprep.subr.bf16.mxu0 %v2765_v1  ;;  %844 = vmatprep.subr.bf16.mxu1 %v2765_v1 }
  0x33   : > { %466 = vmatpush1.bf16.msra.mxu0 %v2668_v25  ;;  %845 = vmatpush1.bf16.msra.mxu1 %v2669_v26  ;;  %v2742_v25 = vld [vmem:[%s3408_s1 + $0x228] sm:$0xff]   ;;  %v2743_v26 = vld [vmem:[%s3408_s1 + $0x230] sm:$0xff]  }
  0x34   : > { %467 = vmatprep.subr.bf16.mxu0 %v2765_v1  ;;  %846 = vmatprep.subr.bf16.mxu1 %v2765_v1 }
  0x37   : > { %468 = vmatpush1.bf16.msra.mxu0 %v2670_v27  ;;  %847 = vmatpush1.bf16.msra.mxu1 %v2671_v28  ;;  %v2744_v27 = vld [vmem:[%s2863_s25 + $0x94] ss:$8 sps:$4 sm:$0xff]  }
  0x38   : > { %469 = vmatprep.subr.bf16.mxu0 %v2765_v1  ;;  %848 = vmatprep.subr.bf16.mxu1 %v2765_v1  ;;  %v2747_v28 = vld [vmem:[%s3408_s1 + $0x238] sm:$0xff]  }
  0x3b   : > { %470 = vmatpush1.bf16.msra.mxu0 %v2672_v29  ;;  %849 = vmatpush1.bf16.msra.mxu1 %v2673_v30  ;;  %v2746_v29 = vld [vmem:[%s2863_s25 + $0x90] ss:$8 sps:$4 sm:$0xff]   ;;  %v2748_v30 = vld [vmem:[%s3408_s1 + $0x240] sm:$0xff]  }
  0x3c   : > { %471 = vmatprep.subr.bf16.mxu0 %v2765_v1  ;;  %850 = vmatprep.subr.bf16.mxu1 %v2765_v1 }
  0x3f   : > { %472 = vmatpush1.bf16.msra.mxu0 %v2674_v31  ;;  %851 = vmatpush1.bf16.msra.mxu1 %v2675_v32  ;;  %v2749_v31 = vld [vmem:[%s2863_s25 + $0xa4] ss:$8 sps:$4 sm:$0xff]  }
  0x40   : > { %1201 = vmatprep.subr.bf16.mxu0 %v2765_v1  ;;  %1580 = vmatprep.subr.bf16.mxu1 %v2765_v1  ;;  %v2752_v32 = vld [vmem:[%s3408_s1 + $0x248] sm:$0xff]  }
  0x42   : > { %476 = vmatmul.mubr.bf16.vlgmr.msra.gmra.mrb[0].mxu0 %v2676_v33  ;;  %855 = vmatmul.mubr.bf16.vlgmr.msra.gmra.mrb[0].mxu1 %v2679_v34  ;;  %v2751_v33 = vld [vmem:[%s2863_s25 + $0xa0] ss:$8 sps:$4 sm:$0xff]  }
  0x43   : > { %1202 = vmatpush1.bf16.msra.mxu0 %v2682_v35  ;;  %1581 = vmatpush1.bf16.msra.mxu1 %v2683_v36  ;;  %v2756_v35 = vld [vmem:[%s2863_s25 + $0xb0] ss:$8 sps:$4 sm:$0xff]  }
  0x44   : > { %1203 = vmatprep.subr.bf16.mxu0 %v2765_v1  ;;  %1582 = vmatprep.subr.bf16.mxu1 %v2765_v1 }
  0x45   : > { %2256 = vmatprep.mubr.msk.bf16.mxu0 %vm418_vm0, %v2681_v20  ;;  %2341 = vmatprep.mubr.msk.bf16.mxu1 %vm418_vm0, %v2936_v37  ;;  %v2737_v20 = vld [vmem:[%s3408_s1 + $0x200] sm:$0xff]  }
  0x47   : > { %1204 = vmatpush1.bf16.msra.mxu0 %v2684_v38  ;;  %1583 = vmatpush1.bf16.msra.mxu1 %v2685_v39 }
  0x48   : > { %1205 = vmatprep.subr.bf16.mxu0 %v2765_v1  ;;  %1584 = vmatprep.subr.bf16.mxu1 %v2765_v1 }
  0x4a   : > { %484 = vmatmul.mubr.bf16.gmra.mrb[4].mxu0 %v2679_v34  ;;  %863 = vmatmul.mubr.bf16.gmra.mrb[4].mxu1 %v2950_v40  ;;  %v2753_v34 = vld [vmem:[%s3408_s1 + $0x250] sm:$0xff]  }
  0x4b   : > { %1206 = vmatpush1.bf16.msra.mxu0 %v2689_v41  ;;  %1585 = vmatpush1.bf16.msra.mxu1 %v2690_v42 }
  0x4c   : > { %1207 = vmatprep.subr.bf16.mxu0 %v2765_v1  ;;  %1586 = vmatprep.subr.bf16.mxu1 %v2765_v1 }
  0x4d   : > { %2257 = vmatprep.mubr.msk.bf16.mxu0 %vm418_vm0, %v2936_v37  ;;  %2342 = vmatprep.mubr.msk.bf16.mxu1 %vm418_vm0, %v2961_v43 }
  0x4f   : > { %1208 = vmatpush1.bf16.msra.mxu0 %v2691_v44  ;;  %1587 = vmatpush1.bf16.msra.mxu1 %v2692_v45 }
  0x50   : > { %1209 = vmatprep.subr.bf16.mxu0 %v2765_v1  ;;  %1588 = vmatprep.subr.bf16.mxu1 %v2765_v1 }
  0x52   : > { %492 = vmatmul.mubr.bf16.gmra.mrb[8].mxu0 %v2950_v40  ;;  %871 = vmatmul.mubr.bf16.gmra.mrb[8].mxu1 %v2977_v46 }
  0x53   : > { %1210 = vmatpush1.bf16.msra.mxu0 %v2696_v47  ;;  %1589 = vmatpush1.bf16.msra.mxu1 %v2697_v48 }
  0x54   : > { %1211 = vmatprep.subr.bf16.mxu0 %v2765_v1  ;;  %1590 = vmatprep.subr.bf16.mxu1 %v2765_v1 }
  0x55   : > { %2258 = vmatprep.mubr.msk.bf16.mxu0 %vm418_vm0, %v2961_v43  ;;  %2343 = vmatprep.mubr.msk.bf16.mxu1 %vm418_vm0, %v2989_v49 }
  0x57   : > { %1212 = vmatpush1.bf16.msra.mxu0 %v2700_v50  ;;  %1591 = vmatpush1.bf16.msra.mxu1 %v2701_v51 }
  0x58   : > { %1213 = vmatprep.subr.bf16.mxu0 %v2765_v1  ;;  %1592 = vmatprep.subr.bf16.mxu1 %v2765_v1 }
  0x5a   : > { %500 = vmatmul.mubr.bf16.gmra.mrb[12].mxu0 %v2977_v46  ;;  %879 = vmatmul.mubr.bf16.gmra.mrb[12].mxu1 %v3005_v52 }
  0x5b   : > { %1214 = vmatpush1.bf16.msra.mxu0 %v2703_v53  ;;  %1593 = vmatpush1.bf16.msra.mxu1 %v2704_v54 }
  0x5c   : > { %1215 = vmatprep.subr.bf16.mxu0 %v2765_v1  ;;  %1594 = vmatprep.subr.bf16.mxu1 %v2765_v1 }
  0x5d   : > { %2259 = vmatprep.mubr.msk.bf16.mxu0 %vm418_vm0, %v2989_v49  ;;  %2344 = vmatprep.mubr.msk.bf16.mxu1 %vm418_vm0, %v3017_v55 }
  0x5f   : > { %1216 = vmatpush1.bf16.msra.mxu0 %v2707_v56  ;;  %1595 = vmatpush1.bf16.msra.mxu1 %v2708_v57 }
  0x60   : > { %1217 = vmatprep.subr.bf16.mxu0 %v2765_v1  ;;  %1596 = vmatprep.subr.bf16.mxu1 %v2765_v1 }
  0x62   : > { %508 = vmatmul.mubr.bf16.gmra.mrb[16].mxu0 %v3005_v52  ;;  %887 = vmatmul.mubr.bf16.gmra.mrb[16].mxu1 %v3033_v58 }
  0x63   : > { %1218 = vmatpush1.bf16.msra.mxu0 %v2710_v59  ;;  %1597 = vmatpush1.bf16.msra.mxu1 %v2711_v60 }
  0x64   : > { %2260 = vmatprep.mubr.msk.bf16.mxu0 %vm418_vm0, %v3017_v55  ;;  %2345 = vmatprep.mubr.msk.bf16.mxu1 %vm418_vm0, %v3044_v61 }
  0x65   : > { %1219 = vmatprep.subr.bf16.mxu0 %v2765_v1  ;;  %1598 = vmatprep.subr.bf16.mxu1 %v2765_v1 }
  0x67   : > { %1220 = vmatpush1.bf16.msra.mxu0 %v2715_v62  ;;  %1599 = vmatpush1.bf16.msra.mxu1 %v2716_v63 }
  0x68   : > { %1221 = vmatprep.subr.bf16.mxu0 %v2765_v1  ;;  %1600 = vmatprep.subr.bf16.mxu1 %v2765_v1 }
  0x6a   : > { %516 = vmatmul.mubr.bf16.gmra.mrb[20].mxu0 %v3033_v58  ;;  %895 = vmatmul.mubr.bf16.gmra.mrb[20].mxu1 %v3061_v0 }
  0x6b   : > { %1222 = vmatpush1.bf16.msra.mxu0 %v2717_v2  ;;  %1601 = vmatpush1.bf16.msra.mxu1 %v2718_v3 }
  0x6c   : > { %2261 = vmatprep.mubr.msk.bf16.mxu0 %vm418_vm0, %v3044_v61  ;;  %2346 = vmatprep.mubr.msk.bf16.mxu1 %vm418_vm0, %v3072_v4 }
  0x6d   : > { %1223 = vmatprep.subr.bf16.mxu0 %v2765_v1  ;;  %1602 = vmatprep.subr.bf16.mxu1 %v2765_v1 }
  0x6f   : > { %1224 = vmatpush1.bf16.msra.mxu0 %v2722_v5  ;;  %1603 = vmatpush1.bf16.msra.mxu1 %v2723_v6 }
  0x70   : > { %1225 = vmatprep.subr.bf16.mxu0 %v2765_v1  ;;  %1604 = vmatprep.subr.bf16.mxu1 %v2765_v1 }
  0x72   : > { %524 = vmatmul.mubr.bf16.gmra.mrb[24].mxu0 %v3061_v0  ;;  %903 = vmatmul.mubr.bf16.gmra.mrb[24].mxu1 %v3089_v7 }
  0x73   : > { %1226 = vmatpush1.bf16.msra.mxu0 %v2724_v8  ;;  %1605 = vmatpush1.bf16.msra.mxu1 %v2725_v9 }
  0x74   : > { %2262 = vmatprep.mubr.msk.bf16.mxu0 %vm418_vm0, %v3072_v4  ;;  %2347 = vmatprep.mubr.msk.bf16.mxu1 %vm418_vm0, %v3100_v10 }
  0x75   : > { %1227 = vmatprep.subr.bf16.mxu0 %v2765_v1  ;;  %1606 = vmatprep.subr.bf16.mxu1 %v2765_v1 }
  0x77   : > { %1228 = vmatpush1.bf16.msra.mxu0 %v2729_v11  ;;  %1607 = vmatpush1.bf16.msra.mxu1 %v2730_v12 }
  0x78   : > { %1229 = vmatprep.subr.bf16.mxu0 %v2765_v1  ;;  %1608 = vmatprep.subr.bf16.mxu1 %v2765_v1 }
  0x7a   : > { %532 = vmatmul.mubr.bf16.gmra.mrb[28].mxu0 %v3089_v7  ;;  %911 = vmatmul.mubr.bf16.gmra.mrb[28].mxu1 %v3117_v13 }
  0x7b   : > { %1230 = vmatpush1.bf16.msra.mxu0 %v2731_v14  ;;  %1609 = vmatpush1.bf16.msra.mxu1 %v2732_v15 }
  0x7c   : > { %2425 = vmatprep.mubr.msk.bf16.mxu0 %vm418_vm0, %v2936_v37  ;;  %2510 = vmatprep.mubr.msk.bf16.mxu1 %vm418_vm0, %v2961_v43 }
  0x7d   : > { %1959 = vmatprep.subr.bf16.mxu0 %v2765_v1  ;;  %2607 = vmatprep.subr.bf16.mxu1 %v2765_v1 }
  0x82   : > { %1234 = vmatmul.mubr.bf16.vlgmr.msra.gmra.mrb[32].mxu0 %v2950_v40  ;;  %1613 = vmatmul.mubr.bf16.vlgmr.msra.gmra.mrb[32].mxu1 %v2977_v46 }
  0x83   : > { %1960 = vmatpush1.bf16.msra.mxu0 %v2733_v16  ;;  %2622 = vmatpush1.bf16.msra.mxu1 %v2733_v16 }
  0x84   : > { %1961 = vmatprep.subr.bf16.mxu0 %v2765_v1  ;;  %2608 = vmatprep.subr.bf16.mxu1 %v2765_v1 }
  0x85   : > { %2426 = vmatprep.mubr.msk.bf16.mxu0 %vm418_vm0, %v2961_v43  ;;  %2511 = vmatprep.mubr.msk.bf16.mxu1 %vm418_vm0, %v2989_v49 }
  0x87   : > { %1962 = vmatpush1.bf16.msra.mxu0 %v2734_v17  ;;  %2623 = vmatpush1.bf16.msra.mxu1 %v2734_v17 }
  0x88   : > { %1963 = vmatprep.subr.bf16.mxu0 %v2765_v1  ;;  %2609 = vmatprep.subr.bf16.mxu1 %v2765_v1 }
  0x8a   : > { %1242 = vmatmul.mubr.bf16.gmra.mrb[36].mxu0 %v2977_v46  ;;  %1621 = vmatmul.mubr.bf16.gmra.mrb[36].mxu1 %v3005_v52 }
  0x8b   : > { %1964 = vmatpush1.bf16.msra.mxu0 %v2735_v18  ;;  %2624 = vmatpush1.bf16.msra.mxu1 %v2735_v18 }
  0x8c   : > { %1965 = vmatprep.subr.bf16.mxu0 %v2765_v1  ;;  %2610 = vmatprep.subr.bf16.mxu1 %v2765_v1 }
  0x8d   : > { %2427 = vmatprep.mubr.msk.bf16.mxu0 %vm418_vm0, %v2989_v49  ;;  %2512 = vmatprep.mubr.msk.bf16.mxu1 %vm418_vm0, %v3017_v55 }
  0x8f   : > { %1966 = vmatpush1.bf16.msra.mxu0 %v2736_v19  ;;  %2625 = vmatpush1.bf16.msra.mxu1 %v2736_v19 }
  0x90   : > { %1967 = vmatprep.subr.bf16.mxu0 %v2765_v1  ;;  %2611 = vmatprep.subr.bf16.mxu1 %v2765_v1 }
  0x92   : > { %1250 = vmatmul.mubr.bf16.gmra.mrb[40].mxu0 %v3005_v52  ;;  %1629 = vmatmul.mubr.bf16.gmra.mrb[40].mxu1 %v3033_v58 }
  0x93   : > { %1968 = vmatpush1.bf16.msra.mxu0 %v2737_v20  ;;  %2626 = vmatpush1.bf16.msra.mxu1 %v2737_v20 }
  0x94   : > { %1969 = vmatprep.subr.bf16.mxu0 %v2765_v1  ;;  %2612 = vmatprep.subr.bf16.mxu1 %v2765_v1 }
  0x95   : > { %2428 = vmatprep.mubr.msk.bf16.mxu0 %vm418_vm0, %v3017_v55  ;;  %2513 = vmatprep.mubr.msk.bf16.mxu1 %vm418_vm0, %v3044_v61 }
  0x97   : > { %1970 = vmatpush1.bf16.msra.mxu0 %v2738_v21  ;;  %2627 = vmatpush1.bf16.msra.mxu1 %v2738_v21 }
  0x98   : > { %1971 = vmatprep.subr.bf16.mxu0 %v2765_v1  ;;  %2613 = vmatprep.subr.bf16.mxu1 %v2765_v1 }
  0x9a   : > { %1258 = vmatmul.mubr.bf16.gmra.mrb[44].mxu0 %v3033_v58  ;;  %1637 = vmatmul.mubr.bf16.gmra.mrb[44].mxu1 %v3061_v0 }
  0x9b   : > { %1972 = vmatpush1.bf16.msra.mxu0 %v2739_v22  ;;  %2628 = vmatpush1.bf16.msra.mxu1 %v2739_v22 }
  0x9c   : > { %1973 = vmatprep.subr.bf16.mxu0 %v2765_v1  ;;  %2614 = vmatprep.subr.bf16.mxu1 %v2765_v1 }
  0x9d   : > { %2429 = vmatprep.mubr.msk.bf16.mxu0 %vm418_vm0, %v3044_v61  ;;  %2514 = vmatprep.mubr.msk.bf16.mxu1 %vm418_vm0, %v3072_v4 }
  0x9f   : > { %1974 = vmatpush1.bf16.msra.mxu0 %v2740_v23  ;;  %2629 = vmatpush1.bf16.msra.mxu1 %v2740_v23 }
  0xa0   : > { %1975 = vmatprep.subr.bf16.mxu0 %v2765_v1  ;;  %2615 = vmatprep.subr.bf16.mxu1 %v2765_v1 }
  0xa2   : > { %1266 = vmatmul.mubr.bf16.gmra.mrb[48].mxu0 %v3061_v0  ;;  %1645 = vmatmul.mubr.bf16.gmra.mrb[48].mxu1 %v3089_v7 }
  0xa3   : > { %1976 = vmatpush1.bf16.msra.mxu0 %v2741_v24  ;;  %2630 = vmatpush1.bf16.msra.mxu1 %v2741_v24 }
  0xa4   : > { %2430 = vmatprep.mubr.msk.bf16.mxu0 %vm418_vm0, %v3072_v4  ;;  %2515 = vmatprep.mubr.msk.bf16.mxu1 %vm418_vm0, %v3100_v10 }
  0xa5   : > { %1977 = vmatprep.subr.bf16.mxu0 %v2765_v1  ;;  %2616 = vmatprep.subr.bf16.mxu1 %v2765_v1 }
  0xa7   : > { %1978 = vmatpush1.bf16.msra.mxu0 %v2742_v25  ;;  %2631 = vmatpush1.bf16.msra.mxu1 %v2742_v25 }
  0xa8   : > { %1979 = vmatprep.subr.bf16.mxu0 %v2765_v1  ;;  %2617 = vmatprep.subr.bf16.mxu1 %v2765_v1 }
  0xaa   : > { %1274 = vmatmul.mubr.bf16.gmra.mrb[52].mxu0 %v3089_v7  ;;  %1653 = vmatmul.mubr.bf16.gmra.mrb[52].mxu1 %v3117_v13 }
  0xab   : > { %1980 = vmatpush1.bf16.msra.mxu0 %v2743_v26  ;;  %2632 = vmatpush1.bf16.msra.mxu1 %v2743_v26 }
  0xac   : > { %2431 = vmatprep.mubr.msk.bf16.mxu0 %vm418_vm0, %v3100_v10  ;;  %2516 = vmatprep.mubr.msk.bf16.mxu1 %vm418_vm0, %v2744_v27 }
  0xad   : > { %1981 = vmatprep.subr.bf16.mxu0 %v2765_v1  ;;  %2618 = vmatprep.subr.bf16.mxu1 %v2765_v1 }
  0xaf   : > { %1982 = vmatpush1.bf16.msra.mxu0 %v2747_v28  ;;  %2633 = vmatpush1.bf16.msra.mxu1 %v2747_v28 }
  0xb0   : > { %1983 = vmatprep.subr.bf16.mxu0 %v2765_v1  ;;  %2619 = vmatprep.subr.bf16.mxu1 %v2765_v1 }
  0xb2   : > { %1282 = vmatmul.mubr.bf16.gmra.mrb[56].mxu0 %v3117_v13  ;;  %1661 = vmatmul.mubr.bf16.gmra.mrb[56].mxu1 %v2746_v29 }
  0xb3   : > { %1984 = vmatpush1.bf16.msra.mxu0 %v2748_v30  ;;  %2634 = vmatpush1.bf16.msra.mxu1 %v2748_v30 }
  0xb4   : > { %2432 = vmatprep.mubr.msk.bf16.mxu0 %vm418_vm0, %v2744_v27  ;;  %2517 = vmatprep.mubr.msk.bf16.mxu1 %vm418_vm0, %v2749_v31 }
  0xb5   : > { %1985 = vmatprep.subr.bf16.mxu0 %v2765_v1  ;;  %2620 = vmatprep.subr.bf16.mxu1 %v2765_v1 }
  0xb7   : > { %1986 = vmatpush1.bf16.msra.mxu0 %v2752_v32  ;;  %2635 = vmatpush1.bf16.msra.mxu1 %v2752_v32 }
  0xb8   : > { %1987 = vmatprep.subr.bf16.mxu0 %v2765_v1  ;;  %2621 = vmatprep.subr.bf16.mxu1 %v2765_v1  ;;  %v2754_v1 = vld [vmem:[%s2863_s25 + $0xb4] ss:$8 sps:$4 sm:$0xff]   ;;  %s2222_s25 = sshll.u32 %s2215_s13, 4 }
  0xb9   : > { %p172_p4 = scmp.lt.s32.totalorder %s2222_s25, 63 }
  0xba   : > { %1290 = vmatmul.mubr.bf16.gmra.mrb[60].mxu0 %v2746_v29  ;;  %1669 = vmatmul.mubr.bf16.gmra.mrb[60].mxu1 %v2751_v33 }
  0xbb   : > { %1988 = vmatpush1.bf16.msra.mxu0 %v2753_v34  ;;  %2636 = vmatpush1.bf16.msra.mxu1 %v2753_v34  ;;  %s3414_s25 = smov (!%p172_p4, %s2222_s25), 63 }
  0xbc   : > { %2595 = vmatprep.mubr.msk.bf16.mxu0 %vm418_vm0, %v2989_v49  ;;  %2599 = vmatprep.mubr.msk.bf16.mxu1 %vm418_vm0, %v3100_v10  ;;  %s2223_s24 = sshll.u32 %s3414_s25, 3 }
  0xbd   : > { %s3359_s28 = scalar_lea.vmem %s3410_s3, %s2223_s24 }
  0xc2   : > { %1992 = vmatmul.mubr.bf16.vlgmr.msra.gmra.mrb[64].mxu0 %v3005_v52  ;;  %2024 = vmatmul.mubr.bf16.vlgmr.msra.gmra.mrb[64].mxu1 %v3117_v13 }
  0xc3   : > { %2596 = vmatprep.mubr.msk.bf16.mxu0 %vm418_vm0, %v3017_v55  ;;  %2600 = vmatprep.mubr.msk.bf16.mxu1 %vm418_vm0, %v2744_v27 }
  0xca   : > { %2000 = vmatmul.mubr.bf16.gmra.mrb[68].mxu0 %v3033_v58  ;;  %2032 = vmatmul.mubr.bf16.gmra.mrb[68].mxu1 %v2746_v29 }
  0xcb   : > { %2597 = vmatprep.mubr.msk.bf16.mxu0 %vm418_vm0, %v3044_v61  ;;  %2601 = vmatprep.mubr.msk.bf16.mxu1 %vm418_vm0, %v2749_v31 }
  0xd2   : > { %2008 = vmatmul.mubr.bf16.gmra.mrb[72].mxu0 %v3061_v0  ;;  %2040 = vmatmul.mubr.bf16.gmra.mrb[72].mxu1 %v2751_v33 }
  0xd3   : > { %2598 = vmatprep.mubr.msk.bf16.mxu0 %vm418_vm0, %v3072_v4  ;;  %2602 = vmatprep.mubr.msk.bf16.mxu1 %vm418_vm0, %v2754_v1 }
  0xda   : > { %2016 = vmatmul.mubr.bf16.gmra.mrb[76].mxu0 %v3089_v7  ;;  %2048 = vmatmul.mubr.bf16.gmra.mrb[76].mxu1 %v2756_v35 }
 0x115   : > { %v477_v36 = vpop.f32.mrb[0].mxu0  ;;  %v856_v37 = vpop.f32.mrb[0].mxu1 }
 0x116   : > { %v479_v38 = vpop.f32.mrb[1].mxu0  ;;  %v3270_v39 = vadd.f32 %v856_v37, %v477_v36  ;;  %v858_v40 = vpop.f32.mrb[1].mxu1 }
 0x117   : > { %v480_v41 = vpop.f32.mrb[2].mxu0  ;;  %v859_v42 = vpop.f32.mrb[2].mxu1 }
 0x118   : > { %v482_v43 = vpop.f32.mrb[3].mxu0  ;;  %v3272_v44 = vadd.f32 %v859_v42, %v480_v41  ;;  %v861_v45 = vpop.f32.mrb[3].mxu1 }
 0x11d   : > { %v485_v46 = vpop.f32.mrb[4].mxu0  ;;  %v864_v47 = vpop.f32.mrb[4].mxu1 }
 0x11e   : > { %v487_v48 = vpop.f32.mrb[5].mxu0  ;;  %v3274_v49 = vadd.f32 %v864_v47, %v485_v46  ;;  %v866_v50 = vpop.f32.mrb[5].mxu1 }
 0x11f   : > { %v488_v51 = vpop.f32.mrb[6].mxu0  ;;  %v867_v52 = vpop.f32.mrb[6].mxu1 }
 0x120   : > { %v490_v53 = vpop.f32.mrb[7].mxu0  ;;  %v3276_v54 = vadd.f32 %v867_v52, %v488_v51  ;;  %v869_v55 = vpop.f32.mrb[7].mxu1 }
 0x125   : > { %v493_v56 = vpop.f32.mrb[8].mxu0  ;;  %v872_v57 = vpop.f32.mrb[8].mxu1 }
 0x126   : > { %v495_v58 = vpop.f32.mrb[9].mxu0  ;;  %v3278_v59 = vadd.f32 %v872_v57, %v493_v56  ;;  %v874_v60 = vpop.f32.mrb[9].mxu1 }
 0x127   : > { %v496_v61 = vpop.f32.mrb[10].mxu0  ;;  %v875_v62 = vpop.f32.mrb[10].mxu1 }
 0x128   : > { %v498_v63 = vpop.f32.mrb[11].mxu0  ;;  %v3280_v0 = vadd.f32 %v875_v62, %v496_v61  ;;  %v877_v2 = vpop.f32.mrb[11].mxu1 }
 0x12d   : > { %v501_v3 = vpop.f32.mrb[12].mxu0  ;;  %v880_v4 = vpop.f32.mrb[12].mxu1 }
 0x12e   : > { %v503_v5 = vpop.f32.mrb[13].mxu0  ;;  %v3282_v6 = vadd.f32 %v880_v4, %v501_v3  ;;  %v882_v7 = vpop.f32.mrb[13].mxu1 }
 0x12f   : > { %v504_v8 = vpop.f32.mrb[14].mxu0  ;;  %v883_v9 = vpop.f32.mrb[14].mxu1 }
 0x130   : > { %v506_v10 = vpop.f32.mrb[15].mxu0  ;;  %v3284_v11 = vadd.f32 %v883_v9, %v504_v8  ;;  %v885_v12 = vpop.f32.mrb[15].mxu1 }
 0x135   : > { %v509_v13 = vpop.f32.mrb[16].mxu0  ;;  %v888_v14 = vpop.f32.mrb[16].mxu1 }
 0x136   : > { %v511_v15 = vpop.f32.mrb[17].mxu0  ;;  %v3286_v16 = vadd.f32 %v888_v14, %v509_v13  ;;  %v890_v17 = vpop.f32.mrb[17].mxu1 }
 0x137   : > { %v512_v18 = vpop.f32.mrb[18].mxu0  ;;  %v891_v19 = vpop.f32.mrb[18].mxu1 }
 0x138   : > { %v514_v20 = vpop.f32.mrb[19].mxu0  ;;  %v3288_v21 = vadd.f32 %v891_v19, %v512_v18  ;;  %v893_v22 = vpop.f32.mrb[19].mxu1 }
 0x13d   : > { %v517_v23 = vpop.f32.mrb[20].mxu0  ;;  %v896_v24 = vpop.f32.mrb[20].mxu1 }
 0x13e   : > { %v519_v25 = vpop.f32.mrb[21].mxu0  ;;  %v3290_v26 = vadd.f32 %v896_v24, %v517_v23  ;;  %v898_v27 = vpop.f32.mrb[21].mxu1 }
 0x13f   : > { %v520_v28 = vpop.f32.mrb[22].mxu0  ;;  %v899_v29 = vpop.f32.mrb[22].mxu1 }
 0x140   : > { %v522_v30 = vpop.f32.mrb[23].mxu0  ;;  %v3292_v31 = vadd.f32 %v899_v29, %v520_v28  ;;  %v901_v32 = vpop.f32.mrb[23].mxu1 }
 0x145   : > { %v525_v33 = vpop.f32.mrb[24].mxu0  ;;  %v904_v34 = vpop.f32.mrb[24].mxu1 }
 0x146   : > { %v527_v1 = vpop.f32.mrb[25].mxu0  ;;  %v3294_v35 = vadd.f32 %v904_v34, %v525_v33  ;;  %v906_v36 = vpop.f32.mrb[25].mxu1 }
 0x147   : > { %v528_v37 = vpop.f32.mrb[26].mxu0  ;;  %v907_v38 = vpop.f32.mrb[26].mxu1 }
 0x148   : > { %v530_v40 = vpop.f32.mrb[27].mxu0  ;;  %v3296_v41 = vadd.f32 %v907_v38, %v528_v37  ;;  %v909_v42 = vpop.f32.mrb[27].mxu1 }
 0x14d   : > { %v533_v43 = vpop.f32.mrb[28].mxu0  ;;  %v912_v45 = vpop.f32.mrb[28].mxu1 }
 0x14e   : > { %v535_v46 = vpop.f32.mrb[29].mxu0  ;;  %v3298_v47 = vadd.f32 %v912_v45, %v533_v43  ;;  %v914_v48 = vpop.f32.mrb[29].mxu1 }
 0x14f   : > { %v536_v50 = vpop.f32.mrb[30].mxu0  ;;  %v915_v51 = vpop.f32.mrb[30].mxu1 }
 0x150   : > { %v538_v52 = vpop.f32.mrb[31].mxu0  ;;  %v3300_v53 = vadd.f32 %v915_v51, %v536_v50  ;;  %v917_v55 = vpop.f32.mrb[31].mxu1 }
 0x155   : > { %v1235_v56 = vpop.f32.mrb[32].mxu0  ;;  %v1614_v58 = vpop.f32.mrb[32].mxu1 }
 0x156   : > { %v1298_v57 = vadd.f32 %v1235_v56, %v3270_v39  ;;  %v1237_v60 = vpop.f32.mrb[33].mxu0  ;;  %v1616_v61 = vpop.f32.mrb[33].mxu1 }
 0x157   : > { %v1238_v62 = vpop.f32.mrb[34].mxu0  ;;  %v1617_v3 = vpop.f32.mrb[34].mxu1 }
 0x158   : > { %v3303_v63 = vadd.f32 %v1614_v58, %v1298_v57  ;;  %v1299_v2 = vadd.f32 %v1238_v62, %v3272_v44  ;;  %v1240_v4 = vpop.f32.mrb[35].mxu0  ;;  %v1619_v5 = vpop.f32.mrb[35].mxu1 }
 0x15a   : > { %v3306_v7 = vadd.f32 %v1617_v3, %v1299_v2 }
 0x15d   : > { %v1243_v8 = vpop.f32.mrb[36].mxu0  ;;  %v1622_v10 = vpop.f32.mrb[36].mxu1 }
 0x15e   : > { %v1300_v9 = vadd.f32 %v1243_v8, %v3274_v49  ;;  %v1245_v12 = vpop.f32.mrb[37].mxu0  ;;  %v1624_v13 = vpop.f32.mrb[37].mxu1 }
 0x15f   : > { %v1246_v39 = vpop.f32.mrb[38].mxu0  ;;  %v1625_v17 = vpop.f32.mrb[38].mxu1 }
 0x160   : > { %v3309_v14 = vadd.f32 %v1622_v10, %v1300_v9  ;;  %v1301_v15 = vadd.f32 %v1246_v39, %v3276_v54  ;;  %v1248_v18 = vpop.f32.mrb[39].mxu0  ;;  %v1627_v19 = vpop.f32.mrb[39].mxu1 }
 0x162   : > { %v3312_v44 = vadd.f32 %v1625_v17, %v1301_v15 }
 0x165   : > { %v1251_v20 = vpop.f32.mrb[40].mxu0  ;;  %v1630_v23 = vpop.f32.mrb[40].mxu1 }
 0x166   : > { %v1302_v22 = vadd.f32 %v1251_v20, %v3278_v59  ;;  %v1253_v24 = vpop.f32.mrb[41].mxu0  ;;  %v1632_v25 = vpop.f32.mrb[41].mxu1 }
 0x167   : > { %v1254_v49 = vpop.f32.mrb[42].mxu0  ;;  %v1633_v29 = vpop.f32.mrb[42].mxu1 }
 0x168   : > { %v3315_v27 = vadd.f32 %v1630_v23, %v1302_v22  ;;  %v1303_v28 = vadd.f32 %v1254_v49, %v3280_v0  ;;  %v1256_v30 = vpop.f32.mrb[43].mxu0  ;;  %v1635_v32 = vpop.f32.mrb[43].mxu1 }
 0x16a   : > { %v3318_v54 = vadd.f32 %v1633_v29, %v1303_v28 }
 0x16d   : > { %v1259_v33 = vpop.f32.mrb[44].mxu0  ;;  %v1638_v1 = vpop.f32.mrb[44].mxu1 }
 0x16e   : > { %v1304_v34 = vadd.f32 %v1259_v33, %v3282_v6  ;;  %v1261_v36 = vpop.f32.mrb[45].mxu0  ;;  %v1640_v37 = vpop.f32.mrb[45].mxu1 }
 0x16f   : > { %v1262_v59 = vpop.f32.mrb[46].mxu0  ;;  %v1641_v42 = vpop.f32.mrb[46].mxu1 }
 0x170   : > { %v3321_v38 = vadd.f32 %v1638_v1, %v1304_v34  ;;  %v1305_v40 = vadd.f32 %v1262_v59, %v3284_v11  ;;  %v1264_v43 = vpop.f32.mrb[47].mxu0  ;;  %v1643_v45 = vpop.f32.mrb[47].mxu1 }
 0x172   : > { %v3324_v0 = vadd.f32 %v1641_v42, %v1305_v40 }
 0x175   : > { %v1267_v46 = vpop.f32.mrb[48].mxu0  ;;  %v1646_v50 = vpop.f32.mrb[48].mxu1 }
 0x176   : > { %v1306_v48 = vadd.f32 %v1267_v46, %v3286_v16  ;;  %v1269_v51 = vpop.f32.mrb[49].mxu0  ;;  %v1648_v52 = vpop.f32.mrb[49].mxu1 }
 0x177   : > { %v1270_v6 = vpop.f32.mrb[50].mxu0  ;;  %v1649_v57 = vpop.f32.mrb[50].mxu1 }
 0x178   : > { %v1685_v55 = vadd.f32 %v1646_v50, %v1306_v48  ;;  %v1307_v56 = vadd.f32 %v1270_v6, %v3288_v21  ;;  %v1272_v58 = vpop.f32.mrb[51].mxu0  ;;  %v1651_v60 = vpop.f32.mrb[51].mxu1 }
 0x17a   : > { %v1686_v61 = vadd.f32 %v1649_v57, %v1307_v56 }
 0x17d   : > { %v1275_v11 = vpop.f32.mrb[52].mxu0  ;;  %v1654_v2 = vpop.f32.mrb[52].mxu1 }
 0x17e   : > { %v1308_v62 = vadd.f32 %v1275_v11, %v3290_v26  ;;  %v1277_v3 = vpop.f32.mrb[53].mxu0  ;;  %v1656_v4 = vpop.f32.mrb[53].mxu1 }
 0x17f   : > { %v1278_v5 = vpop.f32.mrb[54].mxu0  ;;  %v1657_v9 = vpop.f32.mrb[54].mxu1 }
 0x180   : > { %v3329_v8 = vadd.f32 %v1654_v2, %v1308_v62  ;;  %v1309_v16 = vadd.f32 %v1278_v5, %v3292_v31  ;;  %v1280_v10 = vpop.f32.mrb[55].mxu0  ;;  %v1659_v12 = vpop.f32.mrb[55].mxu1 }
 0x182   : > { %v3332_v21 = vadd.f32 %v1657_v9, %v1309_v16 }
 0x185   : > { %v1283_v13 = vpop.f32.mrb[56].mxu0  ;;  %v1662_v15 = vpop.f32.mrb[56].mxu1 }
 0x186   : > { %v1310_v39 = vadd.f32 %v1283_v13, %v3294_v35  ;;  %v1285_v17 = vpop.f32.mrb[57].mxu0  ;;  %v1664_v26 = vpop.f32.mrb[57].mxu1 }
 0x187   : > { %v1286_v18 = vpop.f32.mrb[58].mxu0  ;;  %v1665_v22 = vpop.f32.mrb[58].mxu1 }
 0x188   : > { %v3335_v19 = vadd.f32 %v1662_v15, %v1310_v39  ;;  %v1311_v20 = vadd.f32 %v1286_v18, %v3296_v41  ;;  %v1288_v23 = vpop.f32.mrb[59].mxu0  ;;  %v1667_v31 = vpop.f32.mrb[59].mxu1 }
 0x18a   : > { %v3338_v24 = vadd.f32 %v1665_v22, %v1311_v20 }
 0x18d   : > { %v1291_v25 = vpop.f32.mrb[60].mxu0  ;;  %v1670_v28 = vpop.f32.mrb[60].mxu1 }
 0x18e   : > { %v1312_v49 = vadd.f32 %v1291_v25, %v3298_v47  ;;  %v1293_v35 = vpop.f32.mrb[61].mxu0  ;;  %v1672_v29 = vpop.f32.mrb[61].mxu1  ;;  %v3351_v47 = vld [vmem:[%s3409_s2] ss:$0 sm:$0xff] }
 0x18f   : > { %v1294_v30 = vpop.f32.mrb[62].mxu0  ;;  %v1673_v41 = vpop.f32.mrb[62].mxu1 }
 0x190   : > { %v3343_v32 = vadd.f32 %v1670_v28, %v1312_v49  ;;  %v1313_v33 = vadd.f32 %v1294_v30, %v3300_v53  ;;  %v1296_v34 = vpop.f32.mrb[63].mxu0  ;;  %v1675_v1 = vpop.f32.mrb[63].mxu1 }
 0x192   : > { %v3346_v36 = vadd.f32 %v1673_v41, %v1313_v33 }
 0x195   : > { %v1993_v37 = vpop.f32.mrb[64].mxu0  ;;  %v2025_v40 = vpop.f32.mrb[64].mxu1 }
 0x196   : > { %v2056_v59 = vadd.f32 %v1993_v37, %v3303_v63  ;;  %v1995_v42 = vpop.f32.mrb[65].mxu0  ;;  %v2064_v43 = vadd.f32 %v2025_v40, %v1685_v55  ;;  %v2027_v45 = vpop.f32.mrb[65].mxu1 }
 0x197   : > { %v1996_v53 = vpop.f32.mrb[66].mxu0  ;;  %v2028_v50 = vpop.f32.mrb[66].mxu1 }
 0x198   : > { %v2111_v46 = vadd.f32 %v3351_v47, %v2056_v59  ;;  %v2057_v48 = vadd.f32 %v1996_v53, %v3306_v7  ;;  %v1998_v51 = vpop.f32.mrb[67].mxu0  ;;  %v2119_v63 = vadd.f32 %v3351_v47, %v2064_v43  ;;  %v2065_v52 = vadd.f32 %v2028_v50, %v1686_v61  ;;  %v2030_v6 = vpop.f32.mrb[67].mxu1 }
 0x19a   : > { %v2127_v55 = vmax.f32 %v2111_v46, 0.0  ;;  %v2112_v56 = vadd.f32 %v3351_v47, %v2057_v48  ;;  %v2135_v57 = vmax.f32 %v2119_v63, 0.0  ;;  %v2120_v7 = vadd.f32 %v3351_v47, %v2065_v52 }
 0x19c   : > { %2143 = vst [vmem:[%s3359_s28] sm:$0xff] %v2127_v55  ;;  %v2128_v58 = vmax.f32 %v2112_v56, 0.0  ;;  %2151 = vst [vmem:[%s3359_s28 + $0x40] sm:$0xff] %v2135_v57  ;;  %v2136_v60 = vmax.f32 %v2120_v7, 0.0 }
 0x19d   : > { %v2001_v11 = vpop.f32.mrb[68].mxu0  ;;  %v2033_v2 = vpop.f32.mrb[68].mxu1 }
 0x19e   : > { %2144 = vst [vmem:[%s3359_s28 + $0x8] sm:$0xff] %v2128_v58  ;;  %v2058_v62 = vadd.f32 %v2001_v11, %v3309_v14  ;;  %v2003_v3 = vpop.f32.mrb[69].mxu0  ;;  %2152 = vst [vmem:[%s3359_s28 + $0x48] sm:$0xff] %v2136_v60  ;;  %v2066_v61 = vadd.f32 %v2033_v2, %v3329_v8  ;;  %v2035_v4 = vpop.f32.mrb[69].mxu1 }
 0x19f   : > { %v2004_v5 = vpop.f32.mrb[70].mxu0  ;;  %v2036_v10 = vpop.f32.mrb[70].mxu1 }
 0x1a0   : > { %v2113_v16 = vadd.f32 %v3351_v47, %v2058_v62  ;;  %v2059_v9 = vadd.f32 %v2004_v5, %v3312_v44  ;;  %v2006_v12 = vpop.f32.mrb[71].mxu0  ;;  %v2121_v13 = vadd.f32 %v3351_v47, %v2066_v61  ;;  %v2067_v14 = vadd.f32 %v2036_v10, %v3332_v21  ;;  %v2038_v39 = vpop.f32.mrb[71].mxu1 }
 0x1a2   : > { %v2129_v15 = vmax.f32 %v2113_v16, 0.0  ;;  %v2114_v17 = vadd.f32 %v3351_v47, %v2059_v9  ;;  %v2137_v8 = vmax.f32 %v2121_v13, 0.0  ;;  %v2122_v26 = vadd.f32 %v3351_v47, %v2067_v14 }
 0x1a4   : > { %2145 = vst [vmem:[%s3359_s28 + $0x10] sm:$0xff] %v2129_v15  ;;  %v2130_v18 = vmax.f32 %v2114_v17, 0.0  ;;  %2153 = vst [vmem:[%s3359_s28 + $0x50] sm:$0xff] %v2137_v8  ;;  %v2138_v20 = vmax.f32 %v2122_v26, 0.0 }
 0x1a5   : > { %v2009_v22 = vpop.f32.mrb[72].mxu0  ;;  %v2041_v23 = vpop.f32.mrb[72].mxu1 }
 0x1a6   : > { %2146 = vst [vmem:[%s3359_s28 + $0x18] sm:$0xff] %v2130_v18  ;;  %v2060_v44 = vadd.f32 %v2009_v22, %v3315_v27  ;;  %v2011_v31 = vpop.f32.mrb[73].mxu0  ;;  %2154 = vst [vmem:[%s3359_s28 + $0x58] sm:$0xff] %v2138_v20  ;;  %v2068_v21 = vadd.f32 %v2041_v23, %v3335_v19  ;;  %v2043_v25 = vpop.f32.mrb[73].mxu1 }
 0x1a7   : > { %v2012_v49 = vpop.f32.mrb[74].mxu0  ;;  %v2044_v29 = vpop.f32.mrb[74].mxu1 }
 0x1a8   : > { %v2115_v28 = vadd.f32 %v3351_v47, %v2060_v44  ;;  %v2061_v35 = vadd.f32 %v2012_v49, %v3318_v54  ;;  %v2014_v30 = vpop.f32.mrb[75].mxu0  ;;  %v2123_v33 = vadd.f32 %v3351_v47, %v2068_v21  ;;  %v2069_v27 = vadd.f32 %v2044_v29, %v3338_v24  ;;  %v2046_v41 = vpop.f32.mrb[75].mxu1 }
 0x1aa   : > { %v2131_v34 = vmax.f32 %v2115_v28, 0.0  ;;  %v2116_v1 = vadd.f32 %v3351_v47, %v2061_v35  ;;  %v2139_v19 = vmax.f32 %v2123_v33, 0.0  ;;  %v2124_v37 = vadd.f32 %v3351_v47, %v2069_v27 }
 0x1ac   : > { %2147 = vst [vmem:[%s3359_s28 + $0x20] sm:$0xff] %v2131_v34  ;;  %v2132_v59 = vmax.f32 %v2116_v1, 0.0  ;;  %2155 = vst [vmem:[%s3359_s28 + $0x60] sm:$0xff] %v2139_v19  ;;  %v2140_v40 = vmax.f32 %v2124_v37, 0.0 }
 0x1ad   : > { %v2017_v42 = vpop.f32.mrb[76].mxu0  ;;  %v2049_v43 = vpop.f32.mrb[76].mxu1 }
 0x1ae   : > { %2148 = vst [vmem:[%s3359_s28 + $0x28] sm:$0xff] %v2132_v59  ;;  %v2062_v54 = vadd.f32 %v2017_v42, %v3321_v38  ;;  %v2019_v45 = vpop.f32.mrb[77].mxu0  ;;  %2156 = vst [vmem:[%s3359_s28 + $0x68] sm:$0xff] %v2140_v40  ;;  %v2070_v24 = vadd.f32 %v2049_v43, %v3343_v32  ;;  %v2051_v53 = vpop.f32.mrb[77].mxu1 }
 0x1af   : > { %v2020_v46 = vpop.f32.mrb[78].mxu0  ;;  %v2052_v51 = vpop.f32.mrb[78].mxu1 }
 0x1b0   : > { %v2117_v48 = vadd.f32 %v3351_v47, %v2062_v54  ;;  %v2063_v50 = vadd.f32 %v2020_v46, %v3324_v0  ;;  %v2022_v63 = vpop.f32.mrb[79].mxu0  ;;  %v2125_v52 = vadd.f32 %v3351_v47, %v2070_v24  ;;  %v2071_v38 = vadd.f32 %v2052_v51, %v3346_v36  ;;  %v2054_v6 = vpop.f32.mrb[79].mxu1 }
 0x1b2   : > { %v2133_v55 = vmax.f32 %v2117_v48, 0.0  ;;  %v2118_v56 = vadd.f32 %v3351_v47, %v2063_v50  ;;  %v2141_v32 = vmax.f32 %v2125_v52, 0.0  ;;  %v2126_v57 = vadd.f32 %v3351_v47, %v2071_v38 }
 0x1b4   : > { %2149 = vst [vmem:[%s3359_s28 + $0x30] sm:$0xff] %v2133_v55  ;;  %v2134_v7 = vmax.f32 %v2118_v56, 0.0  ;;  %2157 = vst [vmem:[%s3359_s28 + $0x70] sm:$0xff] %v2141_v32  ;;  %v2142_v58 = vmax.f32 %v2126_v57, 0.0 }
 0x1b6   : > { %2150 = vst [vmem:[%s3359_s28 + $0x38] sm:$0xff] %v2134_v7  ;;  %2158 = vst [vmem:[%s3359_s28 + $0x78] sm:$0xff] %v2142_v58 }
 0x1b7 PF: > { %s13_s12 = sadd.s32 1, %s2763_s12  }
 0x1b8   : > { %p10_p5 = scmp.ge.s32.totalorder %s13_s12, 6  }
 0x1ba   :  { %12 = sbr.rel (!%p10_p5) target bundleno = 1 (0x1), region = 70 }

// kernel: inception_block_a.4
= control target key start
LH: loop header
LB: loop body
LE: loop exit
PB: predicated region body
PF: predicated region fallthrough
CT: control target
= control target key end

     0   :  { %s6314_s18 = smov 0   ;;  %s7941_s0 = inlined_call_operand.vmem [shape: bf16[36,16,192], index: 0, kind: input, shape index: {}]   ;;  %s7942_s1 = inlined_call_operand.vmem [shape: bf16[3,192,128], index: 1, kind: input, shape index: {}]   ;;  %s7943_s2 = inlined_call_operand.vmem [shape: f32[1,128], index: 2, kind: input, shape index: {}]   ;;  %s7944_s3 = inlined_call_operand.vmem [shape: bf16[3,384,128], index: 3, kind: input, shape index: {}]   ;;  %s7945_s4 = inlined_call_operand.vmem [shape: f32[1,128], index: 4, kind: input, shape index: {}]   ;;  %s7946_s5 = inlined_call_operand.vmem [shape: f32[512,128], index: 5, kind: output, shape index: {}]  }
   0x1 LB: > { %s4616_s19 = sadd.s32 4294967295, %s6280_s18   ;;  %p4620_p0 = scmp.ge.s32.totalorder %s6280_s18, 1  ;;  %s6280_s18 = sphi %s6314_s18, %s15_s18  }
   0x2   : > { %p189_p1 = scmp.lt.s32.totalorder %s6280_s18, 3 }
   0x4   : > { %p190_p2 = pnand %p4620_p0, %p189_p1 }
   0x6   : > { %193 = sbr.rel (%p190_p2) target bundleno = 974 (0x3ce), region = 40 }
   0xd   : > { %v6112_v0 = vld [vmem:[%s7942_s1] sm:$0xff]   ;;  %v7947_v1 = vmov 0   ;;  %v6114_v3 = vld [vmem:[%s7942_s1 + $0x8] sm:$0xff]   ;;  %v6116_v5 = vld [vmem:[%s7942_s1 + $0x10] sm:$0xff]   ;;  %s218_s7 = smul.u32 18, %s4616_s19  ;;  %vm568_vm0 = vcmask 523264  }
   0xe   : > { %617 = vmatprep.subr.bf16.mxu0 %v7947_v1  ;;  %1196 = vmatprep.subr.bf16.mxu1 %v7947_v1  ;;  %v6113_v2 = vld [vmem:[%s7942_s1 + $0x60] sm:$0xff]   ;;  %v6115_v4 = vld [vmem:[%s7942_s1 + $0x68] sm:$0xff]   ;;  %v6117_v6 = vld [vmem:[%s7942_s1 + $0x70] sm:$0xff]   ;;  %vm6283_vm5 = vmmov 1   ;;  %s4623_s14 = sshll.u32 %s4616_s19, 5 }
   0xf   : > { %618 = vmatpush1.bf16.msra.mxu0 %v6112_v0  ;;  %1197 = vmatpush1.bf16.msra.mxu1 %v6113_v2  ;;  %v6118_v7 = vld [vmem:[%s7942_s1 + $0x18] sm:$0xff]   ;;  %p219_p3 = scmp.lt.s32.totalorder %s218_s7, 35  ;;  %v6120_v9 = vld [vmem:[%s7942_s1 + $0x20] sm:$0xff]   ;;  %v6122_v11 = vld [vmem:[%s7942_s1 + $0x28] sm:$0xff]   ;;  %p226_p4 = scmp.lt.s32.totalorder %s4623_s14, 63 }
  0x10   : > { %619 = vmatprep.subr.bf16.mxu0 %v7947_v1  ;;  %1198 = vmatprep.subr.bf16.mxu1 %v7947_v1  ;;  %v6119_v8 = vld [vmem:[%s7942_s1 + $0x78] sm:$0xff]   ;;  %v6121_v10 = vld [vmem:[%s7942_s1 + $0x80] sm:$0xff]   ;;  %v6123_v12 = vld [vmem:[%s7942_s1 + $0x88] sm:$0xff]  }
  0x11   : > { %s7959_s7 = smov (!%p219_p3, %s218_s7), 35  ;;  %v6124_v13 = vld [vmem:[%s7942_s1 + $0x30] sm:$0xff]   ;;  %v6126_v16 = vld [vmem:[%s7942_s1 + $0x38] sm:$0xff]   ;;  %v6128_v19 = vld [vmem:[%s7942_s1 + $0x40] sm:$0xff]   ;;  %s7961_s14 = smov (!%p226_p4, %s4623_s14), 63 }
  0x12   : > { %s5089_s22 = sshll.u32 %s7959_s7, 4  ;;  %v6125_v14 = vld [vmem:[%s7942_s1 + $0x90] sm:$0xff]   ;;  %v6127_v18 = vld [vmem:[%s7942_s1 + $0x98] sm:$0xff]   ;;  %v6129_v20 = vld [vmem:[%s7942_s1 + $0xa0] sm:$0xff]   ;;  %s4624_s19 = sshll.u32 %s7961_s14, 3 }
  0x13   : > { %620 = vmatpush1.bf16.msra.mxu0 %v6114_v3  ;;  %1199 = vmatpush1.bf16.msra.mxu1 %v6115_v4  ;;  %s6378_s27 = scalar_lea.vmem %s7941_s0, %s5089_s22  ;;  %v6130_v21 = vld [vmem:[%s7942_s1 + $0x48] sm:$0xff]   ;;  %v6132_v23 = vld [vmem:[%s7942_s1 + $0x50] sm:$0xff]   ;;  %v6134_v25 = vld [vmem:[%s7942_s1 + $0x58] sm:$0xff]   ;;  %s7844_s21 = scalar_lea.vmem %s7946_s5, %s4624_s19 }
  0x14   : > { %621 = vmatprep.subr.bf16.mxu0 %v7947_v1  ;;  %1200 = vmatprep.subr.bf16.mxu1 %v7947_v1  ;;  %v6138_v15 = vld [vmem:[%s6378_s27 + $0x4] ss:$8 sps:$4 sm:$0xff]   ;;  %v6141_v17 = vld [vmem:[%s6378_s27 + $0x14] ss:$8 sps:$4 sm:$0xff]   ;;  %v6136_v27 = vld [vmem:[%s6378_s27] ss:$8 sps:$4 sm:$0xff]  }
  0x15   : > { %4669 = vmatprep.mubr.msk.bf16.mxu0 %vm568_vm0, %v6138_v15  ;;  %4785 = vmatprep.mubr.msk.bf16.mxu1 %vm568_vm0, %v6141_v17  ;;  %v6131_v22 = vld [vmem:[%s7942_s1 + $0xa8] sm:$0xff]   ;;  %v6133_v24 = vld [vmem:[%s7942_s1 + $0xb0] sm:$0xff]   ;;  %v6135_v26 = vld [vmem:[%s7942_s1 + $0xb8] sm:$0xff]  }
  0x16   : > { %v6139_v28 = vld [vmem:[%s6378_s27 + $0x10] ss:$8 sps:$4 sm:$0xff]   ;;  %v6142_v29 = vld [vmem:[%s7942_s1 + $0xc0] sm:$0xff]   ;;  %v6146_v31 = vld [vmem:[%s7942_s1 + $0xc8] sm:$0xff]  }
  0x17   : > { %622 = vmatpush1.bf16.msra.mxu0 %v6116_v5  ;;  %1201 = vmatpush1.bf16.msra.mxu1 %v6117_v6  ;;  %v6435_v30 = vld [vmem:[%s6378_s27 + $0x24] ss:$8 sps:$4 sm:$0xff]   ;;  %v6447_v32 = vld [vmem:[%s6378_s27 + $0x20] ss:$8 sps:$4 sm:$0xff]   ;;  %v6451_v33 = vld [vmem:[%s6378_s27 + $0x34] ss:$8 sps:$4 sm:$0xff]  }
  0x18   : > { %623 = vmatprep.subr.bf16.mxu0 %v7947_v1  ;;  %1202 = vmatprep.subr.bf16.mxu1 %v7947_v1  ;;  %v6152_v34 = vld [vmem:[%s7942_s1 + $0xd0] sm:$0xff]   ;;  %v6157_v35 = vld [vmem:[%s7942_s1 + $0xd8] sm:$0xff]   ;;  %v6471_v37 = vld [vmem:[%s6378_s27 + $0x44] ss:$8 sps:$4 sm:$0xff]  }
  0x19   : > { %v6467_v36 = vld [vmem:[%s6378_s27 + $0x30] ss:$8 sps:$4 sm:$0xff]   ;;  %v6161_v38 = vld [vmem:[%s7942_s1 + $0xe0] sm:$0xff]   ;;  %v6167_v39 = vld [vmem:[%s7942_s1 + $0xe8] sm:$0xff]  }
  0x1a   : > { %v6489_v40 = vld [vmem:[%s6378_s27 + $0x40] ss:$8 sps:$4 sm:$0xff]   ;;  %v6493_v41 = vld [vmem:[%s6378_s27 + $0x54] ss:$8 sps:$4 sm:$0xff]   ;;  %v6511_v44 = vld [vmem:[%s6378_s27 + $0x50] ss:$8 sps:$4 sm:$0xff]  }
  0x1b   : > { %624 = vmatpush1.bf16.msra.mxu0 %v6118_v7  ;;  %1203 = vmatpush1.bf16.msra.mxu1 %v6119_v8  ;;  %v6172_v42 = vld [vmem:[%s7942_s1 + $0xf0] sm:$0xff]   ;;  %v6176_v43 = vld [vmem:[%s7942_s1 + $0xf8] sm:$0xff]   ;;  %v6515_v45 = vld [vmem:[%s6378_s27 + $0x64] ss:$8 sps:$4 sm:$0xff]  }
  0x1c   : > { %625 = vmatprep.subr.bf16.mxu0 %v7947_v1  ;;  %1204 = vmatprep.subr.bf16.mxu1 %v7947_v1  ;;  %v6182_v46 = vld [vmem:[%s7942_s1 + $0x100] sm:$0xff]   ;;  %v6187_v47 = vld [vmem:[%s7942_s1 + $0x108] sm:$0xff]   ;;  %v6537_v49 = vld [vmem:[%s6378_s27 + $0x74] ss:$8 sps:$4 sm:$0xff]  }
  0x1d   : > { %v6533_v48 = vld [vmem:[%s6378_s27 + $0x60] ss:$8 sps:$4 sm:$0xff]   ;;  %v6191_v50 = vld [vmem:[%s7942_s1 + $0x110] sm:$0xff]   ;;  %v6197_v51 = vld [vmem:[%s7942_s1 + $0x118] sm:$0xff]  }
  0x1e   : > { %v6555_v52 = vld [vmem:[%s6378_s27 + $0x70] ss:$8 sps:$4 sm:$0xff]   ;;  %v6559_v53 = vld [vmem:[%s6378_s27 + $0x84] ss:$8 sps:$4 sm:$0xff]   ;;  %v6168_v54 = vld [vmem:[%s6378_s27 + $0x80] ss:$8 sps:$4 sm:$0xff]  }
  0x1f   : > { %626 = vmatpush1.bf16.msra.mxu0 %v6120_v9  ;;  %1205 = vmatpush1.bf16.msra.mxu1 %v6121_v10  ;;  %v6570_v55 = vld [vmem:[%s6378_s27 + $0x94] ss:$8 sps:$4 sm:$0xff]   ;;  %v6171_v56 = vld [vmem:[%s6378_s27 + $0x90] ss:$8 sps:$4 sm:$0xff]   ;;  %v6173_v57 = vld [vmem:[%s6378_s27 + $0xa4] ss:$8 sps:$4 sm:$0xff]  }
  0x20   : > { %627 = vmatprep.subr.bf16.mxu0 %v7947_v1  ;;  %1206 = vmatprep.subr.bf16.mxu1 %v7947_v1  ;;  %v6175_v58 = vld [vmem:[%s6378_s27 + $0xa0] ss:$8 sps:$4 sm:$0xff]   ;;  %v6177_v59 = vld [vmem:[%s6378_s27 + $0xb4] ss:$8 sps:$4 sm:$0xff]   ;;  %v6179_v60 = vld [vmem:[%s6378_s27 + $0xb0] ss:$8 sps:$4 sm:$0xff]  }
  0x21   : > { %v6180_v61 = vld [vmem:[%s6378_s27 + $0xc4] ss:$8 sps:$4 sm:$0xff]   ;;  %v6183_v62 = vld [vmem:[%s6378_s27 + $0xc0] ss:$8 sps:$4 sm:$0xff]   ;;  %v6184_v63 = vld [vmem:[%s6378_s27 + $0xd4] ss:$8 sps:$4 sm:$0xff]  }
  0x22   : > { %v6186_v0 = vld [vmem:[%s6378_s27 + $0xd0] ss:$8 sps:$4 sm:$0xff]   ;;  %v6188_v2 = vld [vmem:[%s6378_s27 + $0xe4] ss:$8 sps:$4 sm:$0xff]   ;;  %v6190_v3 = vld [vmem:[%s6378_s27 + $0xe0] ss:$8 sps:$4 sm:$0xff]  }
  0x23   : > { %628 = vmatpush1.bf16.msra.mxu0 %v6122_v11  ;;  %1207 = vmatpush1.bf16.msra.mxu1 %v6123_v12  ;;  %v6192_v4 = vld [vmem:[%s6378_s27 + $0xf4] ss:$8 sps:$4 sm:$0xff]   ;;  %v6194_v5 = vld [vmem:[%s6378_s27 + $0xf0] ss:$8 sps:$4 sm:$0xff]   ;;  %v6604_v6 = vld [vmem:[%s6378_s27 + $0x104] ss:$8 sps:$4 sm:$0xff]  }
  0x24   : > { %629 = vmatprep.subr.bf16.mxu0 %v7947_v1  ;;  %1208 = vmatprep.subr.bf16.mxu1 %v7947_v1  ;;  %v6610_v7 = vld [vmem:[%s6378_s27 + $0x100] ss:$8 sps:$4 sm:$0xff]   ;;  %v6206_v12 = vld [vmem:[%s7944_s3 + $0x50] sm:$0xff]   ;;  %v6209_v15 = vld [vmem:[%s7944_s3 + $0x58] sm:$0xff]  }
  0x25   : > { %v6202_v8 = vld [vmem:[%s7944_s3 + $0x40] sm:$0xff]   ;;  %v6204_v10 = vld [vmem:[%s7944_s3 + $0x48] sm:$0xff]  }
  0x26   : > { %v6203_v9 = vld [vmem:[%s7944_s3] sm:$0xff]   ;;  %v6205_v11 = vld [vmem:[%s7944_s3 + $0x8] sm:$0xff]  }
  0x27   : > { %630 = vmatpush1.bf16.msra.mxu0 %v6124_v13  ;;  %1209 = vmatpush1.bf16.msra.mxu1 %v6125_v14  ;;  %v6207_v13 = vld [vmem:[%s7944_s3 + $0x80] sm:$0xff]   ;;  %v6208_v14 = vld [vmem:[%s7944_s3 + $0x10] sm:$0xff]  }
  0x28   : > { %631 = vmatprep.subr.bf16.mxu0 %v7947_v1  ;;  %1210 = vmatprep.subr.bf16.mxu1 %v7947_v1 }
  0x2b   : > { %632 = vmatpush1.bf16.msra.mxu0 %v6126_v16  ;;  %1211 = vmatpush1.bf16.msra.mxu1 %v6127_v18  ;;  %v6210_v16 = vld [vmem:[%s7944_s3 + $0x88] sm:$0xff]   ;;  %v6212_v18 = vld [vmem:[%s7944_s3 + $0x60] sm:$0xff]  }
  0x2c   : > { %633 = vmatprep.subr.bf16.mxu0 %v7947_v1  ;;  %1212 = vmatprep.subr.bf16.mxu1 %v7947_v1 }
  0x2f   : > { %634 = vmatpush1.bf16.msra.mxu0 %v6128_v19  ;;  %1213 = vmatpush1.bf16.msra.mxu1 %v6129_v20  ;;  %v6213_v19 = vld [vmem:[%s7944_s3 + $0x90] sm:$0xff]   ;;  %v6214_v20 = vld [vmem:[%s7944_s3 + $0x20] sm:$0xff]  }
  0x30   : > { %635 = vmatprep.subr.bf16.mxu0 %v7947_v1  ;;  %1214 = vmatprep.subr.bf16.mxu1 %v7947_v1 }
  0x33   : > { %636 = vmatpush1.bf16.msra.mxu0 %v6130_v21  ;;  %1215 = vmatpush1.bf16.msra.mxu1 %v6131_v22  ;;  %v6215_v21 = vld [vmem:[%s7944_s3 + $0x68] sm:$0xff]   ;;  %v6216_v22 = vld [vmem:[%s7944_s3 + $0x98] sm:$0xff]  }
  0x34   : > { %637 = vmatprep.subr.bf16.mxu0 %v7947_v1  ;;  %1216 = vmatprep.subr.bf16.mxu1 %v7947_v1 }
  0x37   : > { %638 = vmatpush1.bf16.msra.mxu0 %v6132_v23  ;;  %1217 = vmatpush1.bf16.msra.mxu1 %v6133_v24  ;;  %v6217_v23 = vld [vmem:[%s7944_s3 + $0x28] sm:$0xff]   ;;  %v6199_v24 = vld [vmem:[%s6378_s27 + $0x114] ss:$8 sps:$4 sm:$0xff]  }
  0x38   : > { %639 = vmatprep.subr.bf16.mxu0 %v7947_v1  ;;  %1218 = vmatprep.subr.bf16.mxu1 %v7947_v1 }
  0x3b   : > { %640 = vmatpush1.bf16.msra.mxu0 %v6134_v25  ;;  %1219 = vmatpush1.bf16.msra.mxu1 %v6135_v26  ;;  %v6218_v25 = vld [vmem:[%s7944_s3 + $0x70] sm:$0xff]   ;;  %v6219_v26 = vld [vmem:[%s7944_s3 + $0xa0] sm:$0xff]  }
  0x3c   : > { %1775 = vmatprep.subr.bf16.mxu0 %v7947_v1  ;;  %5918 = vmatprep.subr.bf16.mxu1 %v7947_v1 }
  0x3e   : > { %650 = vmatmul.mubr.bf16.vlgmr.msra.gmra.mrb[0].mxu0 %v6136_v27  ;;  %1229 = vmatmul.mubr.bf16.vlgmr.msra.gmra.mrb[0].mxu1 %v6139_v28  ;;  %v6220_v27 = vld [vmem:[%s7944_s3 + $0x30] sm:$0xff]  }
  0x3f   : > { %4670 = vmatprep.mubr.msk.bf16.mxu0 %vm568_vm0, %v6141_v17  ;;  %5930 = vmatpush1.bf16.msra.mxu1 %v6142_v29  ;;  %v6211_v17 = vld [vmem:[%s7944_s3 + $0x18] sm:$0xff]  }
  0x40   : > { %4786 = vmatprep.mubr.msk.bf16.mxu1 %vm568_vm0, %v6435_v30  ;;  %5919 = vmatprep.subr.bf16.mxu1 %v7947_v1 }
  0x41   : > { %1776 = vmatpush1.bf16.msra.mxu0 %v6142_v29 }
  0x42   : > { %1777 = vmatprep.subr.bf16.mxu0 %v7947_v1 }
  0x43   : > { %5931 = vmatpush1.bf16.msra.mxu1 %v6146_v31 }
  0x44   : > { %5920 = vmatprep.subr.bf16.mxu1 %v7947_v1 }
  0x45   : > { %1778 = vmatpush1.bf16.msra.mxu0 %v6146_v31  ;;  %v6221_v31 = vld [vmem:[%s7944_s3 + $0x78] sm:$0xff]  }
  0x46   : > { %658 = vmatmul.mubr.bf16.gmra.mrb[4].mxu0 %v6139_v28  ;;  %1779 = vmatprep.subr.bf16.mxu0 %v7947_v1 }
  0x47   : > { %1237 = vmatmul.mubr.bf16.gmra.mrb[4].mxu1 %v6447_v32  ;;  %4671 = vmatprep.mubr.msk.bf16.mxu0 %vm568_vm0, %v6435_v30 }
  0x48   : > { %4787 = vmatprep.mubr.msk.bf16.mxu1 %vm568_vm0, %v6451_v33  ;;  %5932 = vmatpush1.bf16.msra.mxu1 %v6152_v34 }
  0x49   : > { %5921 = vmatprep.subr.bf16.mxu1 %v7947_v1  ;;  %1780 = vmatpush1.bf16.msra.mxu0 %v6152_v34 }
  0x4a   : > { %1781 = vmatprep.subr.bf16.mxu0 %v7947_v1 }
  0x4c   : > { %5933 = vmatpush1.bf16.msra.mxu1 %v6157_v35 }
  0x4d   : > { %5922 = vmatprep.subr.bf16.mxu1 %v7947_v1  ;;  %1782 = vmatpush1.bf16.msra.mxu0 %v6157_v35 }
  0x4e   : > { %666 = vmatmul.mubr.bf16.gmra.mrb[8].mxu0 %v6447_v32  ;;  %1783 = vmatprep.subr.bf16.mxu0 %v7947_v1 }
  0x4f   : > { %1245 = vmatmul.mubr.bf16.gmra.mrb[8].mxu1 %v6467_v36  ;;  %4672 = vmatprep.mubr.msk.bf16.mxu0 %vm568_vm0, %v6451_v33 }
  0x50   : > { %4788 = vmatprep.mubr.msk.bf16.mxu1 %vm568_vm0, %v6471_v37  ;;  %5934 = vmatpush1.bf16.msra.mxu1 %v6161_v38 }
  0x51   : > { %5923 = vmatprep.subr.bf16.mxu1 %v7947_v1  ;;  %1784 = vmatpush1.bf16.msra.mxu0 %v6161_v38 }
  0x52   : > { %1785 = vmatprep.subr.bf16.mxu0 %v7947_v1 }
  0x54   : > { %5935 = vmatpush1.bf16.msra.mxu1 %v6167_v39 }
  0x55   : > { %5924 = vmatprep.subr.bf16.mxu1 %v7947_v1  ;;  %1786 = vmatpush1.bf16.msra.mxu0 %v6167_v39 }
  0x56   : > { %674 = vmatmul.mubr.bf16.gmra.mrb[12].mxu0 %v6467_v36  ;;  %1787 = vmatprep.subr.bf16.mxu0 %v7947_v1 }
  0x57   : > { %1253 = vmatmul.mubr.bf16.gmra.mrb[12].mxu1 %v6489_v40  ;;  %4673 = vmatprep.mubr.msk.bf16.mxu0 %vm568_vm0, %v6471_v37 }
  0x58   : > { %4789 = vmatprep.mubr.msk.bf16.mxu1 %vm568_vm0, %v6493_v41  ;;  %5936 = vmatpush1.bf16.msra.mxu1 %v6172_v42 }
  0x59   : > { %5925 = vmatprep.subr.bf16.mxu1 %v7947_v1  ;;  %1788 = vmatpush1.bf16.msra.mxu0 %v6172_v42  ;;  %v6224_v42 = vld [vmem:[%s7944_s3 + $0xb0] sm:$0xff]  }
  0x5a   : > { %1789 = vmatprep.subr.bf16.mxu0 %v7947_v1 }
  0x5c   : > { %5937 = vmatpush1.bf16.msra.mxu1 %v6176_v43 }
  0x5d   : > { %5926 = vmatprep.subr.bf16.mxu1 %v7947_v1  ;;  %1790 = vmatpush1.bf16.msra.mxu0 %v6176_v43 }
  0x5e   : > { %682 = vmatmul.mubr.bf16.gmra.mrb[16].mxu0 %v6489_v40  ;;  %1791 = vmatprep.subr.bf16.mxu0 %v7947_v1 }
  0x5f   : > { %1261 = vmatmul.mubr.bf16.gmra.mrb[16].mxu1 %v6511_v44  ;;  %4674 = vmatprep.mubr.msk.bf16.mxu0 %vm568_vm0, %v6493_v41 }
  0x60   : > { %4790 = vmatprep.mubr.msk.bf16.mxu1 %vm568_vm0, %v6515_v45  ;;  %5938 = vmatpush1.bf16.msra.mxu1 %v6182_v46 }
  0x61   : > { %5927 = vmatprep.subr.bf16.mxu1 %v7947_v1  ;;  %1792 = vmatpush1.bf16.msra.mxu0 %v6182_v46  ;;  %v6225_v46 = vld [vmem:[%s7944_s3 + $0xb8] sm:$0xff]  }
  0x62   : > { %1793 = vmatprep.subr.bf16.mxu0 %v7947_v1 }
  0x64   : > { %5939 = vmatpush1.bf16.msra.mxu1 %v6187_v47 }
  0x65   : > { %5928 = vmatprep.subr.bf16.mxu1 %v7947_v1  ;;  %1794 = vmatpush1.bf16.msra.mxu0 %v6187_v47 }
  0x66   : > { %690 = vmatmul.mubr.bf16.gmra.mrb[20].mxu0 %v6511_v44  ;;  %1795 = vmatprep.subr.bf16.mxu0 %v7947_v1 }
  0x67   : > { %1269 = vmatmul.mubr.bf16.gmra.mrb[20].mxu1 %v6533_v48  ;;  %4675 = vmatprep.mubr.msk.bf16.mxu0 %vm568_vm0, %v6515_v45 }
  0x68   : > { %4791 = vmatprep.mubr.msk.bf16.mxu1 %vm568_vm0, %v6537_v49  ;;  %5940 = vmatpush1.bf16.msra.mxu1 %v6191_v50 }
  0x69   : > { %5929 = vmatprep.subr.bf16.mxu1 %v7947_v1  ;;  %1796 = vmatpush1.bf16.msra.mxu0 %v6191_v50 }
  0x6a   : > { %1797 = vmatprep.subr.bf16.mxu0 %v7947_v1 }
  0x6c   : > { %5941 = vmatpush1.bf16.msra.mxu1 %v6197_v51 }
  0x6d   : > { %1798 = vmatpush1.bf16.msra.mxu0 %v6197_v51  ;;  %5366 = vmatprep.subr.bf16.mxu1 %v6202_v8 }
  0x6e   : > { %698 = vmatmul.mubr.bf16.gmra.mrb[24].mxu0 %v6533_v48  ;;  %5774 = vmatprep.subr.bf16.mxu0 %v6207_v13 }
  0x6f   : > { %1277 = vmatmul.mubr.bf16.gmra.mrb[24].mxu1 %v6555_v52  ;;  %4676 = vmatprep.mubr.msk.bf16.mxu0 %vm568_vm0, %v6537_v49 }
  0x70   : > { %4792 = vmatprep.mubr.msk.bf16.mxu1 %vm568_vm0, %v6559_v53 }
  0x76   : > { %706 = vmatmul.mubr.bf16.gmra.mrb[28].mxu0 %v6555_v52 }
  0x77   : > { %1285 = vmatmul.mubr.bf16.gmra.mrb[28].mxu1 %v6168_v54  ;;  %4677 = vmatprep.mubr.msk.bf16.mxu0 %vm568_vm0, %v6559_v53 }
  0x78   : > { %4793 = vmatprep.mubr.msk.bf16.mxu1 %vm568_vm0, %v6570_v55 }
  0x7e   : > { %714 = vmatmul.mubr.bf16.gmra.mrb[32].mxu0 %v6168_v54 }
  0x7f   : > { %1293 = vmatmul.mubr.bf16.gmra.mrb[32].mxu1 %v6171_v56  ;;  %4678 = vmatprep.mubr.msk.bf16.mxu0 %vm568_vm0, %v6570_v55 }
  0x80   : > { %4794 = vmatprep.mubr.msk.bf16.mxu1 %vm568_vm0, %v6173_v57 }
  0x86   : > { %722 = vmatmul.mubr.bf16.gmra.mrb[36].mxu0 %v6171_v56 }
  0x87   : > { %1301 = vmatmul.mubr.bf16.gmra.mrb[36].mxu1 %v6175_v58  ;;  %4679 = vmatprep.mubr.msk.bf16.mxu0 %vm568_vm0, %v6173_v57 }
  0x88   : > { %4795 = vmatprep.mubr.msk.bf16.mxu1 %vm568_vm0, %v6177_v59 }
  0x8e   : > { %730 = vmatmul.mubr.bf16.gmra.mrb[40].mxu0 %v6175_v58 }
  0x8f   : > { %1309 = vmatmul.mubr.bf16.gmra.mrb[40].mxu1 %v6179_v60  ;;  %4680 = vmatprep.mubr.msk.bf16.mxu0 %vm568_vm0, %v6177_v59 }
  0x90   : > { %4796 = vmatprep.mubr.msk.bf16.mxu1 %vm568_vm0, %v6180_v61 }
  0x96   : > { %738 = vmatmul.mubr.bf16.gmra.mrb[44].mxu0 %v6179_v60 }
  0x97   : > { %1317 = vmatmul.mubr.bf16.gmra.mrb[44].mxu1 %v6183_v62  ;;  %4681 = vmatprep.mubr.msk.bf16.mxu0 %vm568_vm0, %v6180_v61 }
  0x98   : > { %4797 = vmatprep.mubr.msk.bf16.mxu1 %vm568_vm0, %v6184_v63 }
  0x9e   : > { %746 = vmatmul.mubr.bf16.gmra.mrb[48].mxu0 %v6183_v62 }
  0x9f   : > { %1325 = vmatmul.mubr.bf16.gmra.mrb[48].mxu1 %v6186_v0  ;;  %4682 = vmatprep.mubr.msk.bf16.mxu0 %vm568_vm0, %v6184_v63 }
  0xa0   : > { %4798 = vmatprep.mubr.msk.bf16.mxu1 %vm568_vm0, %v6188_v2 }
  0xa6   : > { %754 = vmatmul.mubr.bf16.gmra.mrb[52].mxu0 %v6186_v0 }
  0xa7   : > { %1333 = vmatmul.mubr.bf16.gmra.mrb[52].mxu1 %v6190_v3  ;;  %4683 = vmatprep.mubr.msk.bf16.mxu0 %vm568_vm0, %v6188_v2 }
  0xa8   : > { %4799 = vmatprep.mubr.msk.bf16.mxu1 %vm568_vm0, %v6192_v4 }
  0xae   : > { %762 = vmatmul.mubr.bf16.gmra.mrb[56].mxu0 %v6190_v3 }
  0xaf   : > { %1341 = vmatmul.mubr.bf16.gmra.mrb[56].mxu1 %v6194_v5  ;;  %4684 = vmatprep.mubr.msk.bf16.mxu0 %vm568_vm0, %v6192_v4 }
  0xb0   : > { %4800 = vmatprep.mubr.msk.bf16.mxu1 %vm568_vm0, %v6604_v6 }
  0xb6   : > { %770 = vmatmul.mubr.bf16.gmra.mrb[60].mxu0 %v6194_v5 }
  0xb7   : > { %1349 = vmatmul.mubr.bf16.gmra.mrb[60].mxu1 %v6610_v7  ;;  %4901 = vmatprep.mubr.msk.bf16.mxu0 %vm568_vm0, %v6435_v30 }
  0xb8   : > { %4905 = vmatprep.mubr.msk.bf16.mxu1 %vm568_vm0, %v6515_v45 }
  0xbe   : > { %1808 = vmatmul.mubr.bf16.vlgmr.msra.gmra.mrb[64].mxu0 %v6447_v32  ;;  %v6222_v32 = vld [vmem:[%s7944_s3 + $0xa8] sm:$0xff]  }
  0xbf   : > { %1840 = vmatmul.mubr.bf16.vlgmr.msra.gmra.mrb[64].mxu1 %v6533_v48  ;;  %4902 = vmatprep.mubr.msk.bf16.mxu0 %vm568_vm0, %v6451_v33 }
  0xc0   : > { %4906 = vmatprep.mubr.msk.bf16.mxu1 %vm568_vm0, %v6537_v49  ;;  %5367 = vmatpush3.bf16.msra.mxu1 %v6203_v9 }
  0xc1   : > { %5368 = vmatprep.subr.bf16.mxu1 %v6204_v10  ;;  %5775 = vmatpush3.bf16.msra.mxu0 %v6207_v13 }
  0xc2   : > { %5776 = vmatprep.subr.bf16.mxu0 %v6210_v16 }
  0xc4   : > { %5369 = vmatpush3.bf16.msra.mxu1 %v6205_v11 }
  0xc5   : > { %5370 = vmatprep.subr.bf16.mxu1 %v6206_v12  ;;  %5777 = vmatpush3.bf16.msra.mxu0 %v6210_v16 }
  0xc6   : > { %1816 = vmatmul.mubr.bf16.gmra.mrb[68].mxu0 %v6467_v36  ;;  %5778 = vmatprep.subr.bf16.mxu0 %v6213_v19  ;;  %v6201_v36 = vld [vmem:[%s6378_s27 + $0x110] ss:$8 sps:$4 sm:$0xff]  }
  0xc7   : > { %1848 = vmatmul.mubr.bf16.gmra.mrb[68].mxu1 %v6555_v52  ;;  %4903 = vmatprep.mubr.msk.bf16.mxu0 %vm568_vm0, %v6471_v37  ;;  %v6223_v37 = vld [vmem:[%s7944_s3 + $0x38] sm:$0xff]  }
  0xc8   : > { %4907 = vmatprep.mubr.msk.bf16.mxu1 %vm568_vm0, %v6559_v53  ;;  %5371 = vmatpush3.bf16.msra.mxu1 %v6208_v14 }
  0xc9   : > { %5372 = vmatprep.subr.bf16.mxu1 %v6209_v15  ;;  %5779 = vmatpush3.bf16.msra.mxu0 %v6213_v19 }
  0xca   : > { %5780 = vmatprep.subr.bf16.mxu0 %v6216_v22 }
  0xcc   : > { %5373 = vmatpush3.bf16.msra.mxu1 %v6211_v17 }
  0xcd   : > { %5374 = vmatprep.subr.bf16.mxu1 %v6212_v18  ;;  %5781 = vmatpush3.bf16.msra.mxu0 %v6216_v22 }
  0xce   : > { %1824 = vmatmul.mubr.bf16.gmra.mrb[72].mxu0 %v6489_v40  ;;  %5782 = vmatprep.subr.bf16.mxu0 %v6219_v26 }
  0xcf   : > { %1856 = vmatmul.mubr.bf16.gmra.mrb[72].mxu1 %v6168_v54  ;;  %4904 = vmatprep.mubr.msk.bf16.mxu0 %vm568_vm0, %v6493_v41 }
  0xd0   : > { %4908 = vmatprep.mubr.msk.bf16.mxu1 %vm568_vm0, %v6570_v55  ;;  %5375 = vmatpush3.bf16.msra.mxu1 %v6214_v20 }
  0xd1   : > { %5376 = vmatprep.subr.bf16.mxu1 %v6215_v21  ;;  %5783 = vmatpush3.bf16.msra.mxu0 %v6219_v26 }
  0xd2   : > { %5784 = vmatprep.subr.bf16.mxu0 %v6222_v32 }
  0xd4   : > { %5377 = vmatpush3.bf16.msra.mxu1 %v6217_v23 }
  0xd5   : > { %5378 = vmatprep.subr.bf16.mxu1 %v6218_v25  ;;  %5785 = vmatpush3.bf16.msra.mxu0 %v6222_v32 }
  0xd6   : > { %1832 = vmatmul.mubr.bf16.gmra.mrb[76].mxu0 %v6511_v44  ;;  %5786 = vmatprep.subr.bf16.mxu0 %v6224_v42 }
  0xd7   : > { %1864 = vmatmul.mubr.bf16.gmra.mrb[76].mxu1 %v6171_v56  ;;  %5790 = vmatprep.mubr.bf16.mxu0 %v7947_v1 }
  0xd8   : > { %4909 = vmatprep.mubr.msk.bf16.mxu1 %vm568_vm0, %v6173_v57  ;;  %5379 = vmatpush3.bf16.msra.mxu1 %v6220_v27  ;;  %v6747_v27 = vld [vmem:[%s7944_s3 + $0x140] sm:$0xff]  }
  0xd9   : > { %5380 = vmatprep.subr.bf16.mxu1 %v6221_v31  ;;  %5787 = vmatpush3.bf16.msra.mxu0 %v6224_v42 }
  0xda   : > { %5788 = vmatprep.subr.bf16.mxu0 %v6225_v46 }
  0xdc   : > { %5381 = vmatpush3.bf16.msra.mxu1 %v6223_v37 }
  0xdd   : > { %5789 = vmatpush3.bf16.msra.mxu0 %v6225_v46 }
  0xde   : > { %5822 = vmatprep.subr.bf16.mxu0 %v6747_v27 }
  0xdf   : > { %1872 = vmatmul.mubr.bf16.gmra.mrb[80].mxu1 %v6175_v58 }
  0xe0   : > { %4910 = vmatprep.mubr.msk.bf16.mxu1 %vm568_vm0, %v6177_v59 }
  0xe7   : > { %1880 = vmatmul.mubr.bf16.gmra.mrb[84].mxu1 %v6179_v60 }
  0xe8   : > { %4911 = vmatprep.mubr.msk.bf16.mxu1 %vm568_vm0, %v6180_v61 }
  0xef   : > { %1888 = vmatmul.mubr.bf16.gmra.mrb[88].mxu1 %v6183_v62 }
  0xf0   : > { %4912 = vmatprep.mubr.msk.bf16.mxu1 %vm568_vm0, %v6184_v63 }
  0xf7   : > { %1896 = vmatmul.mubr.bf16.gmra.mrb[92].mxu1 %v6186_v0 }
  0xf8   : > { %4913 = vmatprep.mubr.msk.bf16.mxu1 %vm568_vm0, %v6188_v2 }
  0xff   : > { %1904 = vmatmul.mubr.bf16.gmra.mrb[96].mxu1 %v6190_v3 }
 0x100   : > { %4914 = vmatprep.mubr.msk.bf16.mxu1 %vm568_vm0, %v6192_v4 }
 0x107   : > { %1912 = vmatmul.mubr.bf16.gmra.mrb[100].mxu1 %v6194_v5 }
 0x108   : > { %4915 = vmatprep.mubr.msk.bf16.mxu1 %vm568_vm0, %v6604_v6 }
 0x10f   : > { %1920 = vmatmul.mubr.bf16.gmra.mrb[104].mxu1 %v6610_v7 }
 0x110   : > { %4916 = vmatprep.mubr.msk.bf16.mxu1 %vm568_vm0, %v6199_v24 }
 0x111   : > { %v651_v28 = vpop.f32.mrb[0].mxu0  ;;  %v1230_v29 = vpop.f32.mrb[0].mxu1 }
 0x112   : > { %v653_v30 = vpop.f32.mrb[1].mxu0  ;;  %v6710_v33 = vadd.f32 %v1230_v29, %v651_v28  ;;  %v1232_v34 = vpop.f32.mrb[1].mxu1 }
 0x113   : > { %v654_v35 = vpop.f32.mrb[2].mxu0  ;;  %v1233_v38 = vpop.f32.mrb[2].mxu1 }
 0x114   : > { %v656_v39 = vpop.f32.mrb[3].mxu0  ;;  %v6716_v40 = vadd.f32 %v1233_v38, %v654_v35  ;;  %v1235_v41 = vpop.f32.mrb[3].mxu1 }
 0x117   : > { %1928 = vmatmul.mubr.bf16.gmra.mrb[108].mxu1 %v6201_v36 }
 0x118   : > { %2752 = vmatprep.mubr.bf16.mxu1 %v7947_v1 }
 0x119   : > { %v659_v43 = vpop.f32.mrb[4].mxu0 }
 0x11a   : > { %v1238_v44 = vpop.f32.mrb[4].mxu1  ;;  %v661_v45 = vpop.f32.mrb[5].mxu0 }
 0x11b   : > { %v6725_v47 = vadd.f32 %v1238_v44, %v659_v43  ;;  %v1240_v48 = vpop.f32.mrb[5].mxu1  ;;  %v662_v49 = vpop.f32.mrb[6].mxu0 }
 0x11c   : > { %v1241_v50 = vpop.f32.mrb[6].mxu1  ;;  %v664_v51 = vpop.f32.mrb[7].mxu0 }
 0x11d   : > { %v6727_v52 = vadd.f32 %v1241_v50, %v662_v49  ;;  %v1243_v53 = vpop.f32.mrb[7].mxu1 }
 0x11f   : > { %2753 = vmatmul.mubr.bf16.vlgmr.msra.gmra.mrb[112].mxu1 %v7947_v1 }
 0x121   : > { %v667_v54 = vpop.f32.mrb[8].mxu0 }
 0x122   : > { %v1246_v55 = vpop.f32.mrb[8].mxu1  ;;  %v669_v56 = vpop.f32.mrb[9].mxu0 }
 0x123   : > { %v6730_v57 = vadd.f32 %v1246_v55, %v667_v54  ;;  %v1248_v58 = vpop.f32.mrb[9].mxu1  ;;  %v670_v59 = vpop.f32.mrb[10].mxu0 }
 0x124   : > { %v1249_v60 = vpop.f32.mrb[10].mxu1  ;;  %v672_v61 = vpop.f32.mrb[11].mxu0 }
 0x125   : > { %v6732_v62 = vadd.f32 %v1249_v60, %v670_v59  ;;  %v1251_v63 = vpop.f32.mrb[11].mxu1 }
 0x129   : > { %v675_v0 = vpop.f32.mrb[12].mxu0 }
 0x12a   : > { %v1254_v2 = vpop.f32.mrb[12].mxu1  ;;  %v677_v3 = vpop.f32.mrb[13].mxu0 }
 0x12b   : > { %v6734_v4 = vadd.f32 %v1254_v2, %v675_v0  ;;  %v1256_v5 = vpop.f32.mrb[13].mxu1  ;;  %v678_v6 = vpop.f32.mrb[14].mxu0 }
 0x12c   : > { %v1257_v7 = vpop.f32.mrb[14].mxu1  ;;  %v680_v8 = vpop.f32.mrb[15].mxu0 }
 0x12d   : > { %v6736_v9 = vadd.f32 %v1257_v7, %v678_v6  ;;  %v1259_v10 = vpop.f32.mrb[15].mxu1 }
 0x131   : > { %v683_v11 = vpop.f32.mrb[16].mxu0 }
 0x132   : > { %v1262_v12 = vpop.f32.mrb[16].mxu1  ;;  %v685_v13 = vpop.f32.mrb[17].mxu0 }
 0x133   : > { %v6738_v14 = vadd.f32 %v1262_v12, %v683_v11  ;;  %v1264_v15 = vpop.f32.mrb[17].mxu1  ;;  %v686_v16 = vpop.f32.mrb[18].mxu0 }
 0x134   : > { %v1265_v17 = vpop.f32.mrb[18].mxu1  ;;  %v688_v18 = vpop.f32.mrb[19].mxu0 }
 0x135   : > { %v6740_v19 = vadd.f32 %v1265_v17, %v686_v16  ;;  %v1267_v20 = vpop.f32.mrb[19].mxu1 }
 0x139   : > { %v691_v21 = vpop.f32.mrb[20].mxu0 }
 0x13a   : > { %v1270_v22 = vpop.f32.mrb[20].mxu1  ;;  %v693_v23 = vpop.f32.mrb[21].mxu0 }
 0x13b   : > { %v6742_v24 = vadd.f32 %v1270_v22, %v691_v21  ;;  %v1272_v25 = vpop.f32.mrb[21].mxu1  ;;  %v694_v26 = vpop.f32.mrb[22].mxu0 }
 0x13c   : > { %v1273_v28 = vpop.f32.mrb[22].mxu1  ;;  %v696_v29 = vpop.f32.mrb[23].mxu0 }
 0x13d   : > { %v6749_v30 = vadd.f32 %v1273_v28, %v694_v26  ;;  %v1275_v31 = vpop.f32.mrb[23].mxu1 }
 0x141   : > { %v699_v32 = vpop.f32.mrb[24].mxu0 }
 0x142   : > { %v1278_v34 = vpop.f32.mrb[24].mxu1  ;;  %v701_v35 = vpop.f32.mrb[25].mxu0 }
 0x143   : > { %v6752_v36 = vadd.f32 %v1278_v34, %v699_v32  ;;  %v1280_v37 = vpop.f32.mrb[25].mxu1  ;;  %v702_v38 = vpop.f32.mrb[26].mxu0 }
 0x144   : > { %v1281_v39 = vpop.f32.mrb[26].mxu1  ;;  %v704_v41 = vpop.f32.mrb[27].mxu0 }
 0x145   : > { %v6754_v42 = vadd.f32 %v1281_v39, %v702_v38  ;;  %v1283_v43 = vpop.f32.mrb[27].mxu1 }
 0x149   : > { %v707_v44 = vpop.f32.mrb[28].mxu0 }
 0x14a   : > { %v1286_v45 = vpop.f32.mrb[28].mxu1  ;;  %v709_v46 = vpop.f32.mrb[29].mxu0 }
 0x14b   : > { %v6756_v48 = vadd.f32 %v1286_v45, %v707_v44  ;;  %v1288_v49 = vpop.f32.mrb[29].mxu1  ;;  %v710_v50 = vpop.f32.mrb[30].mxu0 }
 0x14c   : > { %v1289_v51 = vpop.f32.mrb[30].mxu1  ;;  %v712_v53 = vpop.f32.mrb[31].mxu0 }
 0x14d   : > { %v6758_v54 = vadd.f32 %v1289_v51, %v710_v50  ;;  %v1291_v55 = vpop.f32.mrb[31].mxu1 }
 0x151   : > { %v715_v56 = vpop.f32.mrb[32].mxu0 }
 0x152   : > { %v1294_v58 = vpop.f32.mrb[32].mxu1  ;;  %v717_v59 = vpop.f32.mrb[33].mxu0 }
 0x153   : > { %v6760_v60 = vadd.f32 %v1294_v58, %v715_v56  ;;  %v1296_v61 = vpop.f32.mrb[33].mxu1  ;;  %v718_v63 = vpop.f32.mrb[34].mxu0  ;;  %v6234_v56 = vld [vmem:[%s7944_s3 + $0x100] sm:$0xff]  }
 0x154   : > { %v1297_v0 = vpop.f32.mrb[34].mxu1  ;;  %v720_v2 = vpop.f32.mrb[35].mxu0  ;;  %v6235_v58 = vld [vmem:[%s7944_s3 + $0xc0] sm:$0xff]   ;;  %5502 = vmatprep.subr.bf16.mxu1 %v6234_v56  ;;  %v6250_v56 = vld [vmem:[%s7944_s3 + $0x128] sm:$0xff]  }
 0x155   : > { %v6762_v3 = vadd.f32 %v1297_v0, %v718_v63  ;;  %v1299_v5 = vpop.f32.mrb[35].mxu1  ;;  %5503 = vmatpush3.bf16.msra.mxu1 %v6235_v58 }
 0x159   : > { %v723_v6 = vpop.f32.mrb[36].mxu0 }
 0x15a   : > { %v1302_v7 = vpop.f32.mrb[36].mxu1  ;;  %v725_v8 = vpop.f32.mrb[37].mxu0 }
 0x15b   : > { %v6764_v10 = vadd.f32 %v1302_v7, %v723_v6  ;;  %v1304_v11 = vpop.f32.mrb[37].mxu1  ;;  %v726_v12 = vpop.f32.mrb[38].mxu0  ;;  %v6238_v7 = vld [vmem:[%s7944_s3 + $0x108] sm:$0xff]  }
 0x15c   : > { %v1305_v13 = vpop.f32.mrb[38].mxu1  ;;  %v728_v15 = vpop.f32.mrb[39].mxu0  ;;  %v6239_v8 = vld [vmem:[%s7944_s3 + $0xc8] sm:$0xff]   ;;  %5504 = vmatprep.subr.bf16.mxu1 %v6238_v7 }
 0x15d   : > { %v6766_v16 = vadd.f32 %v1305_v13, %v726_v12  ;;  %v1307_v17 = vpop.f32.mrb[39].mxu1  ;;  %5505 = vmatpush3.bf16.msra.mxu1 %v6239_v8 }
 0x161   : > { %v731_v18 = vpop.f32.mrb[40].mxu0 }
 0x162   : > { %v1310_v20 = vpop.f32.mrb[40].mxu1  ;;  %v733_v21 = vpop.f32.mrb[41].mxu0 }
 0x163   : > { %v6768_v22 = vadd.f32 %v1310_v20, %v731_v18  ;;  %v1312_v23 = vpop.f32.mrb[41].mxu1  ;;  %v734_v25 = vpop.f32.mrb[42].mxu0 }
 0x164   : > { %v1313_v26 = vpop.f32.mrb[42].mxu1  ;;  %v736_v28 = vpop.f32.mrb[43].mxu0  ;;  %v6240_v23 = vld [vmem:[%s7944_s3 + $0x110] sm:$0xff]  }
 0x165   : > { %v6770_v29 = vadd.f32 %v1313_v26, %v734_v25  ;;  %v1315_v31 = vpop.f32.mrb[43].mxu1  ;;  %v6242_v28 = vld [vmem:[%s7944_s3 + $0xd0] sm:$0xff]   ;;  %5506 = vmatprep.subr.bf16.mxu1 %v6240_v23 }
 0x166   : > { %v6244_v31 = vld [vmem:[%s7944_s3 + $0x118] sm:$0xff]   ;;  %5507 = vmatpush3.bf16.msra.mxu1 %v6242_v28 }
 0x167   : > { %5508 = vmatprep.subr.bf16.mxu1 %v6244_v31 }
 0x169   : > { %v739_v32 = vpop.f32.mrb[44].mxu0 }
 0x16a   : > { %v1318_v34 = vpop.f32.mrb[44].mxu1  ;;  %v741_v35 = vpop.f32.mrb[45].mxu0 }
 0x16b   : > { %v6772_v37 = vadd.f32 %v1318_v34, %v739_v32  ;;  %v1320_v38 = vpop.f32.mrb[45].mxu1  ;;  %v742_v39 = vpop.f32.mrb[46].mxu0 }
 0x16c   : > { %v1321_v41 = vpop.f32.mrb[46].mxu1  ;;  %v744_v43 = vpop.f32.mrb[47].mxu0 }
 0x16d   : > { %v6774_v44 = vadd.f32 %v1321_v41, %v742_v39  ;;  %v1323_v45 = vpop.f32.mrb[47].mxu1  ;;  %v6245_v41 = vld [vmem:[%s7944_s3 + $0xd8] sm:$0xff]  }
 0x16e   : > { %5509 = vmatpush3.bf16.msra.mxu1 %v6245_v41 }
 0x171   : > { %v747_v46 = vpop.f32.mrb[48].mxu0 }
 0x172   : > { %v1326_v49 = vpop.f32.mrb[48].mxu1  ;;  %v749_v50 = vpop.f32.mrb[49].mxu0 }
 0x173   : > { %v6776_v51 = vadd.f32 %v1326_v49, %v747_v46  ;;  %v1328_v53 = vpop.f32.mrb[49].mxu1  ;;  %v750_v55 = vpop.f32.mrb[50].mxu0  ;;  %v6246_v49 = vld [vmem:[%s7944_s3 + $0x120] sm:$0xff]  }
 0x174   : > { %v1329_v59 = vpop.f32.mrb[50].mxu1  ;;  %v752_v61 = vpop.f32.mrb[51].mxu0  ;;  %5510 = vmatprep.subr.bf16.mxu1 %v6246_v49 }
 0x175   : > { %v6784_v63 = vadd.f32 %v1329_v59, %v750_v55  ;;  %v1331_v0 = vpop.f32.mrb[51].mxu1  ;;  %v6248_v55 = vld [vmem:[%s7944_s3 + $0xe0] sm:$0xff]  }
 0x176   : > { %5511 = vmatpush3.bf16.msra.mxu1 %v6248_v55 }
 0x177   : > { %5512 = vmatprep.subr.bf16.mxu1 %v6250_v56 }
 0x179   : > { %v755_v2 = vpop.f32.mrb[52].mxu0 }
 0x17a   : > { %v1334_v5 = vpop.f32.mrb[52].mxu1  ;;  %v757_v6 = vpop.f32.mrb[53].mxu0 }
 0x17b   : > { %v6792_v11 = vadd.f32 %v1334_v5, %v755_v2  ;;  %v1336_v12 = vpop.f32.mrb[53].mxu1  ;;  %v758_v13 = vpop.f32.mrb[54].mxu0  ;;  %v2103_v5 = vlaneseq  ;;  %v6251_v6 = vld [vmem:[%s7944_s3 + $0xe8] sm:$0xff]  }
 0x17c   : > { %v1337_v15 = vpop.f32.mrb[54].mxu1  ;;  %v760_v17 = vpop.f32.mrb[55].mxu0  ;;  %5513 = vmatpush3.bf16.msra.mxu1 %v6251_v6 }
 0x17d   : > { %v6794_v18 = vadd.f32 %v1337_v15, %v758_v13  ;;  %v1339_v20 = vpop.f32.mrb[55].mxu1  ;;  %v6828_v12 = vshrl.u32 %v2103_v5, 7  ;;  %v6833_v15 = vld [vmem:[%s7943_s2] ss:$0 sm:$0xff]  ;;  %v6252_v17 = vld [vmem:[%s7944_s3 + $0x130] sm:$0xff]  }
 0x17e   : > { %v6254_v20 = vld [vmem:[%s7944_s3 + $0xf0] sm:$0xff]   ;;  %5514 = vmatprep.subr.bf16.mxu1 %v6252_v17 }
 0x17f   : > { %vm2243_vm1 = vcmp.lt.s32.totalorder %v6828_v12, 7  ;;  %vm2106_vm2 = vcmp.ge.s32.totalorder %v6828_v12, 1  ;;  %vm2140_vm3 = vcmp.lt.s32.totalorder %v6828_v12, 1 }
 0x180   : > { %5515 = vmatpush3.bf16.msra.mxu1 %v6254_v20  ;;  %vm6901_vm7 = vmpackc.low %vm6283_vm5, %vm2106_vm2 }
 0x181   : > { %v763_v21 = vpop.f32.mrb[56].mxu0 }
 0x182   : > { %v1342_v25 = vpop.f32.mrb[56].mxu1  ;;  %v765_v26 = vpop.f32.mrb[57].mxu0 }
 0x183   : > { %v6805_v32 = vadd.f32 %v1342_v25, %v763_v21  ;;  %v1344_v34 = vpop.f32.mrb[57].mxu1  ;;  %v766_v35 = vpop.f32.mrb[58].mxu0  ;;  %v6256_v26 = vld [vmem:[%s7944_s3 + $0x138] sm:$0xff]  }
 0x184   : > { %v1345_v38 = vpop.f32.mrb[58].mxu1  ;;  %v768_v39 = vpop.f32.mrb[59].mxu0  ;;  %5516 = vmatprep.subr.bf16.mxu1 %v6256_v26 }
 0x185   : > { %v6810_v43 = vadd.f32 %v1345_v38, %v766_v35  ;;  %v1347_v45 = vpop.f32.mrb[59].mxu1 }
 0x186   : > { %v2105_v45 = vadd.s32 8, %v6828_v12  ;;  %v6243_v12 = vld [vmem:[%s7944_s3 + $0x188] sm:$0xff]  }
 0x188   : > { %vm2210_vm4 = vcmp.le.s32.totalorder %v2105_v45, 14 }
 0x189   : > { %v771_v46 = vpop.f32.mrb[60].mxu0  ;;  %vm6883_vm6 = vmpackc.low %vm2210_vm4, %vm6283_vm5 }
 0x18a   : > { %v1350_v50 = vpop.f32.mrb[60].mxu1  ;;  %v773_v53 = vpop.f32.mrb[61].mxu0 }
 0x18b   : > { %v6821_v58 = vadd.f32 %v1350_v50, %v771_v46  ;;  %v1352_v59 = vpop.f32.mrb[61].mxu1  ;;  %v774_v61 = vpop.f32.mrb[62].mxu0 }
 0x18c   : > { %v1353_v0 = vpop.f32.mrb[62].mxu1  ;;  %v776_v2 = vpop.f32.mrb[63].mxu0 }
 0x18d   : > { %v6826_v7 = vadd.f32 %v1353_v0, %v774_v61  ;;  %v1355_v8 = vpop.f32.mrb[63].mxu1 }
 0x191   : > { %v1809_v13 = vpop.f32.mrb[64].mxu0 }
 0x192   : > { %v1936_v21 = vadd.f32 %v1809_v13, %v6710_v33  ;;  %v1841_v23 = vpop.f32.mrb[64].mxu1  ;;  %v1811_v25 = vpop.f32.mrb[65].mxu0  ;;  %v6257_v33 = vld [vmem:[%s7944_s3 + $0xf8] sm:$0xff]  }
 0x193   : > { %v1944_v28 = vadd.f32 %v1841_v23, %v6738_v14  ;;  %v1843_v31 = vpop.f32.mrb[65].mxu1  ;;  %v1812_v34 = vpop.f32.mrb[66].mxu0  ;;  %5517 = vmatpush3.bf16.msra.mxu1 %v6257_v33 }
 0x194   : > { %v2039_v35 = vadd.f32 %v6833_v15, %v1936_v21  ;;  %v1937_v38 = vadd.f32 %v1812_v34, %v6716_v40  ;;  %v1844_v39 = vpop.f32.mrb[66].mxu1  ;;  %v1814_v41 = vpop.f32.mrb[67].mxu0 }
 0x195   : > { %v2047_v46 = vadd.f32 %v6833_v15, %v1944_v28  ;;  %v1945_v14 = vadd.f32 %v1844_v39, %v6740_v19  ;;  %v1846_v49 = vpop.f32.mrb[67].mxu1 }
 0x196   : > { %v2071_v50 = vmax.f32 %v2039_v35, 0.0  ;;  %v2040_v53 = vadd.f32 %v6833_v15, %v1937_v38 }
 0x197   : > { %v6856_v40 = vmax.f32 %v2047_v46, 0.0  ;;  %v2048_v55 = vadd.f32 %v6833_v15, %v1945_v14 }
 0x198   : > { %v2108_v56 = vrot.slane %v2071_v50, 7  ;;  %v2072_v59 = vmax.f32 %v2040_v53, 0.0  ;;  %v2211_v19 = vrot.slane %v2071_v50, 1  ;;  %v6227_v53 = vld [vmem:[%s7944_s3 + $0x148] sm:$0xff]  }
 0x199   : > { %v2112_v61 = vrot.slane %v6856_v40, 7  ;;  %v2215_v0 = vrot.slane %v6856_v40, 1  ;;  %v6863_v2 = vmax.f32 %v2048_v55, 0.0  ;;  %v1817_v5 = vpop.f32.mrb[68].mxu0 }
 0x19a   : > { %v2124_v6 = vrot.slane %v2072_v59, 7  ;;  %v2227_v8 = vrot.slane %v2072_v59, 1  ;;  %v1938_v13 = vadd.f32 %v1817_v5, %v6725_v47  ;;  %v1849_v17 = vpop.f32.mrb[68].mxu1  ;;  %v1819_v20 = vpop.f32.mrb[69].mxu0  ;;  %v6866_v21 = vpack.c.bf16 %v2072_v59, %v2071_v50 }
 0x19b   : > { %v2128_v23 = vrot.slane %v6863_v2, 7  ;;  %v2231_v25 = vrot.slane %v6863_v2, 1  ;;  %v1946_v26 = vadd.f32 %v1849_v17, %v6742_v24  ;;  %v1851_v28 = vpop.f32.mrb[69].mxu1  ;;  %v1820_v31 = vpop.f32.mrb[70].mxu0  ;;  %v6873_v34 = vpack.c.bf16 %v6863_v2, %v6856_v40 }
 0x19c   : > { %v2244_v35 = vsel %vm2243_vm1, %v2211_v19, %v2227_v8  ;;  %v2260_v47 = vsel %vm2243_vm1, %v2227_v8, %v2211_v19  ;;  %v2041_v38 = vadd.f32 %v6833_v15, %v1938_v13  ;;  %v1939_v39 = vadd.f32 %v1820_v31, %v6727_v52  ;;  %v1852_v41 = vpop.f32.mrb[70].mxu1  ;;  %2760 = vmatprep.mubr.bf16.mxu1 %v6866_v21  ;;  %v1822_v33 = vpop.f32.mrb[71].mxu0 }
 0x19d   : > { %v6887_v46 = vpack.c.bf16 %v2260_v47, %v2244_v35  ;;  %v2049_v14 = vadd.f32 %v6833_v15, %v1946_v26  ;;  %v1947_v49 = vadd.f32 %v1852_v41, %v6749_v30  ;;  %v1854_v50 = vpop.f32.mrb[71].mxu1  ;;  %v2141_v52 = vsel %vm2140_vm3, %v2108_v56, %v2124_v6  ;;  %v6228_v33 = vld [vmem:[%s7944_s3 + $0x150] sm:$0xff]  }
 0x19e   : > { %v2073_v45 = vmax.f32 %v2041_v38, 0.0  ;;  %v2042_v55 = vadd.f32 %v6833_v15, %v1939_v39  ;;  %v2157_v59 = vsel %vm2140_vm3, %v2124_v6, %v2108_v56  ;;  %v2248_v30 = vsel %vm2243_vm1, %v2215_v0, %v2231_v25 }
 0x19f   : > { %v6907_v2 = vmax.f32 %v2049_v14, 0.0  ;;  %v2050_v5 = vadd.f32 %v6833_v15, %v1947_v49  ;;  %v6910_v8 = vpack.c.bf16 %v2141_v52, %v2157_v59  ;;  %5791 = vmatmul.mubr.msk.bf16.vlgmr.msra.gmra.mrb[80].mxu0 %vm6883_vm6, %v6887_v46  ;;  %v2264_v56 = vsel %vm2243_vm1, %v2231_v25, %v2215_v0 }
 0x1a0   : > { %v2109_v6 = vrot.slane %v2073_v45, 7  ;;  %v2212_v13 = vrot.slane %v2073_v45, 1  ;;  %v2074_v17 = vmax.f32 %v2042_v55, 0.0  ;;  %v6917_v20 = vpack.c.bf16 %v2264_v56, %v2248_v30  ;;  %5823 = vmatpush3.bf16.msra.mxu0 %v6747_v27 }
 0x1a1   : > { %v2113_v26 = vrot.slane %v6907_v2, 7  ;;  %v2216_v28 = vrot.slane %v6907_v2, 1  ;;  %v6922_v31 = vmax.f32 %v2050_v5, 0.0  ;;  %5092 = vmatmul.mubr.msk.bf16.gmra.mrb[116].mxu1 %vm6901_vm7, %v6910_v8  ;;  %v1825_v35 = vpop.f32.mrb[72].mxu0  ;;  %v2145_v0 = vsel %vm2140_vm3, %v2112_v61, %v2128_v23  ;;  %5824 = vmatprep.subr.bf16.mxu0 %v6227_v53 }
 0x1a2   : > { %v2125_v25 = vrot.slane %v2074_v17, 7  ;;  %v2228_v47 = vrot.slane %v2074_v17, 1  ;;  %v1940_v27 = vadd.f32 %v1825_v35, %v6730_v57  ;;  %v1857_v38 = vpop.f32.mrb[72].mxu1  ;;  %v1827_v39 = vpop.f32.mrb[73].mxu0  ;;  %v6932_v41 = vpack.c.bf16 %v2074_v17, %v2073_v45 }
 0x1a3   : > { %v2129_v14 = vrot.slane %v6922_v31, 7  ;;  %v2232_v49 = vrot.slane %v6922_v31, 1  ;;  %v1948_v50 = vadd.f32 %v1857_v38, %v6752_v36  ;;  %v1859_v52 = vpop.f32.mrb[73].mxu1  ;;  %v1828_v55 = vpop.f32.mrb[74].mxu0  ;;  %v2161_v57 = vsel %vm2140_vm3, %v2128_v23, %v2112_v61 }
 0x1a4   : > { %v2043_v45 = vadd.f32 %v6833_v15, %v1940_v27  ;;  %v1941_v59 = vadd.f32 %v1828_v55, %v6732_v62  ;;  %v1860_v30 = vpop.f32.mrb[74].mxu1  ;;  %2768 = vmatprep.mubr.bf16.mxu1 %v6932_v41  ;;  %v2142_v5 = vsel %vm2140_vm3, %v2109_v6, %v2125_v25  ;;  %v2158_v36 = vsel %vm2140_vm3, %v2125_v25, %v2109_v6  ;;  %v1830_v56 = vpop.f32.mrb[75].mxu0 }
 0x1a5   : > { %v2051_v17 = vadd.f32 %v6833_v15, %v1948_v50  ;;  %v1949_v40 = vadd.f32 %v1860_v30, %v6754_v42  ;;  %v1862_v35 = vpop.f32.mrb[75].mxu1  ;;  %v6953_v61 = vpack.c.bf16 %v2142_v5, %v2158_v36  ;;  %v2245_v62 = vsel %vm2243_vm1, %v2212_v13, %v2228_v47  ;;  %5825 = vmatpush3.bf16.msra.mxu0 %v6227_v53  ;;  %v6229_v53 = vld [vmem:[%s7944_s3 + $0x158] sm:$0xff]  }
 0x1a6   : > { %v2075_v23 = vmax.f32 %v2043_v45, 0.0  ;;  %v2044_v27 = vadd.f32 %v6833_v15, %v1941_v59  ;;  %v2261_v38 = vsel %vm2243_vm1, %v2228_v47, %v2212_v13  ;;  %v2249_v6 = vsel %vm2243_vm1, %v2216_v28, %v2232_v49  ;;  %5826 = vmatprep.subr.bf16.mxu0 %v6228_v33 }
 0x1a7   : > { %v6962_v25 = vmax.f32 %v2051_v17, 0.0  ;;  %v2052_v42 = vadd.f32 %v6833_v15, %v1949_v40  ;;  %v6965_v39 = vpack.c.bf16 %v2261_v38, %v2245_v62  ;;  %v2265_v50 = vsel %vm2243_vm1, %v2232_v49, %v2216_v28 }
 0x1a8   : > { %v2110_v52 = vrot.slane %v2075_v23, 7  ;;  %v2213_v55 = vrot.slane %v2075_v23, 1  ;;  %v2076_v13 = vmax.f32 %v2044_v27, 0.0  ;;  %v6972_v47 = vpack.c.bf16 %v2265_v50, %v2249_v6 }
 0x1a9   : > { %v2114_v45 = vrot.slane %v6962_v25, 7  ;;  %v2217_v59 = vrot.slane %v6962_v25, 1  ;;  %v6976_v30 = vmax.f32 %v2052_v42, 0.0  ;;  %5095 = vmatmul.mubr.msk.bf16.gmra.mrb[120].mxu1 %vm6901_vm7, %v6953_v61  ;;  %5794 = vmatprep.mubr.msk.bf16.mxu0 %vm6883_vm6, %v6965_v39  ;;  %v1833_v28 = vpop.f32.mrb[76].mxu0  ;;  %v6984_v49 = vpack.c.bf16 %v2145_v0, %v2161_v57 }
 0x1aa   : > { %v2126_v5 = vrot.slane %v2076_v13, 7  ;;  %v2229_v36 = vrot.slane %v2076_v13, 1  ;;  %v1942_v56 = vadd.f32 %v1833_v28, %v6734_v4  ;;  %v1865_v17 = vpop.f32.mrb[76].mxu1  ;;  %v1835_v40 = vpop.f32.mrb[77].mxu0  ;;  %v6987_v35 = vpack.c.bf16 %v2076_v13, %v2075_v23  ;;  %5827 = vmatpush3.bf16.msra.mxu0 %v6228_v33  ;;  %v6230_v4 = vld [vmem:[%s7944_s3 + $0x160] sm:$0xff]  }
 0x1ab   : > { %v2130_v62 = vrot.slane %v6976_v30, 7  ;;  %v2233_v27 = vrot.slane %v6976_v30, 1  ;;  %v1950_v38 = vadd.f32 %v1865_v17, %v6756_v48  ;;  %v1867_v6 = vpop.f32.mrb[77].mxu1  ;;  %v1836_v42 = vpop.f32.mrb[78].mxu0  ;;  %v6994_v0 = vpack.c.bf16 %v6922_v31, %v6907_v2  ;;  %5828 = vmatprep.subr.bf16.mxu0 %v6229_v53 }
 0x1ac   : > { %v2045_v57 = vadd.f32 %v6833_v15, %v1942_v56  ;;  %v1943_v33 = vadd.f32 %v1836_v42, %v6736_v9  ;;  %v1868_v23 = vpop.f32.mrb[78].mxu1  ;;  %2776 = vmatprep.mubr.bf16.mxu1 %v6987_v35  ;;  %v2143_v48 = vsel %vm2140_vm3, %v2110_v52, %v2126_v5  ;;  %v2159_v50 = vsel %vm2140_vm3, %v2126_v5, %v2110_v52  ;;  %v1838_v13 = vpop.f32.mrb[79].mxu0 }
 0x1ad   : > { %v2053_v28 = vadd.f32 %v6833_v15, %v1950_v38  ;;  %v1951_v17 = vadd.f32 %v1868_v23, %v6758_v54  ;;  %v1870_v40 = vpop.f32.mrb[79].mxu1  ;;  %v7008_v6 = vpack.c.bf16 %v2143_v48, %v2159_v50  ;;  %v2246_v9 = vsel %vm2243_vm1, %v2213_v55, %v2229_v36 }
 0x1ae   : > { %v2077_v56 = vmax.f32 %v2045_v57, 0.0  ;;  %v2046_v42 = vadd.f32 %v6833_v15, %v1943_v33  ;;  %v2262_v1 = vsel %vm2243_vm1, %v2229_v36, %v2213_v55  ;;  %v2250_v52 = vsel %vm2243_vm1, %v2217_v59, %v2233_v27  ;;  %5829 = vmatpush3.bf16.msra.mxu0 %v6229_v53  ;;  %v6231_v57 = vld [vmem:[%s7944_s3 + $0x168] sm:$0xff]  }
 0x1af   : > { %v2085_v5 = vmax.f32 %v2053_v28, 0.0  ;;  %v2054_v38 = vadd.f32 %v6833_v15, %v1951_v17  ;;  %v7018_v54 = vpack.c.bf16 %v2262_v1, %v2246_v9  ;;  %v2266_v23 = vsel %vm2243_vm1, %v2233_v27, %v2217_v59  ;;  %5830 = vmatprep.subr.bf16.mxu0 %v6230_v4 }
 0x1b0   : > { %v2111_v33 = vrot.slane %v2077_v56, 7  ;;  %v2214_v48 = vrot.slane %v2077_v56, 1  ;;  %v2078_v55 = vmax.f32 %v2046_v42, 0.0  ;;  %v7025_v36 = vpack.c.bf16 %v2266_v23, %v2250_v52 }
 0x1b1   : > { %v2115_v50 = vrot.slane %v2085_v5, 7  ;;  %v2218_v53 = vrot.slane %v2085_v5, 1  ;;  %v2086_v13 = vmax.f32 %v2054_v38, 0.0  ;;  %5098 = vmatmul.mubr.msk.bf16.gmra.mrb[124].mxu1 %vm6901_vm7, %v7008_v6  ;;  %5795 = vmatmul.mubr.msk.bf16.gmra.mrb[84].mxu0 %vm6883_vm6, %v7018_v54  ;;  %v2146_v1 = vsel %vm2140_vm3, %v2113_v26, %v2129_v14 }
 0x1b2   : > { %v2127_v59 = vrot.slane %v2078_v55, 7  ;;  %v2230_v27 = vrot.slane %v2078_v55, 1  ;;  %v1873_v28 = vpop.f32.mrb[80].mxu1  ;;  %v7039_v17 = vpack.c.bf16 %v2078_v55, %v2077_v56  ;;  %v2162_v40 = vsel %vm2140_vm3, %v2129_v14, %v2113_v26  ;;  %5831 = vmatpush3.bf16.msra.mxu0 %v6230_v4  ;;  %v6232_v56 = vld [vmem:[%s7944_s3 + $0x170] sm:$0xff]  }
 0x1b3   : > { %v2131_v9 = vrot.slane %v2086_v13, 7  ;;  %v2234_v42 = vrot.slane %v2086_v13, 1  ;;  %v1952_v52 = vadd.f32 %v1873_v28, %v6760_v60  ;;  %v1875_v38 = vpop.f32.mrb[81].mxu1  ;;  %v7048_v23 = vpack.c.bf16 %v2146_v1, %v2162_v40  ;;  %5832 = vmatprep.subr.bf16.mxu0 %v6231_v57 }
 0x1b4   : > { %v1876_v55 = vpop.f32.mrb[82].mxu1  ;;  %2784 = vmatprep.mubr.bf16.mxu1 %v7039_v17  ;;  %v2144_v2 = vsel %vm2140_vm3, %v2111_v33, %v2127_v59  ;;  %v2160_v26 = vsel %vm2140_vm3, %v2127_v59, %v2111_v33  ;;  %v2247_v60 = vsel %vm2243_vm1, %v2214_v48, %v2230_v27  ;;  %v2263_v31 = vsel %vm2243_vm1, %v2230_v27, %v2214_v48 }
 0x1b5   : > { %v2055_v14 = vadd.f32 %v6833_v15, %v1952_v52  ;;  %v1953_v4 = vadd.f32 %v1876_v55, %v6762_v3  ;;  %v1878_v1 = vpop.f32.mrb[83].mxu1  ;;  %v7064_v28 = vpack.c.bf16 %v2144_v2, %v2160_v26  ;;  %v7066_v40 = vpack.c.bf16 %v2263_v31, %v2247_v60 }
 0x1b6   : > { %v2251_v38 = vsel %vm2243_vm1, %v2218_v53, %v2234_v42  ;;  %v2267_v33 = vsel %vm2243_vm1, %v2234_v42, %v2218_v53  ;;  %v7074_v59 = vpack.c.bf16 %v6976_v30, %v6962_v25  ;;  %v2147_v3 = vsel %vm2140_vm3, %v2114_v45, %v2130_v62  ;;  %5833 = vmatpush3.bf16.msra.mxu0 %v6231_v57  ;;  %v6233_v25 = vld [vmem:[%s7944_s3 + $0x178] sm:$0xff]  }
 0x1b7   : > { %v2087_v48 = vmax.f32 %v2055_v14, 0.0  ;;  %v2056_v27 = vadd.f32 %v6833_v15, %v1953_v4  ;;  %5798 = vmatprep.mubr.msk.bf16.mxu0 %vm6883_vm6, %v7066_v40  ;;  %v7086_v53 = vpack.c.bf16 %v2267_v33, %v2251_v38  ;;  %v2163_v42 = vsel %vm2140_vm3, %v2130_v62, %v2114_v45  ;;  %5834 = vmatprep.subr.bf16.mxu0 %v6232_v56  ;;  %v6236_v4 = vld [vmem:[%s7944_s3 + $0x1c0] sm:$0xff]  }
 0x1b8   : > { %v7094_v52 = vpack.c.bf16 %v2147_v3, %v2163_v42  ;;  %v7096_v57 = vpack.c.bf16 %v2086_v13, %v2085_v5  ;;  %v2148_v55 = vsel %vm2140_vm3, %v2115_v50, %v2131_v9  ;;  %v2164_v2 = vsel %vm2140_vm3, %v2131_v9, %v2115_v50 }
 0x1b9   : > { %v2088_v26 = vmax.f32 %v2056_v27, 0.0  ;;  %5101 = vmatmul.mubr.msk.bf16.gmra.mrb[128].mxu1 %vm6901_vm7, %v7064_v28  ;;  %5799 = vmatmul.mubr.msk.bf16.gmra.mrb[88].mxu0 %vm6883_vm6, %v6917_v20  ;;  %v7111_v45 = vpack.c.bf16 %v2148_v55, %v2164_v2  ;;  %v2219_v30 = vrot.slane %v2087_v48, 1  ;;  %v2116_v31 = vrot.slane %v2087_v48, 7 }
 0x1ba   : > { %2792 = vmatprep.mubr.bf16.mxu1 %v6873_v34  ;;  %v1881_v62 = vpop.f32.mrb[84].mxu1  ;;  %5802 = vmatprep.mubr.msk.bf16.mxu0 %vm6883_vm6, %v6972_v47 }
 0x1bb   : > { %v2132_v5 = vrot.slane %v2088_v26, 7  ;;  %v2235_v50 = vrot.slane %v2088_v26, 1  ;;  %v1954_v13 = vadd.f32 %v1881_v62, %v6764_v10  ;;  %v1883_v9 = vpop.f32.mrb[85].mxu1  ;;  %v7118_v60 = vpack.c.bf16 %v2088_v26, %v2087_v48  ;;  %5835 = vmatpush3.bf16.msra.mxu0 %v6232_v56 }
 0x1bc   : > { %v1884_v14 = vpop.f32.mrb[86].mxu1  ;;  %5836 = vmatprep.subr.bf16.mxu0 %v6233_v25 }
 0x1bd   : > { %v2057_v1 = vadd.f32 %v6833_v15, %v1954_v13  ;;  %v1955_v38 = vadd.f32 %v1884_v14, %v6766_v16  ;;  %v1886_v33 = vpop.f32.mrb[87].mxu1  ;;  %v2252_v3 = vsel %vm2243_vm1, %v2219_v30, %v2235_v50  ;;  %v2268_v10 = vsel %vm2243_vm1, %v2235_v50, %v2219_v30 }
 0x1be   : > { %v7129_v27 = vpack.c.bf16 %v2268_v10, %v2252_v3  ;;  %v2149_v56 = vsel %vm2140_vm3, %v2116_v31, %v2132_v5  ;;  %v2165_v48 = vsel %vm2140_vm3, %v2132_v5, %v2116_v31 }
 0x1bf   : > { %v2089_v42 = vmax.f32 %v2057_v1, 0.0  ;;  %v2058_v55 = vadd.f32 %v6833_v15, %v1955_v38  ;;  %v7136_v2 = vpack.c.bf16 %v2149_v56, %v2165_v48  ;;  %5837 = vmatpush3.bf16.msra.mxu0 %v6233_v25 }
 0x1c0   : > { %5638 = vmatprep.subr.bf16.mxu0 %v6236_v4 }
 0x1c1   : > { %v2090_v16 = vmax.f32 %v2058_v55, 0.0  ;;  %5104 = vmatmul.mubr.msk.bf16.gmra.mrb[132].mxu1 %vm6901_vm7, %v6984_v49  ;;  %5803 = vmatmul.mubr.msk.bf16.gmra.mrb[92].mxu0 %vm6883_vm6, %v7025_v36  ;;  %v2220_v26 = vrot.slane %v2089_v42, 1  ;;  %v2117_v9 = vrot.slane %v2089_v42, 7 }
 0x1c2   : > { %2800 = vmatprep.mubr.bf16.mxu1 %v6994_v0  ;;  %v1889_v30 = vpop.f32.mrb[88].mxu1  ;;  %5806 = vmatprep.mubr.msk.bf16.mxu0 %vm6883_vm6, %v7086_v53 }
 0x1c3   : > { %v2133_v62 = vrot.slane %v2090_v16, 7  ;;  %v2236_v25 = vrot.slane %v2090_v16, 1  ;;  %v1956_v5 = vadd.f32 %v1889_v30, %v6768_v22  ;;  %v1891_v50 = vpop.f32.mrb[89].mxu1  ;;  %v7149_v13 = vpack.c.bf16 %v2090_v16, %v2089_v42 }
 0x1c4   : > { %v1892_v31 = vpop.f32.mrb[90].mxu1 }
 0x1c5   : > { %v2059_v14 = vadd.f32 %v6833_v15, %v1956_v5  ;;  %v1957_v4 = vadd.f32 %v1892_v31, %v6770_v29  ;;  %v1894_v1 = vpop.f32.mrb[91].mxu1  ;;  %v2253_v38 = vsel %vm2243_vm1, %v2220_v26, %v2236_v25  ;;  %v2269_v33 = vsel %vm2243_vm1, %v2236_v25, %v2220_v26 }
 0x1c6   : > { %v7157_v3 = vpack.c.bf16 %v2269_v33, %v2253_v38  ;;  %v2150_v22 = vsel %vm2140_vm3, %v2117_v9, %v2133_v62  ;;  %v2166_v10 = vsel %vm2140_vm3, %v2133_v62, %v2117_v9 }
 0x1c7   : > { %v2091_v56 = vmax.f32 %v2059_v14, 0.0  ;;  %v2060_v48 = vadd.f32 %v6833_v15, %v1957_v4  ;;  %v7164_v42 = vpack.c.bf16 %v2150_v22, %v2166_v10 }
 0x1c9   : > { %v2092_v29 = vmax.f32 %v2060_v48, 0.0  ;;  %5107 = vmatmul.mubr.msk.bf16.gmra.mrb[136].mxu1 %vm6901_vm7, %v7048_v23  ;;  %5807 = vmatmul.mubr.msk.bf16.gmra.mrb[96].mxu0 %vm6883_vm6, %v7129_v27  ;;  %v2221_v55 = vrot.slane %v2091_v56, 1  ;;  %v2118_v50 = vrot.slane %v2091_v56, 7 }
 0x1ca   : > { %2808 = vmatprep.mubr.bf16.mxu1 %v7074_v59  ;;  %v1897_v16 = vpop.f32.mrb[92].mxu1  ;;  %5810 = vmatprep.mubr.msk.bf16.mxu0 %vm6883_vm6, %v7157_v3 }
 0x1cb   : > { %v2134_v26 = vrot.slane %v2092_v29, 7  ;;  %v2237_v30 = vrot.slane %v2092_v29, 1  ;;  %v1958_v62 = vadd.f32 %v1897_v16, %v6772_v37  ;;  %v1899_v25 = vpop.f32.mrb[93].mxu1  ;;  %v7177_v5 = vpack.c.bf16 %v2092_v29, %v2091_v56 }
 0x1cc   : > { %v1900_v9 = vpop.f32.mrb[94].mxu1 }
 0x1cd   : > { %7955 = vst [vmem:[#allocation4_spill] sm:$0xff] %v7177_v5  ;;  %v2061_v31 = vadd.f32 %v6833_v15, %v1958_v62  ;;  %v1959_v14 = vadd.f32 %v1900_v9, %v6774_v44  ;;  %v1902_v4 = vpop.f32.mrb[95].mxu1  ;;  %v2254_v1 = vsel %vm2243_vm1, %v2221_v55, %v2237_v30  ;;  %v2270_v38 = vsel %vm2243_vm1, %v2237_v30, %v2221_v55 }
 0x1ce   : > { %v7185_v33 = vpack.c.bf16 %v2270_v38, %v2254_v1  ;;  %v2151_v37 = vsel %vm2140_vm3, %v2118_v50, %v2134_v26  ;;  %v2167_v22 = vsel %vm2140_vm3, %v2134_v26, %v2118_v50 }
 0x1cf   : > { %v2093_v10 = vmax.f32 %v2061_v31, 0.0  ;;  %v2062_v56 = vadd.f32 %v6833_v15, %v1959_v14  ;;  %v7192_v48 = vpack.c.bf16 %v2151_v37, %v2167_v22 }
 0x1d1   : > { %v2094_v44 = vmax.f32 %v2062_v56, 0.0  ;;  %5110 = vmatmul.mubr.msk.bf16.gmra.mrb[140].mxu1 %vm6901_vm7, %v7094_v52  ;;  %5811 = vmatmul.mubr.msk.bf16.gmra.mrb[100].mxu0 %vm6883_vm6, %v7185_v33  ;;  %v2222_v29 = vrot.slane %v2093_v10, 1  ;;  %v2119_v50 = vrot.slane %v2093_v10, 7 }
 0x1d2   : > { %2816 = vmatprep.mubr.bf16.mxu1 %v7096_v57  ;;  %v1905_v55 = vpop.f32.mrb[96].mxu1 }
 0x1d3   : > { %v2135_v16 = vrot.slane %v2094_v44, 7  ;;  %v2238_v26 = vrot.slane %v2094_v44, 1  ;;  %v1960_v30 = vadd.f32 %v1905_v55, %v6776_v51  ;;  %v1907_v62 = vpop.f32.mrb[97].mxu1  ;;  %v7202_v25 = vpack.c.bf16 %v2094_v44, %v2093_v10 }
 0x1d4   : > { %v1908_v9 = vpop.f32.mrb[98].mxu1 }
 0x1d5   : > { %v2063_v31 = vadd.f32 %v6833_v15, %v1960_v30  ;;  %v1961_v14 = vadd.f32 %v1908_v9, %v6784_v63  ;;  %v1910_v4 = vpop.f32.mrb[99].mxu1  ;;  %v2255_v1 = vsel %vm2243_vm1, %v2222_v29, %v2238_v26  ;;  %v2271_v38 = vsel %vm2243_vm1, %v2238_v26, %v2222_v29 }
 0x1d6   : > { %v7210_v37 = vpack.c.bf16 %v2271_v38, %v2255_v1  ;;  %v2152_v51 = vsel %vm2140_vm3, %v2119_v50, %v2135_v16  ;;  %v2168_v22 = vsel %vm2140_vm3, %v2135_v16, %v2119_v50 }
 0x1d7   : > { %v2095_v10 = vmax.f32 %v2063_v31, 0.0  ;;  %v2064_v56 = vadd.f32 %v6833_v15, %v1961_v14  ;;  %v7217_v44 = vpack.c.bf16 %v2152_v51, %v2168_v22 }
 0x1d8   : > { %5814 = vmatprep.mubr.msk.bf16.mxu0 %vm6883_vm6, %v7210_v37 }
 0x1d9   : > { %v2096_v63 = vmax.f32 %v2064_v56, 0.0  ;;  %5113 = vmatmul.mubr.msk.bf16.gmra.mrb[144].mxu1 %vm6901_vm7, %v7111_v45  ;;  %v2223_v29 = vrot.slane %v2095_v10, 1  ;;  %v2120_v9 = vrot.slane %v2095_v10, 7 }
 0x1da   : > { %2824 = vmatprep.mubr.bf16.mxu1 %v7118_v60  ;;  %v1913_v55 = vpop.f32.mrb[100].mxu1 }
 0x1db   : > { %v2136_v26 = vrot.slane %v2096_v63, 7  ;;  %v2239_v16 = vrot.slane %v2096_v63, 1  ;;  %v1962_v30 = vadd.f32 %v1913_v55, %v6792_v11  ;;  %v1915_v62 = vpop.f32.mrb[101].mxu1  ;;  %v7227_v50 = vpack.c.bf16 %v2096_v63, %v2095_v10 }
 0x1dc   : > { %v1916_v31 = vpop.f32.mrb[102].mxu1 }
 0x1dd   : > { %v2065_v14 = vadd.f32 %v6833_v15, %v1962_v30  ;;  %v1963_v4 = vadd.f32 %v1916_v31, %v6794_v18  ;;  %v1918_v1 = vpop.f32.mrb[103].mxu1  ;;  %v2256_v38 = vsel %vm2243_vm1, %v2223_v29, %v2239_v16  ;;  %v2272_v51 = vsel %vm2243_vm1, %v2239_v16, %v2223_v29 }
 0x1de   : > { %v7235_v22 = vpack.c.bf16 %v2272_v51, %v2256_v38  ;;  %v2153_v11 = vsel %vm2140_vm3, %v2120_v9, %v2136_v26  ;;  %v2169_v10 = vsel %vm2140_vm3, %v2136_v26, %v2120_v9 }
 0x1df   : > { %v2097_v56 = vmax.f32 %v2065_v14, 0.0  ;;  %v2066_v63 = vadd.f32 %v6833_v15, %v1963_v4  ;;  %v7242_v55 = vpack.c.bf16 %v2153_v11, %v2169_v10 }
 0x1e0   : > { %5815 = vmatmul.mubr.msk.bf16.gmra.mrb[104].mxu0 %vm6883_vm6, %v7235_v22 }
 0x1e1   : > { %v2098_v18 = vmax.f32 %v2066_v63, 0.0  ;;  %5116 = vmatmul.mubr.msk.bf16.gmra.mrb[148].mxu1 %vm6901_vm7, %v7136_v2  ;;  %v2224_v29 = vrot.slane %v2097_v56, 1  ;;  %v2121_v14 = vrot.slane %v2097_v56, 7 }
 0x1e2   : > { %2832 = vmatprep.mubr.bf16.mxu1 %v7149_v13  ;;  %v1921_v16 = vpop.f32.mrb[104].mxu1 }
 0x1e3   : > { %v2137_v30 = vrot.slane %v2098_v18, 7  ;;  %v2240_v26 = vrot.slane %v2098_v18, 1  ;;  %v1964_v62 = vadd.f32 %v1921_v16, %v6805_v32  ;;  %v1923_v9 = vpop.f32.mrb[105].mxu1  ;;  %v7252_v31 = vpack.c.bf16 %v2098_v18, %v2097_v56 }
 0x1e4   : > { %v1924_v4 = vpop.f32.mrb[106].mxu1 }
 0x1e5   : > { %v2067_v1 = vadd.f32 %v6833_v15, %v1964_v62  ;;  %v1965_v38 = vadd.f32 %v1924_v4, %v6810_v43  ;;  %v1926_v51 = vpop.f32.mrb[107].mxu1  ;;  %v2257_v11 = vsel %vm2243_vm1, %v2224_v29, %v2240_v26  ;;  %v2273_v10 = vsel %vm2243_vm1, %v2240_v26, %v2224_v29 }
 0x1e6   : > { %v7260_v63 = vpack.c.bf16 %v2273_v10, %v2257_v11  ;;  %v2154_v32 = vsel %vm2140_vm3, %v2121_v14, %v2137_v30  ;;  %v2170_v56 = vsel %vm2140_vm3, %v2137_v30, %v2121_v14 }
 0x1e7   : > { %v2099_v18 = vmax.f32 %v2067_v1, 0.0  ;;  %v2068_v16 = vadd.f32 %v6833_v15, %v1965_v38  ;;  %v7267_v62 = vpack.c.bf16 %v2154_v32, %v2170_v56 }
 0x1e8   : > { %5818 = vmatprep.mubr.msk.bf16.mxu0 %vm6883_vm6, %v7260_v63 }
 0x1e9   : > { %v2100_v43 = vmax.f32 %v2068_v16, 0.0  ;;  %5119 = vmatmul.mubr.msk.bf16.gmra.mrb[152].mxu1 %vm6901_vm7, %v7164_v42  ;;  %v2225_v29 = vrot.slane %v2099_v18, 1  ;;  %v2122_v38 = vrot.slane %v2099_v18, 7 }
 0x1ea   : > { %2840 = vmatprep.mubr.bf16.mxu1 %v7177_v5  ;;  %v1929_v26 = vpop.f32.mrb[108].mxu1 }
 0x1eb   : > { %v2138_v9 = vrot.slane %v2100_v43, 7  ;;  %v2241_v30 = vrot.slane %v2100_v43, 1  ;;  %v1966_v14 = vadd.f32 %v1929_v26, %v6821_v58  ;;  %v1931_v4 = vpop.f32.mrb[109].mxu1  ;;  %v7277_v1 = vpack.c.bf16 %v2100_v43, %v2099_v18 }
 0x1ec   : > { %v1932_v51 = vpop.f32.mrb[110].mxu1 }
 0x1ed   : > { %v2069_v11 = vadd.f32 %v6833_v15, %v1966_v14  ;;  %v1967_v10 = vadd.f32 %v1932_v51, %v6826_v7  ;;  %v2258_v32 = vsel %vm2243_vm1, %v2225_v29, %v2241_v30  ;;  %v2274_v56 = vsel %vm2243_vm1, %v2241_v30, %v2225_v29  ;;  %v1934_v16 = vpop.f32.mrb[111].mxu1 }
 0x1ee   : > { %v7285_v5 = vpack.c.bf16 %v2274_v56, %v2258_v32  ;;  %v2155_v58 = vsel %vm2140_vm3, %v2122_v38, %v2138_v9  ;;  %v2171_v18 = vsel %vm2140_vm3, %v2138_v9, %v2122_v38 }
 0x1ef   : > { %v2101_v43 = vmax.f32 %v2069_v11, 0.0  ;;  %v2070_v26 = vadd.f32 %v6833_v15, %v1967_v10  ;;  %v7292_v14 = vpack.c.bf16 %v2155_v58, %v2171_v18  ;;  %v6237_v18 = vld [vmem:[%s7944_s3 + $0x180] sm:$0xff]  }
 0x1f0   : > { %5819 = vmatmul.mubr.msk.bf16.gmra.mrb[108].mxu0 %vm6883_vm6, %v7285_v5 }
 0x1f1   : > { %v2102_v7 = vmax.f32 %v2070_v26, 0.0  ;;  %5122 = vmatmul.mubr.msk.bf16.gmra.mrb[156].mxu1 %vm6901_vm7, %v7192_v48  ;;  %5838 = vmatprep.mubr.msk.bf16.mxu0 %vm6883_vm6, %v6887_v46  ;;  %v2123_v29 = vrot.slane %v2101_v43, 7  ;;  %v2226_v15 = vrot.slane %v2101_v43, 1 }
 0x1f2   : > { %2848 = vmatprep.mubr.bf16.mxu1 %v7202_v25  ;;  %v5382_v9 = vpop.f32.mrb[112].mxu1 }
 0x1f3   : > { %v2139_v30 = vrot.slane %v2102_v7, 7  ;;  %v2242_v4 = vrot.slane %v2102_v7, 1  ;;  %v5383_v38 = vpop.f32.mrb[113].mxu1  ;;  %v7304_v51 = vpack.c.bf16 %v2102_v7, %v2101_v43 }
 0x1f4   : > { %v7306_v11 = vadd.f32 %v5383_v38, %v5382_v9  ;;  %v5385_v10 = vpop.f32.mrb[114].mxu1  ;;  %v6241_v9 = vld [vmem:[%s7944_s3 + $0x1c8] sm:$0xff]   ;;  %v6258_v38 = vld [vmem:[%s7944_s3 + $0x1e0] sm:$0xff]  }
 0x1f5   : > { %v2259_v32 = vsel %vm2243_vm1, %v2226_v15, %v2242_v4  ;;  %v2275_v56 = vsel %vm2243_vm1, %v2242_v4, %v2226_v15  ;;  %v5386_v46 = vpop.f32.mrb[115].mxu1  ;;  %v2156_v16 = vsel %vm2140_vm3, %v2123_v29, %v2139_v30  ;;  %v2172_v58 = vsel %vm2140_vm3, %v2139_v30, %v2123_v29  ;;  %v6247_v29 = vld [vmem:[%s7944_s3 + $0x1d0] sm:$0xff]   ;;  %v6253_v30 = vld [vmem:[%s7944_s3 + $0x1d8] sm:$0xff]  }
 0x1f6   : > { %v7319_v43 = vpack.c.bf16 %v2275_v56, %v2259_v32  ;;  %v7321_v26 = vadd.f32 %v5386_v46, %v5385_v10  ;;  %v7323_v7 = vpack.c.bf16 %v2156_v16, %v2172_v58  ;;  %v6249_v15 = vld [vmem:[%s7944_s3 + $0x190] sm:$0xff]   ;;  %v6255_v4 = vld [vmem:[%s7944_s3 + $0x198] sm:$0xff]   ;;  %v6259_v10 = vld [vmem:[%s7944_s3 + $0x1a0] sm:$0xff]  }
 0x1f7   : > { %v6260_v32 = vld [vmem:[%s7944_s3 + $0x1e8] sm:$0xff]   ;;  %v6262_v46 = vld [vmem:[%s7944_s3 + $0x1f0] sm:$0xff]   ;;  %v6264_v58 = vld [vmem:[%s7944_s3 + $0x1f8] sm:$0xff]  }
 0x1f8   : > { %5839 = vmatmul.mubr.msk.bf16.vlgmr.msra.gmra.mrb[80].mxu0 %vm6883_vm6, %v6965_v39  ;;  %v6261_v56 = vld [vmem:[%s7944_s3 + $0x1a8] sm:$0xff]   ;;  %v6263_v16 = vld [vmem:[%s7944_s3 + $0x1b0] sm:$0xff]  }
 0x1f9   : > { %5125 = vmatmul.mubr.msk.bf16.gmra.mrb[160].mxu1 %vm6901_vm7, %v7217_v44  ;;  %5842 = vmatprep.mubr.msk.bf16.mxu0 %vm6883_vm6, %v7018_v54 }
 0x1fa   : > { %2856 = vmatprep.mubr.bf16.mxu1 %v7227_v50  ;;  %5639 = vmatpush3.bf16.msra.mxu0 %v6237_v18  ;;  %v6265_v18 = vld [vmem:[%s7944_s3 + $0x1b8] sm:$0xff]  }
 0x1fb   : > { %5640 = vmatprep.subr.bf16.mxu0 %v6241_v9  ;;  %v6266_v9 = vld [vmem:[%s7944_s3 + $0x200] sm:$0xff]  }
 0x1fe   : > { %5641 = vmatpush3.bf16.msra.mxu0 %v6243_v12 }
 0x1ff   : > { %5642 = vmatprep.subr.bf16.mxu0 %v6247_v29 }
 0x200   : > { %5843 = vmatmul.mubr.msk.bf16.gmra.mrb[84].mxu0 %vm6883_vm6, %v7066_v40 }
 0x201   : > { %5128 = vmatmul.mubr.msk.bf16.gmra.mrb[164].mxu1 %vm6901_vm7, %v7242_v55  ;;  %5846 = vmatprep.mubr.msk.bf16.mxu0 %vm6883_vm6, %v6917_v20 }
 0x202   : > { %2864 = vmatprep.mubr.bf16.mxu1 %v7252_v31  ;;  %5643 = vmatpush3.bf16.msra.mxu0 %v6249_v15 }
 0x203   : > { %5644 = vmatprep.subr.bf16.mxu0 %v6253_v30 }
 0x206   : > { %5645 = vmatpush3.bf16.msra.mxu0 %v6255_v4 }
 0x207   : > { %5646 = vmatprep.subr.bf16.mxu0 %v6258_v38 }
 0x208   : > { %5847 = vmatmul.mubr.msk.bf16.gmra.mrb[88].mxu0 %vm6883_vm6, %v6972_v47 }
 0x209   : > { %5131 = vmatmul.mubr.msk.bf16.gmra.mrb[168].mxu1 %vm6901_vm7, %v7267_v62  ;;  %5850 = vmatprep.mubr.msk.bf16.mxu0 %vm6883_vm6, %v7025_v36 }
 0x20a   : > { %2872 = vmatprep.mubr.bf16.mxu1 %v7277_v1  ;;  %5647 = vmatpush3.bf16.msra.mxu0 %v6259_v10 }
 0x20b   : > { %5648 = vmatprep.subr.bf16.mxu0 %v6260_v32 }
 0x20e   : > { %5649 = vmatpush3.bf16.msra.mxu0 %v6261_v56 }
 0x20f   : > { %5650 = vmatprep.subr.bf16.mxu0 %v6262_v46 }
 0x210   : > { %5851 = vmatmul.mubr.msk.bf16.gmra.mrb[92].mxu0 %vm6883_vm6, %v7086_v53 }
 0x211   : > { %5134 = vmatmul.mubr.msk.bf16.gmra.mrb[172].mxu1 %vm6901_vm7, %v7292_v14  ;;  %5854 = vmatprep.mubr.msk.bf16.mxu0 %vm6883_vm6, %v7129_v27 }
 0x212   : > { %3411 = vmatprep.mubr.bf16.mxu1 %v6866_v21  ;;  %5651 = vmatpush3.bf16.msra.mxu0 %v6263_v16  ;;  %v6267_v21 = vld [vmem:[%s7944_s3 + $0x208] sm:$0xff]  }
 0x213   : > { %5652 = vmatprep.subr.bf16.mxu0 %v6264_v58 }
 0x216   : > { %5653 = vmatpush3.bf16.msra.mxu0 %v6265_v18 }
 0x217   : > { %5870 = vmatprep.subr.bf16.mxu0 %v6266_v9 }
 0x218   : > { %5855 = vmatmul.mubr.msk.bf16.gmra.mrb[96].mxu0 %vm6883_vm6, %v7157_v3 }
 0x219   : > { %5182 = vmatmul.mubr.msk.bf16.vlgmr.msra.gmra.mrb[176].mxu1 %vm6901_vm7, %v6910_v8  ;;  %5858 = vmatprep.mubr.msk.bf16.mxu0 %vm6883_vm6, %v7185_v33  ;;  %v6268_v8 = vld [vmem:[%s7944_s3 + $0x210] sm:$0xff]  }
 0x21a   : > { %3419 = vmatprep.mubr.bf16.mxu1 %v6932_v41 }
 0x220   : > { %5859 = vmatmul.mubr.msk.bf16.gmra.mrb[100].mxu0 %vm6883_vm6, %v7210_v37 }
 0x221   : > { %5185 = vmatmul.mubr.msk.bf16.gmra.mrb[180].mxu1 %vm6901_vm7, %v6953_v61  ;;  %5862 = vmatprep.mubr.msk.bf16.mxu0 %vm6883_vm6, %v7235_v22 }
 0x222   : > { %3427 = vmatprep.mubr.bf16.mxu1 %v6987_v35 }
 0x228   : > { %5863 = vmatmul.mubr.msk.bf16.gmra.mrb[104].mxu0 %vm6883_vm6, %v7260_v63 }
 0x229   : > { %5188 = vmatmul.mubr.msk.bf16.gmra.mrb[184].mxu1 %vm6901_vm7, %v7008_v6  ;;  %5866 = vmatprep.mubr.msk.bf16.mxu0 %vm6883_vm6, %v7285_v5 }
 0x22a   : > { %3435 = vmatprep.mubr.bf16.mxu1 %v7039_v17 }
 0x230   : > { %5867 = vmatmul.mubr.msk.bf16.gmra.mrb[108].mxu0 %vm6883_vm6, %v7319_v43 }
 0x231   : > { %5191 = vmatmul.mubr.msk.bf16.gmra.mrb[188].mxu1 %vm6901_vm7, %v7064_v28  ;;  %4071 = vmatprep.mubr.bf16.mxu0 %v6932_v41  ;;  %v6269_v41 = vld [vmem:[%s7944_s3 + $0x218] sm:$0xff]  }
 0x232   : > { %3443 = vmatprep.mubr.bf16.mxu1 %v6873_v34 }
 0x238   : > { %5278 = vmatmul.mubr.msk.bf16.vlgmr.msra.gmra.mrb[112].mxu0 %vm6901_vm7, %v6953_v61  ;;  %v6270_v61 = vld [vmem:[%s7944_s3 + $0x220] sm:$0xff]  }
 0x239   : > { %5194 = vmatmul.mubr.msk.bf16.gmra.mrb[192].mxu1 %vm6901_vm7, %v6984_v49  ;;  %4079 = vmatprep.mubr.bf16.mxu0 %v6987_v35  ;;  %v6271_v35 = vld [vmem:[%s7944_s3 + $0x228] sm:$0xff]  }
 0x23a   : > { %3451 = vmatprep.mubr.bf16.mxu1 %v6994_v0  ;;  %5871 = vmatpush3.bf16.msra.mxu0 %v6266_v9 }
 0x23b   : > { %5872 = vmatprep.subr.bf16.mxu0 %v6267_v21 }
 0x23e   : > { %5873 = vmatpush3.bf16.msra.mxu0 %v6267_v21 }
 0x23f   : > { %5874 = vmatprep.subr.bf16.mxu0 %v6268_v8 }
 0x240   : > { %5281 = vmatmul.mubr.msk.bf16.gmra.mrb[116].mxu0 %vm6901_vm7, %v7008_v6  ;;  %v6272_v6 = vld [vmem:[%s7944_s3 + $0x230] sm:$0xff]  }
 0x241   : > { %5197 = vmatmul.mubr.msk.bf16.gmra.mrb[196].mxu1 %vm6901_vm7, %v7048_v23  ;;  %4087 = vmatprep.mubr.bf16.mxu0 %v7039_v17  ;;  %v6273_v17 = vld [vmem:[%s7944_s3 + $0x238] sm:$0xff]  }
 0x242   : > { %3459 = vmatprep.mubr.bf16.mxu1 %v7074_v59  ;;  %5875 = vmatpush3.bf16.msra.mxu0 %v6268_v8 }
 0x243   : > { %5876 = vmatprep.subr.bf16.mxu0 %v6269_v41 }
 0x246   : > { %5877 = vmatpush3.bf16.msra.mxu0 %v6269_v41 }
 0x247   : > { %5878 = vmatprep.subr.bf16.mxu0 %v6270_v61 }
 0x248   : > { %5284 = vmatmul.mubr.msk.bf16.gmra.mrb[120].mxu0 %vm6901_vm7, %v7064_v28 }
 0x249   : > { %5200 = vmatmul.mubr.msk.bf16.gmra.mrb[200].mxu1 %vm6901_vm7, %v7094_v52  ;;  %4095 = vmatprep.mubr.bf16.mxu0 %v6873_v34  ;;  %v7956_v34 = vld [vmem:[#allocation4_spill] sm:$0xff] }
 0x24a   : > { %3467 = vmatprep.mubr.bf16.mxu1 %v7096_v57  ;;  %5879 = vmatpush3.bf16.msra.mxu0 %v6270_v61 }
 0x24b   : > { %5880 = vmatprep.subr.bf16.mxu0 %v6271_v35 }
 0x24e   : > { %5881 = vmatpush3.bf16.msra.mxu0 %v6271_v35 }
 0x24f   : > { %5882 = vmatprep.subr.bf16.mxu0 %v6272_v6 }
 0x250   : > { %5287 = vmatmul.mubr.msk.bf16.gmra.mrb[124].mxu0 %vm6901_vm7, %v6984_v49 }
 0x251   : > { %5203 = vmatmul.mubr.msk.bf16.gmra.mrb[204].mxu1 %vm6901_vm7, %v7111_v45  ;;  %4103 = vmatprep.mubr.bf16.mxu0 %v6994_v0 }
 0x252   : > { %3475 = vmatprep.mubr.bf16.mxu1 %v7118_v60  ;;  %5883 = vmatpush3.bf16.msra.mxu0 %v6272_v6 }
 0x253   : > { %5884 = vmatprep.subr.bf16.mxu0 %v6273_v17 }
 0x256   : > { %5885 = vmatpush3.bf16.msra.mxu0 %v6273_v17 }
 0x258   : > { %5290 = vmatmul.mubr.msk.bf16.gmra.mrb[128].mxu0 %vm6901_vm7, %v7048_v23 }
 0x259   : > { %5206 = vmatmul.mubr.msk.bf16.gmra.mrb[208].mxu1 %vm6901_vm7, %v7136_v2  ;;  %4111 = vmatprep.mubr.bf16.mxu0 %v7074_v59 }
 0x25a   : > { %3483 = vmatprep.mubr.bf16.mxu1 %v7149_v13 }
 0x260   : > { %5293 = vmatmul.mubr.msk.bf16.gmra.mrb[132].mxu0 %vm6901_vm7, %v7094_v52 }
 0x261   : > { %5209 = vmatmul.mubr.msk.bf16.gmra.mrb[212].mxu1 %vm6901_vm7, %v7164_v42  ;;  %4119 = vmatprep.mubr.bf16.mxu0 %v7096_v57 }
 0x262   : > { %3491 = vmatprep.mubr.bf16.mxu1 %v7956_v34 }
 0x268   : > { %5296 = vmatmul.mubr.msk.bf16.gmra.mrb[136].mxu0 %vm6901_vm7, %v7111_v45 }
 0x269   : > { %5212 = vmatmul.mubr.msk.bf16.gmra.mrb[216].mxu1 %vm6901_vm7, %v7192_v48  ;;  %4127 = vmatprep.mubr.bf16.mxu0 %v7118_v60 }
 0x26a   : > { %3499 = vmatprep.mubr.bf16.mxu1 %v7202_v25 }
 0x270   : > { %5299 = vmatmul.mubr.msk.bf16.gmra.mrb[140].mxu0 %vm6901_vm7, %v7136_v2 }
 0x271   : > { %5215 = vmatmul.mubr.msk.bf16.gmra.mrb[220].mxu1 %vm6901_vm7, %v7217_v44  ;;  %4135 = vmatprep.mubr.bf16.mxu0 %v7149_v13 }
 0x272   : > { %3507 = vmatprep.mubr.bf16.mxu1 %v7227_v50 }
 0x274   : > { %v5388_v49 = vpop.f32.mrb[116].mxu1 }
 0x275   : > { %v5389_v0 = vpop.f32.mrb[117].mxu1 }
 0x276   : > { %v7533_v23 = vadd.f32 %v5389_v0, %v5388_v49  ;;  %v5391_v28 = vpop.f32.mrb[118].mxu1  ;;  %v7957_v49 = vmov 0  }
 0x277   : > { %v5392_v59 = vpop.f32.mrb[119].mxu1 }
 0x278   : > { %v7535_v52 = vadd.f32 %v5392_v59, %v5391_v28  ;;  %5302 = vmatmul.mubr.msk.bf16.gmra.mrb[144].mxu0 %vm6901_vm7, %v7164_v42 }
 0x279   : > { %5218 = vmatmul.mubr.msk.bf16.gmra.mrb[224].mxu1 %vm6901_vm7, %v7242_v55  ;;  %4143 = vmatprep.mubr.bf16.mxu0 %v7956_v34 }
 0x27a   : > { %3515 = vmatprep.mubr.bf16.mxu1 %v7252_v31 }
 0x27c   : > { %v5394_v57 = vpop.f32.mrb[120].mxu1 }
 0x27d   : > { %v5395_v45 = vpop.f32.mrb[121].mxu1 }
 0x27e   : > { %v7545_v60 = vadd.f32 %v5395_v45, %v5394_v57  ;;  %v5397_v2 = vpop.f32.mrb[122].mxu1 }
 0x27f   : > { %v5398_v13 = vpop.f32.mrb[123].mxu1 }
 0x280   : > { %v7547_v12 = vadd.f32 %v5398_v13, %v5397_v2  ;;  %5305 = vmatmul.mubr.msk.bf16.gmra.mrb[148].mxu0 %vm6901_vm7, %v7192_v48 }
 0x281   : > { %5221 = vmatmul.mubr.msk.bf16.gmra.mrb[228].mxu1 %vm6901_vm7, %v7267_v62  ;;  %4151 = vmatprep.mubr.bf16.mxu0 %v7202_v25 }
 0x282   : > { %3523 = vmatprep.mubr.bf16.mxu1 %v7277_v1 }
 0x284   : > { %v5400_v42 = vpop.f32.mrb[124].mxu1 }
 0x285   : > { %v5401_v29 = vpop.f32.mrb[125].mxu1 }
 0x286   : > { %v7557_v15 = vadd.f32 %v5401_v29, %v5400_v42  ;;  %v5403_v30 = vpop.f32.mrb[126].mxu1 }
 0x287   : > { %v5404_v4 = vpop.f32.mrb[127].mxu1 }
 0x288   : > { %v7559_v38 = vadd.f32 %v5404_v4, %v5403_v30  ;;  %5308 = vmatmul.mubr.msk.bf16.gmra.mrb[152].mxu0 %vm6901_vm7, %v7217_v44 }
 0x289   : > { %5224 = vmatmul.mubr.msk.bf16.gmra.mrb[232].mxu1 %vm6901_vm7, %v7292_v14  ;;  %4159 = vmatprep.mubr.bf16.mxu0 %v7227_v50 }
 0x28a   : > { %3531 = vmatprep.mubr.bf16.mxu1 %v7304_v51 }
 0x28c   : > { %v5406_v48 = vpop.f32.mrb[128].mxu1 }
 0x28d   : > { %v5407_v25 = vpop.f32.mrb[129].mxu1 }
 0x28e   : > { %v7569_v10 = vadd.f32 %v5407_v25, %v5406_v48  ;;  %v5409_v32 = vpop.f32.mrb[130].mxu1 }
 0x28f   : > { %v5410_v56 = vpop.f32.mrb[131].mxu1 }
 0x290   : > { %v7571_v46 = vadd.f32 %v5410_v56, %v5409_v32  ;;  %5311 = vmatmul.mubr.msk.bf16.gmra.mrb[156].mxu0 %vm6901_vm7, %v7242_v55 }
 0x291   : > { %5227 = vmatmul.mubr.msk.bf16.gmra.mrb[236].mxu1 %vm6901_vm7, %v7323_v7  ;;  %4167 = vmatprep.mubr.bf16.mxu0 %v7252_v31 }
 0x294   : > { %v5412_v44 = vpop.f32.mrb[132].mxu1 }
 0x295   : > { %v5413_v50 = vpop.f32.mrb[133].mxu1 }
 0x296   : > { %v7580_v16 = vadd.f32 %v5413_v50, %v5412_v44  ;;  %v5415_v58 = vpop.f32.mrb[134].mxu1 }
 0x297   : > { %v5416_v18 = vpop.f32.mrb[135].mxu1 }
 0x298   : > { %v7582_v9 = vadd.f32 %v5416_v18, %v5415_v58  ;;  %5314 = vmatmul.mubr.msk.bf16.gmra.mrb[160].mxu0 %vm6901_vm7, %v7267_v62 }
 0x299   : > { %4175 = vmatprep.mubr.bf16.mxu0 %v7277_v1 }
 0x29c   : > { %v5418_v55 = vpop.f32.mrb[136].mxu1 }
 0x29d   : > { %v5419_v21 = vpop.f32.mrb[137].mxu1 }
 0x29e   : > { %v7588_v8 = vadd.f32 %v5419_v21, %v5418_v55  ;;  %v5421_v41 = vpop.f32.mrb[138].mxu1 }
 0x29f   : > { %v5422_v31 = vpop.f32.mrb[139].mxu1 }
 0x2a0   : > { %v7590_v61 = vadd.f32 %v5422_v31, %v5421_v41  ;;  %5317 = vmatmul.mubr.msk.bf16.gmra.mrb[164].mxu0 %vm6901_vm7, %v7292_v14 }
 0x2a1   : > { %4183 = vmatprep.mubr.bf16.mxu0 %v7304_v51 }
 0x2a4   : > { %v5424_v35 = vpop.f32.mrb[140].mxu1 }
 0x2a5   : > { %v5425_v6 = vpop.f32.mrb[141].mxu1 }
 0x2a6   : > { %v7596_v17 = vadd.f32 %v5425_v6, %v5424_v35  ;;  %v5427_v62 = vpop.f32.mrb[142].mxu1 }
 0x2a7   : > { %v5428_v1 = vpop.f32.mrb[143].mxu1 }
 0x2a8   : > { %v7598_v34 = vadd.f32 %v5428_v1, %v5427_v62  ;;  %5320 = vmatmul.mubr.msk.bf16.gmra.mrb[168].mxu0 %vm6901_vm7, %v7323_v7 }
 0x2a9   : > { %4191 = vmatprep.mubr.bf16.mxu0 %v7957_v49 }
 0x2ac   : > { %v5430_v0 = vpop.f32.mrb[144].mxu1 }
 0x2ad   : > { %v5431_v28 = vpop.f32.mrb[145].mxu1 }
 0x2ae   : > { %v7604_v59 = vadd.f32 %v5431_v28, %v5430_v0  ;;  %v5433_v14 = vpop.f32.mrb[146].mxu1 }
 0x2af   : > { %v5434_v51 = vpop.f32.mrb[147].mxu1 }
 0x2b0   : > { %v7606_v57 = vadd.f32 %v5434_v51, %v5433_v14  ;;  %4192 = vmatmul.mubr.bf16.gmra.mrb[172].mxu0 %v7957_v49 }
 0x2b1   : > { %5886 = vmatprep.mubr.msk.bf16.mxu0 %vm6883_vm6, %v6965_v39 }
 0x2b4   : > { %v5436_v45 = vpop.f32.mrb[148].mxu1 }
 0x2b5   : > { %v5437_v2 = vpop.f32.mrb[149].mxu1 }
 0x2b6   : > { %v7612_v19 = vadd.f32 %v5437_v2, %v5436_v45  ;;  %v5439_v7 = vpop.f32.mrb[150].mxu1 }
 0x2b7   : > { %v5440_v13 = vpop.f32.mrb[151].mxu1 }
 0x2b8   : > { %v7614_v42 = vadd.f32 %v5440_v13, %v5439_v7  ;;  %5887 = vmatmul.mubr.msk.bf16.vlgmr.msra.gmra.mrb[80].mxu0 %vm6883_vm6, %v7018_v54 }
 0x2b9   : > { %5890 = vmatprep.mubr.msk.bf16.mxu0 %vm6883_vm6, %v7066_v40 }
 0x2bc   : > { %v5442_v29 = vpop.f32.mrb[152].mxu1 }
 0x2bd   : > { %v5443_v30 = vpop.f32.mrb[153].mxu1 }
 0x2be   : > { %v7622_v4 = vadd.f32 %v5443_v30, %v5442_v29  ;;  %v5445_v39 = vpop.f32.mrb[154].mxu1 }
 0x2bf   : > { %v5446_v48 = vpop.f32.mrb[155].mxu1 }
 0x2c0   : > { %v7624_v25 = vadd.f32 %v5446_v48, %v5445_v39  ;;  %5891 = vmatmul.mubr.msk.bf16.gmra.mrb[84].mxu0 %vm6883_vm6, %v6917_v20 }
 0x2c1   : > { %5894 = vmatprep.mubr.msk.bf16.mxu0 %vm6883_vm6, %v6972_v47 }
 0x2c4   : > { %v5448_v54 = vpop.f32.mrb[156].mxu1 }
 0x2c5   : > { %v5449_v32 = vpop.f32.mrb[157].mxu1 }
 0x2c6   : > { %v7632_v56 = vadd.f32 %v5449_v32, %v5448_v54  ;;  %v5451_v40 = vpop.f32.mrb[158].mxu1 }
 0x2c7   : > { %v5452_v44 = vpop.f32.mrb[159].mxu1 }
 0x2c8   : > { %v7634_v50 = vadd.f32 %v5452_v44, %v5451_v40  ;;  %5895 = vmatmul.mubr.msk.bf16.gmra.mrb[88].mxu0 %vm6883_vm6, %v7025_v36 }
 0x2c9   : > { %5898 = vmatprep.mubr.msk.bf16.mxu0 %vm6883_vm6, %v7086_v53 }
 0x2cc   : > { %v5454_v20 = vpop.f32.mrb[160].mxu1 }
 0x2cd   : > { %v5455_v58 = vpop.f32.mrb[161].mxu1 }
 0x2ce   : > { %v7642_v18 = vadd.f32 %v5455_v58, %v5454_v20  ;;  %v5457_v47 = vpop.f32.mrb[162].mxu1 }
 0x2cf   : > { %v5458_v55 = vpop.f32.mrb[163].mxu1 }
 0x2d0   : > { %v7644_v21 = vadd.f32 %v5458_v55, %v5457_v47  ;;  %5899 = vmatmul.mubr.msk.bf16.gmra.mrb[92].mxu0 %vm6883_vm6, %v7129_v27 }
 0x2d1   : > { %5902 = vmatprep.mubr.msk.bf16.mxu0 %vm6883_vm6, %v7157_v3 }
 0x2d4   : > { %v5460_v36 = vpop.f32.mrb[164].mxu1 }
 0x2d5   : > { %v5461_v41 = vpop.f32.mrb[165].mxu1 }
 0x2d6   : > { %v7652_v31 = vadd.f32 %v5461_v41, %v5460_v36  ;;  %v5463_v53 = vpop.f32.mrb[166].mxu1 }
 0x2d7   : > { %v5464_v35 = vpop.f32.mrb[167].mxu1 }
 0x2d8   : > { %v7654_v6 = vadd.f32 %v5464_v35, %v5463_v53  ;;  %5903 = vmatmul.mubr.msk.bf16.gmra.mrb[96].mxu0 %vm6883_vm6, %v7185_v33 }
 0x2d9   : > { %5906 = vmatprep.mubr.msk.bf16.mxu0 %vm6883_vm6, %v7210_v37 }
 0x2dc   : > { %v5466_v27 = vpop.f32.mrb[168].mxu1 }
 0x2dd   : > { %v5467_v62 = vpop.f32.mrb[169].mxu1 }
 0x2de   : > { %v7662_v1 = vadd.f32 %v5467_v62, %v5466_v27  ;;  %v5469_v3 = vpop.f32.mrb[170].mxu1 }
 0x2df   : > { %v5470_v0 = vpop.f32.mrb[171].mxu1 }
 0x2e0   : > { %v7664_v28 = vadd.f32 %v5470_v0, %v5469_v3  ;;  %5907 = vmatmul.mubr.msk.bf16.gmra.mrb[100].mxu0 %vm6883_vm6, %v7235_v22 }
 0x2e1   : > { %5910 = vmatprep.mubr.msk.bf16.mxu0 %vm6883_vm6, %v7260_v63 }
 0x2e4   : > { %v5472_v33 = vpop.f32.mrb[172].mxu1 }
 0x2e5   : > { %v5473_v14 = vpop.f32.mrb[173].mxu1 }
 0x2e6   : > { %v7672_v51 = vadd.f32 %v5473_v14, %v5472_v33  ;;  %v5475_v37 = vpop.f32.mrb[174].mxu1 }
 0x2e7   : > { %v5476_v45 = vpop.f32.mrb[175].mxu1 }
 0x2e8   : > { %v7674_v2 = vadd.f32 %v5476_v45, %v5475_v37  ;;  %5911 = vmatmul.mubr.msk.bf16.gmra.mrb[104].mxu0 %vm6883_vm6, %v7285_v5 }
 0x2e9   : > { %5914 = vmatprep.mubr.msk.bf16.mxu0 %vm6883_vm6, %v7319_v43 }
 0x2ec   : > { %v5518_v22 = vpop.f32.mrb[176].mxu1 }
 0x2ed   : > { %v5519_v7 = vpop.f32.mrb[177].mxu1 }
 0x2ee   : > { %v5520_v13 = vadd.f32 %v5519_v7, %v5518_v22  ;;  %v5521_v63 = vpop.f32.mrb[178].mxu1 }
 0x2ef   : > { %v5522_v29 = vpop.f32.mrb[179].mxu1 }
 0x2f0   : > { %v5945_v30 = vadd.f32 %v5520_v13, %v7306_v11  ;;  %v5523_v39 = vadd.f32 %v5522_v29, %v5521_v63  ;;  %5915 = vmatmul.mubr.bf16.gmra.mrb[108].mxu0 %v7957_v49 }
 0x2f2   : > { %v5951_v48 = vadd.f32 %v5523_v39, %v7321_v26 }
 0x2f4   : > { %v5524_v54 = vpop.f32.mrb[180].mxu1 }
 0x2f5   : > { %v5525_v32 = vpop.f32.mrb[181].mxu1 }
 0x2f6   : > { %v5526_v40 = vadd.f32 %v5525_v32, %v5524_v54  ;;  %v5527_v5 = vpop.f32.mrb[182].mxu1 }
 0x2f7   : > { %v5528_v44 = vpop.f32.mrb[183].mxu1 }
 0x2f8   : > { %v5942_v24 = vadd.f32 %v5526_v40, %v7533_v23  ;;  %v5529_v43 = vadd.f32 %v5528_v44, %v5527_v5 }
 0x2fa   : > { %v5948_v20 = vadd.f32 %v5529_v43, %v7535_v52 }
 0x2fc   : > { %v5530_v58 = vpop.f32.mrb[184].mxu1 }
 0x2fd   : > { %v5531_v47 = vpop.f32.mrb[185].mxu1 }
 0x2fe   : > { %v5532_v55 = vadd.f32 %v5531_v47, %v5530_v58  ;;  %v5533_v36 = vpop.f32.mrb[186].mxu1 }
 0x2ff   : > { %v5534_v11 = vpop.f32.mrb[187].mxu1 }
 0x300   : > { %v5957_v41 = vadd.f32 %v5532_v55, %v7545_v60  ;;  %v5535_v49 = vadd.f32 %v5534_v11, %v5533_v36 }
 0x302   : > { %v5963_v26 = vadd.f32 %v5535_v49, %v7547_v12 }
 0x304   : > { %v5536_v53 = vpop.f32.mrb[188].mxu1 }
 0x305   : > { %v5537_v35 = vpop.f32.mrb[189].mxu1 }
 0x306   : > { %v5538_v27 = vadd.f32 %v5537_v35, %v5536_v53  ;;  %v5539_v62 = vpop.f32.mrb[190].mxu1 }
 0x307   : > { %v5540_v3 = vpop.f32.mrb[191].mxu1 }
 0x308   : > { %v5954_v23 = vadd.f32 %v5538_v27, %v7557_v15  ;;  %v5541_v0 = vadd.f32 %v5540_v3, %v5539_v62 }
 0x30a   : > { %v7691_v52 = vadd.f32 %v5541_v0, %v7559_v38 }
 0x30b   : > { %v5654_v33 = vpop.f32.mrb[112].mxu0 }
 0x30c   : > { %v5542_v14 = vpop.f32.mrb[192].mxu1  ;;  %v5655_v37 = vpop.f32.mrb[113].mxu0 }
 0x30d   : > { %v5543_v45 = vpop.f32.mrb[193].mxu1  ;;  %v5656_v22 = vadd.f32 %v5655_v37, %v5654_v33  ;;  %v5657_v60 = vpop.f32.mrb[114].mxu0 }
 0x30e   : > { %v5544_v7 = vadd.f32 %v5543_v45, %v5542_v14  ;;  %v5545_v13 = vpop.f32.mrb[194].mxu1  ;;  %v5658_v12 = vpop.f32.mrb[115].mxu0 }
 0x30f   : > { %v5546_v63 = vpop.f32.mrb[195].mxu1  ;;  %v5659_v29 = vadd.f32 %v5658_v12, %v5657_v60  ;;  %v7693_v39 = vadd.f32 %v5945_v30, %v5656_v22 }
 0x310   : > { %v7696_v54 = vadd.f32 %v5544_v7, %v7569_v10  ;;  %v5547_v15 = vadd.f32 %v5546_v63, %v5545_v13 }
 0x311   : > { %v7698_v32 = vadd.f32 %v5951_v48, %v5659_v29 }
 0x312   : > { %v7701_v38 = vadd.f32 %v5547_v15, %v7571_v46 }
 0x313   : > { %v5660_v40 = vpop.f32.mrb[116].mxu0 }
 0x314   : > { %v5548_v5 = vpop.f32.mrb[196].mxu1  ;;  %v5661_v44 = vpop.f32.mrb[117].mxu0 }
 0x315   : > { %v5549_v43 = vpop.f32.mrb[197].mxu1  ;;  %v5662_v58 = vadd.f32 %v5661_v44, %v5660_v40  ;;  %v5663_v47 = vpop.f32.mrb[118].mxu0 }
 0x316   : > { %v5550_v55 = vadd.f32 %v5549_v43, %v5548_v5  ;;  %v5551_v36 = vpop.f32.mrb[198].mxu1  ;;  %v5664_v11 = vpop.f32.mrb[119].mxu0 }
 0x317   : > { %v5552_v30 = vpop.f32.mrb[199].mxu1  ;;  %v5665_v49 = vadd.f32 %v5664_v11, %v5663_v47  ;;  %v7703_v53 = vadd.f32 %v5942_v24, %v5662_v58 }
 0x318   : > { %v7706_v10 = vadd.f32 %v5550_v55, %v7580_v16  ;;  %v5553_v48 = vadd.f32 %v5552_v30, %v5551_v36 }
 0x319   : > { %v7708_v35 = vadd.f32 %v5948_v20, %v5665_v49 }
 0x31a   : > { %v7711_v46 = vadd.f32 %v5553_v48, %v7582_v9 }
 0x31b   : > { %v5666_v27 = vpop.f32.mrb[120].mxu0 }
 0x31c   : > { %v5554_v62 = vpop.f32.mrb[200].mxu1  ;;  %v5667_v3 = vpop.f32.mrb[121].mxu0 }
 0x31d   : > { %v5555_v0 = vpop.f32.mrb[201].mxu1  ;;  %v5668_v33 = vadd.f32 %v5667_v3, %v5666_v27  ;;  %v5669_v14 = vpop.f32.mrb[122].mxu0 }
 0x31e   : > { %v5556_v37 = vadd.f32 %v5555_v0, %v5554_v62  ;;  %v5557_v45 = vpop.f32.mrb[202].mxu1  ;;  %v5670_v22 = vpop.f32.mrb[123].mxu0 }
 0x31f   : > { %v5558_v24 = vpop.f32.mrb[203].mxu1  ;;  %v5671_v60 = vadd.f32 %v5670_v22, %v5669_v14  ;;  %v7713_v7 = vadd.f32 %v5957_v41, %v5668_v33 }
 0x320   : > { %v7716_v16 = vadd.f32 %v5556_v37, %v7588_v8  ;;  %v5559_v20 = vadd.f32 %v5558_v24, %v5557_v45 }
 0x321   : > { %v7718_v13 = vadd.f32 %v5963_v26, %v5671_v60 }
 0x322   : > { %v7721_v9 = vadd.f32 %v5559_v20, %v7590_v61 }
 0x323   : > { %v5672_v12 = vpop.f32.mrb[124].mxu0 }
 0x324   : > { %v5560_v63 = vpop.f32.mrb[204].mxu1  ;;  %v5673_v29 = vpop.f32.mrb[125].mxu0 }
 0x325   : > { %v5561_v15 = vpop.f32.mrb[205].mxu1  ;;  %v5674_v40 = vadd.f32 %v5673_v29, %v5672_v12  ;;  %v5675_v5 = vpop.f32.mrb[126].mxu0 }
 0x326   : > { %v5562_v44 = vadd.f32 %v5561_v15, %v5560_v63  ;;  %v5563_v43 = vpop.f32.mrb[206].mxu1  ;;  %v5676_v58 = vpop.f32.mrb[127].mxu0 }
 0x327   : > { %v5564_v41 = vpop.f32.mrb[207].mxu1  ;;  %v5677_v47 = vadd.f32 %v5676_v58, %v5675_v5  ;;  %v7723_v55 = vadd.f32 %v5954_v23, %v5674_v40 }
 0x328   : > { %v7726_v8 = vadd.f32 %v5562_v44, %v7596_v17  ;;  %v5565_v26 = vadd.f32 %v5564_v41, %v5563_v43 }
 0x329   : > { %v7729_v61 = vadd.f32 %v7691_v52, %v5677_v47 }
 0x32a   : > { %v7732_v36 = vadd.f32 %v5565_v26, %v7598_v34 }
 0x32b   : > { %v5678_v11 = vpop.f32.mrb[128].mxu0 }
 0x32c   : > { %v5566_v30 = vpop.f32.mrb[208].mxu1  ;;  %v5679_v49 = vpop.f32.mrb[129].mxu0 }
 0x32d   : > { %v5567_v48 = vpop.f32.mrb[209].mxu1  ;;  %v5680_v27 = vadd.f32 %v5679_v49, %v5678_v11  ;;  %v5681_v62 = vpop.f32.mrb[130].mxu0 }
 0x32e   : > { %v5568_v3 = vadd.f32 %v5567_v48, %v5566_v30  ;;  %v5569_v0 = vpop.f32.mrb[210].mxu1  ;;  %v5682_v23 = vpop.f32.mrb[131].mxu0 }
 0x32f   : > { %v5570_v33 = vpop.f32.mrb[211].mxu1  ;;  %v5683_v14 = vadd.f32 %v5682_v23, %v5681_v62  ;;  %v7735_v17 = vadd.f32 %v7696_v54, %v5680_v27 }
 0x330   : > { %v7738_v52 = vadd.f32 %v5568_v3, %v7604_v59  ;;  %v5571_v37 = vadd.f32 %v5570_v33, %v5569_v0 }
 0x331   : > { %v7741_v34 = vadd.f32 %v7701_v38, %v5683_v14 }
 0x332   : > { %v7744_v45 = vadd.f32 %v5571_v37, %v7606_v57 }
 0x333   : > { %v5684_v22 = vpop.f32.mrb[132].mxu0 }
 0x334   : > { %v5572_v24 = vpop.f32.mrb[212].mxu1  ;;  %v5685_v60 = vpop.f32.mrb[133].mxu0 }
 0x335   : > { %v5573_v20 = vpop.f32.mrb[213].mxu1  ;;  %v5686_v12 = vadd.f32 %v5685_v60, %v5684_v22  ;;  %v5687_v63 = vpop.f32.mrb[134].mxu0 }
 0x336   : > { %v5574_v29 = vadd.f32 %v5573_v20, %v5572_v24  ;;  %v5575_v15 = vpop.f32.mrb[214].mxu1  ;;  %v5688_v54 = vpop.f32.mrb[135].mxu0 }
 0x337   : > { %v5576_v40 = vpop.f32.mrb[215].mxu1  ;;  %v5689_v5 = vadd.f32 %v5688_v54, %v5687_v63  ;;  %v7747_v59 = vadd.f32 %v7706_v10, %v5686_v12 }
 0x338   : > { %v7750_v38 = vadd.f32 %v5574_v29, %v7612_v19  ;;  %v5577_v44 = vadd.f32 %v5576_v40, %v5575_v15 }
 0x339   : > { %v7753_v57 = vadd.f32 %v7711_v46, %v5689_v5 }
 0x33a   : > { %v7756_v43 = vadd.f32 %v5577_v44, %v7614_v42 }
 0x33b   : > { %v5690_v58 = vpop.f32.mrb[136].mxu0 }
 0x33c   : > { %v5578_v41 = vpop.f32.mrb[216].mxu1  ;;  %v5691_v47 = vpop.f32.mrb[137].mxu0 }
 0x33d   : > { %v5579_v26 = vpop.f32.mrb[217].mxu1  ;;  %v5692_v11 = vadd.f32 %v5691_v47, %v5690_v58  ;;  %v5693_v30 = vpop.f32.mrb[138].mxu0 }
 0x33e   : > { %v5580_v49 = vadd.f32 %v5579_v26, %v5578_v41  ;;  %v5581_v48 = vpop.f32.mrb[218].mxu1  ;;  %v5694_v10 = vpop.f32.mrb[139].mxu0 }
 0x33f   : > { %v5582_v27 = vpop.f32.mrb[219].mxu1  ;;  %v5695_v62 = vadd.f32 %v5694_v10, %v5693_v30  ;;  %v7759_v19 = vadd.f32 %v7716_v16, %v5692_v11 }
 0x340   : > { %v7762_v46 = vadd.f32 %v5580_v49, %v7622_v4  ;;  %v5583_v3 = vadd.f32 %v5582_v27, %v5581_v48 }
 0x341   : > { %v7765_v42 = vadd.f32 %v7721_v9, %v5695_v62 }
 0x342   : > { %v7768_v0 = vadd.f32 %v5583_v3, %v7624_v25 }
 0x343   : > { %v5696_v23 = vpop.f32.mrb[140].mxu0 }
 0x344   : > { %v5584_v33 = vpop.f32.mrb[220].mxu1  ;;  %v5697_v14 = vpop.f32.mrb[141].mxu0 }
 0x345   : > { %v5585_v37 = vpop.f32.mrb[221].mxu1  ;;  %v5698_v22 = vadd.f32 %v5697_v14, %v5696_v23  ;;  %v5699_v24 = vpop.f32.mrb[142].mxu0 }
 0x346   : > { %v5586_v60 = vadd.f32 %v5585_v37, %v5584_v33  ;;  %v5587_v20 = vpop.f32.mrb[222].mxu1  ;;  %v5700_v16 = vpop.f32.mrb[143].mxu0 }
 0x347   : > { %v5588_v12 = vpop.f32.mrb[223].mxu1  ;;  %v5701_v63 = vadd.f32 %v5700_v16, %v5699_v24  ;;  %v7771_v4 = vadd.f32 %v7726_v8, %v5698_v22 }
 0x348   : > { %v7774_v9 = vadd.f32 %v5586_v60, %v7632_v56  ;;  %v5589_v29 = vadd.f32 %v5588_v12, %v5587_v20 }
 0x349   : > { %v7777_v25 = vadd.f32 %v7732_v36, %v5701_v63 }
 0x34a   : > { %v7780_v15 = vadd.f32 %v5589_v29, %v7634_v50 }
 0x34b   : > { %v5702_v54 = vpop.f32.mrb[144].mxu0 }
 0x34c   : > { %v5590_v40 = vpop.f32.mrb[224].mxu1  ;;  %v5703_v5 = vpop.f32.mrb[145].mxu0 }
 0x34d   : > { %v5591_v44 = vpop.f32.mrb[225].mxu1  ;;  %v5704_v58 = vadd.f32 %v5703_v5, %v5702_v54  ;;  %v5705_v41 = vpop.f32.mrb[146].mxu0 }
 0x34e   : > { %v5592_v47 = vadd.f32 %v5591_v44, %v5590_v40  ;;  %v5593_v26 = vpop.f32.mrb[226].mxu1  ;;  %v5706_v8 = vpop.f32.mrb[147].mxu0 }
 0x34f   : > { %v5594_v11 = vpop.f32.mrb[227].mxu1  ;;  %v5707_v30 = vadd.f32 %v5706_v8, %v5705_v41  ;;  %v7783_v56 = vadd.f32 %v7738_v52, %v5704_v58 }
 0x350   : > { %v6017_v36 = vadd.f32 %v5592_v47, %v7642_v18  ;;  %v5595_v49 = vadd.f32 %v5594_v11, %v5593_v26 }
 0x351   : > { %v7787_v50 = vadd.f32 %v7744_v45, %v5707_v30 }
 0x352   : > { %v6023_v48 = vadd.f32 %v5595_v49, %v7644_v21 }
 0x353   : > { %v5708_v10 = vpop.f32.mrb[148].mxu0 }
 0x354   : > { %v5596_v27 = vpop.f32.mrb[228].mxu1  ;;  %v5709_v62 = vpop.f32.mrb[149].mxu0 }
 0x355   : > { %v5597_v3 = vpop.f32.mrb[229].mxu1  ;;  %v5710_v23 = vadd.f32 %v5709_v62, %v5708_v10  ;;  %v5711_v33 = vpop.f32.mrb[150].mxu0 }
 0x356   : > { %v5598_v14 = vadd.f32 %v5597_v3, %v5596_v27  ;;  %v5599_v37 = vpop.f32.mrb[230].mxu1  ;;  %v5712_v22 = vpop.f32.mrb[151].mxu0 }
 0x357   : > { %v5600_v24 = vpop.f32.mrb[231].mxu1  ;;  %v5713_v52 = vadd.f32 %v5712_v22, %v5711_v33  ;;  %v7791_v60 = vadd.f32 %v7750_v38, %v5710_v23 }
 0x358   : > { %v6014_v18 = vadd.f32 %v5598_v14, %v7652_v31  ;;  %v5601_v45 = vadd.f32 %v5600_v24, %v5599_v37 }
 0x359   : > { %v7795_v20 = vadd.f32 %v7756_v43, %v5713_v52 }
 0x35a   : > { %v6020_v21 = vadd.f32 %v5601_v45, %v7654_v6 }
 0x35b   : > { %v5714_v16 = vpop.f32.mrb[152].mxu0 }
 0x35c   : > { %v5602_v12 = vpop.f32.mrb[232].mxu1  ;;  %v5715_v63 = vpop.f32.mrb[153].mxu0 }
 0x35d   : > { %v5603_v29 = vpop.f32.mrb[233].mxu1  ;;  %v5716_v54 = vadd.f32 %v5715_v63, %v5714_v16  ;;  %v5717_v40 = vpop.f32.mrb[154].mxu0 }
 0x35e   : > { %v5604_v5 = vadd.f32 %v5603_v29, %v5602_v12  ;;  %v5605_v44 = vpop.f32.mrb[234].mxu1  ;;  %v5718_v58 = vpop.f32.mrb[155].mxu0 }
 0x35f   : > { %v5606_v41 = vpop.f32.mrb[235].mxu1  ;;  %v5719_v38 = vadd.f32 %v5718_v58, %v5717_v40  ;;  %v7799_v47 = vadd.f32 %v7762_v46, %v5716_v54 }
 0x360   : > { %v6029_v31 = vadd.f32 %v5604_v5, %v7662_v1  ;;  %v5607_v43 = vadd.f32 %v5606_v41, %v5605_v44 }
 0x361   : > { %v7803_v26 = vadd.f32 %v7768_v0, %v5719_v38 }
 0x362   : > { %v6035_v6 = vadd.f32 %v5607_v43, %v7664_v28 }
 0x363   : > { %v5720_v8 = vpop.f32.mrb[156].mxu0 }
 0x364   : > { %v5608_v11 = vpop.f32.mrb[236].mxu1  ;;  %v5721_v30 = vpop.f32.mrb[157].mxu0 }
 0x365   : > { %v5609_v49 = vpop.f32.mrb[237].mxu1  ;;  %v5722_v10 = vadd.f32 %v5721_v30, %v5720_v8  ;;  %v5723_v27 = vpop.f32.mrb[158].mxu0 }
 0x366   : > { %v5610_v62 = vadd.f32 %v5609_v49, %v5608_v11  ;;  %v5611_v3 = vpop.f32.mrb[238].mxu1  ;;  %v5724_v23 = vpop.f32.mrb[159].mxu0 }
 0x367   : > { %v5612_v33 = vpop.f32.mrb[239].mxu1  ;;  %v5725_v46 = vadd.f32 %v5724_v23, %v5723_v27  ;;  %v7807_v14 = vadd.f32 %v7774_v9, %v5722_v10 }
 0x368   : > { %v6026_v1 = vadd.f32 %v5610_v62, %v7672_v51  ;;  %v5613_v0 = vadd.f32 %v5612_v33, %v5611_v3 }
 0x369   : > { %v7811_v37 = vadd.f32 %v7780_v15, %v5725_v46 }
 0x36a   : > { %v6032_v28 = vadd.f32 %v5613_v0, %v7674_v2 }
 0x36b   : > { %v5726_v22 = vpop.f32.mrb[160].mxu0 }
 0x36c   : > { %v5727_v24 = vpop.f32.mrb[161].mxu0 }
 0x36d   : > { %v5728_v52 = vadd.f32 %v5727_v24, %v5726_v22  ;;  %v5729_v45 = vpop.f32.mrb[162].mxu0 }
 0x36e   : > { %v5730_v16 = vpop.f32.mrb[163].mxu0 }
 0x36f   : > { %v5731_v12 = vadd.f32 %v5730_v16, %v5729_v45  ;;  %v7814_v63 = vadd.f32 %v6017_v36, %v5728_v52 }
 0x371   : > { %v7816_v29 = vadd.f32 %v6023_v48, %v5731_v12 }
 0x373   : > { %v5732_v9 = vpop.f32.mrb[164].mxu0 }
 0x374   : > { %v5733_v54 = vpop.f32.mrb[165].mxu0 }
 0x375   : > { %v5734_v51 = vadd.f32 %v5733_v54, %v5732_v9  ;;  %v5735_v40 = vpop.f32.mrb[166].mxu0 }
 0x376   : > { %v5736_v5 = vpop.f32.mrb[167].mxu0 }
 0x377   : > { %v5737_v15 = vadd.f32 %v5736_v5, %v5735_v40  ;;  %v7818_v44 = vadd.f32 %v6014_v18, %v5734_v51 }
 0x379   : > { %v7820_v2 = vadd.f32 %v6020_v21, %v5737_v15 }
 0x37b   : > { %v5738_v58 = vpop.f32.mrb[168].mxu0 }
 0x37c   : > { %v5739_v41 = vpop.f32.mrb[169].mxu0 }
 0x37d   : > { %v5740_v38 = vadd.f32 %v5739_v41, %v5738_v58  ;;  %v5741_v43 = vpop.f32.mrb[170].mxu0 }
 0x37e   : > { %v5742_v8 = vpop.f32.mrb[171].mxu0 }
 0x37f   : > { %v5743_v36 = vadd.f32 %v5742_v8, %v5741_v43  ;;  %v7822_v11 = vadd.f32 %v6029_v31, %v5740_v38  ;;  %v7835_v31 = vld [vmem:[%s7945_s4] ss:$0 sm:$0xff] }
 0x381   : > { %v7826_v48 = vadd.f32 %v6035_v6, %v5743_v36 }
 0x383   : > { %v5744_v30 = vpop.f32.mrb[172].mxu0 }
 0x384   : > { %v5745_v49 = vpop.f32.mrb[173].mxu0 }
 0x385   : > { %v5746_v10 = vadd.f32 %v5745_v49, %v5744_v30  ;;  %v5747_v18 = vpop.f32.mrb[174].mxu0 }
 0x386   : > { %v5748_v27 = vpop.f32.mrb[175].mxu0 }
 0x387   : > { %v5749_v21 = vadd.f32 %v5748_v27, %v5747_v18  ;;  %v7828_v62 = vadd.f32 %v6026_v1, %v5746_v10 }
 0x389   : > { %v7830_v3 = vadd.f32 %v6032_v28, %v5749_v21 }
 0x38b   : > { %v5888_v23 = vpop.f32.mrb[80].mxu0 }
 0x38c   : > { %v5944_v6 = vadd.f32 %v7703_v53, %v5888_v23  ;;  %v4234_v33 = vpop.f32.mrb[81].mxu0 }
 0x38d   : > { %v5947_v46 = vadd.f32 %v7693_v39, %v4234_v33  ;;  %v5889_v0 = vpop.f32.mrb[82].mxu0 }
 0x38e   : > { %v4466_v22 = vadd.f32 %v5944_v6, %v7835_v31  ;;  %v5950_v1 = vadd.f32 %v7708_v35, %v5889_v0  ;;  %v4237_v24 = vpop.f32.mrb[83].mxu0 }
 0x38f   : > { %v4464_v53 = vadd.f32 %v5947_v46, %v7835_v31  ;;  %v5953_v28 = vadd.f32 %v7698_v32, %v4237_v24 }
 0x390   : > { %v4498_v39 = vmax.f32 %v4466_v22, 0.0  ;;  %v4467_v52 = vadd.f32 %v5950_v1, %v7835_v31 }
 0x391   : > { %v4496_v45 = vmax.f32 %v4464_v53, 0.0  ;;  %v4465_v35 = vadd.f32 %v5953_v28, %v7835_v31 }
 0x392   : > { %4530 = vst [vmem:[%s7844_s21 + $0x10] sm:$0xff] %v4498_v39  ;;  %v4499_v16 = vmax.f32 %v4467_v52, 0.0 }
 0x393   : > { %4528 = vst [vmem:[%s7844_s21] sm:$0xff] %v4496_v45  ;;  %v4497_v12 = vmax.f32 %v4465_v35, 0.0  ;;  %v5892_v9 = vpop.f32.mrb[84].mxu0 }
 0x394   : > { %4531 = vst [vmem:[%s7844_s21 + $0x18] sm:$0xff] %v4499_v16  ;;  %v5956_v54 = vadd.f32 %v7723_v55, %v5892_v9  ;;  %v4250_v51 = vpop.f32.mrb[85].mxu0 }
 0x395   : > { %4529 = vst [vmem:[%s7844_s21 + $0x8] sm:$0xff] %v4497_v12  ;;  %v5959_v32 = vadd.f32 %v7713_v7, %v4250_v51  ;;  %v5893_v40 = vpop.f32.mrb[86].mxu0 }
 0x396   : > { %v4470_v5 = vadd.f32 %v5956_v54, %v7835_v31  ;;  %v5962_v15 = vadd.f32 %v7729_v61, %v5893_v40  ;;  %v4253_v58 = vpop.f32.mrb[87].mxu0 }
 0x397   : > { %v4468_v41 = vadd.f32 %v5959_v32, %v7835_v31  ;;  %v5965_v38 = vadd.f32 %v7718_v13, %v4253_v58 }
 0x398   : > { %v4502_v43 = vmax.f32 %v4470_v5, 0.0  ;;  %v4471_v55 = vadd.f32 %v5962_v15, %v7835_v31 }
 0x399   : > { %v4500_v8 = vmax.f32 %v4468_v41, 0.0  ;;  %v4469_v36 = vadd.f32 %v5965_v38, %v7835_v31 }
 0x39a   : > { %4534 = vst [vmem:[%s7844_s21 + $0x30] sm:$0xff] %v4502_v43  ;;  %v4503_v7 = vmax.f32 %v4471_v55, 0.0 }
 0x39b   : > { %4532 = vst [vmem:[%s7844_s21 + $0x20] sm:$0xff] %v4500_v8  ;;  %v4501_v30 = vmax.f32 %v4469_v36, 0.0  ;;  %v5896_v49 = vpop.f32.mrb[88].mxu0 }
 0x39c   : > { %4535 = vst [vmem:[%s7844_s21 + $0x38] sm:$0xff] %v4503_v7  ;;  %v5968_v61 = vadd.f32 %v7747_v59, %v5896_v49  ;;  %v4266_v10 = vpop.f32.mrb[89].mxu0 }
 0x39d   : > { %4533 = vst [vmem:[%s7844_s21 + $0x28] sm:$0xff] %v4501_v30  ;;  %v5971_v13 = vadd.f32 %v7735_v17, %v4266_v10  ;;  %v5897_v18 = vpop.f32.mrb[90].mxu0 }
 0x39e   : > { %v4474_v27 = vadd.f32 %v5968_v61, %v7835_v31  ;;  %v5974_v21 = vadd.f32 %v7753_v57, %v5897_v18  ;;  %v4269_v23 = vpop.f32.mrb[91].mxu0 }
 0x39f   : > { %v4472_v6 = vadd.f32 %v5971_v13, %v7835_v31  ;;  %v5977_v33 = vadd.f32 %v7741_v34, %v4269_v23 }
 0x3a0   : > { %v4506_v46 = vmax.f32 %v4474_v27, 0.0  ;;  %v4475_v59 = vadd.f32 %v5974_v21, %v7835_v31 }
 0x3a1   : > { %v4504_v0 = vmax.f32 %v4472_v6, 0.0  ;;  %v4473_v22 = vadd.f32 %v5977_v33, %v7835_v31 }
 0x3a2   : > { %4538 = vst [vmem:[%s7844_s21 + $0x50] sm:$0xff] %v4506_v46  ;;  %v4507_v17 = vmax.f32 %v4475_v59, 0.0 }
 0x3a3   : > { %4536 = vst [vmem:[%s7844_s21 + $0x40] sm:$0xff] %v4504_v0  ;;  %v4505_v1 = vmax.f32 %v4473_v22, 0.0  ;;  %v5900_v24 = vpop.f32.mrb[92].mxu0 }
 0x3a4   : > { %4539 = vst [vmem:[%s7844_s21 + $0x58] sm:$0xff] %v4507_v17  ;;  %v5980_v57 = vadd.f32 %v7771_v4, %v5900_v24  ;;  %v4282_v53 = vpop.f32.mrb[93].mxu0 }
 0x3a5   : > { %4537 = vst [vmem:[%s7844_s21 + $0x48] sm:$0xff] %v4505_v1  ;;  %v5983_v34 = vadd.f32 %v7759_v19, %v4282_v53  ;;  %v5901_v28 = vpop.f32.mrb[94].mxu0 }
 0x3a6   : > { %v4478_v39 = vadd.f32 %v5980_v57, %v7835_v31  ;;  %v5986_v52 = vadd.f32 %v7777_v25, %v5901_v28  ;;  %v4285_v45 = vpop.f32.mrb[95].mxu0 }
 0x3a7   : > { %v4476_v35 = vadd.f32 %v5983_v34, %v7835_v31  ;;  %v5989_v16 = vadd.f32 %v7765_v42, %v4285_v45 }
 0x3a8   : > { %v4510_v12 = vmax.f32 %v4478_v39, 0.0  ;;  %v4479_v4 = vadd.f32 %v5986_v52, %v7835_v31 }
 0x3a9   : > { %v4508_v9 = vmax.f32 %v4476_v35, 0.0  ;;  %v4477_v54 = vadd.f32 %v5989_v16, %v7835_v31 }
 0x3aa   : > { %4542 = vst [vmem:[%s7844_s21 + $0x70] sm:$0xff] %v4510_v12  ;;  %v4511_v19 = vmax.f32 %v4479_v4, 0.0 }
 0x3ab   : > { %4540 = vst [vmem:[%s7844_s21 + $0x60] sm:$0xff] %v4508_v9  ;;  %v4509_v51 = vmax.f32 %v4477_v54, 0.0  ;;  %v5904_v32 = vpop.f32.mrb[96].mxu0 }
 0x3ac   : > { %4543 = vst [vmem:[%s7844_s21 + $0x78] sm:$0xff] %v4511_v19  ;;  %v5992_v25 = vadd.f32 %v7791_v60, %v5904_v32  ;;  %v4298_v40 = vpop.f32.mrb[97].mxu0 }
 0x3ad   : > { %4541 = vst [vmem:[%s7844_s21 + $0x68] sm:$0xff] %v4509_v51  ;;  %v5995_v42 = vadd.f32 %v7783_v56, %v4298_v40  ;;  %v5905_v5 = vpop.f32.mrb[98].mxu0 }
 0x3ae   : > { %v4482_v15 = vadd.f32 %v5992_v25, %v7835_v31  ;;  %v5998_v58 = vadd.f32 %v7795_v20, %v5905_v5  ;;  %v4301_v41 = vpop.f32.mrb[99].mxu0 }
 0x3af   : > { %v4480_v38 = vadd.f32 %v5995_v42, %v7835_v31  ;;  %v6001_v43 = vadd.f32 %v7787_v50, %v4301_v41 }
 0x3b0   : > { %v4514_v55 = vmax.f32 %v4482_v15, 0.0  ;;  %v4483_v60 = vadd.f32 %v5998_v58, %v7835_v31 }
 0x3b1   : > { %v4512_v8 = vmax.f32 %v4480_v38, 0.0  ;;  %v4481_v36 = vadd.f32 %v6001_v43, %v7835_v31 }
 0x3b2   : > { %4546 = vst [vmem:[%s7844_s21 + $0x90] sm:$0xff] %v4514_v55  ;;  %v4515_v56 = vmax.f32 %v4483_v60, 0.0 }
 0x3b3   : > { %4544 = vst [vmem:[%s7844_s21 + $0x80] sm:$0xff] %v4512_v8  ;;  %v4513_v7 = vmax.f32 %v4481_v36, 0.0  ;;  %v5908_v30 = vpop.f32.mrb[100].mxu0 }
 0x3b4   : > { %4547 = vst [vmem:[%s7844_s21 + $0x98] sm:$0xff] %v4515_v56  ;;  %v6004_v20 = vadd.f32 %v7807_v14, %v5908_v30  ;;  %v4314_v49 = vpop.f32.mrb[101].mxu0 }
 0x3b5   : > { %4545 = vst [vmem:[%s7844_s21 + $0x88] sm:$0xff] %v4513_v7  ;;  %v6007_v50 = vadd.f32 %v7799_v47, %v4314_v49  ;;  %v5909_v61 = vpop.f32.mrb[102].mxu0 }
 0x3b6   : > { %v4486_v10 = vadd.f32 %v6004_v20, %v7835_v31  ;;  %v6010_v13 = vadd.f32 %v7811_v37, %v5909_v61  ;;  %v4317_v18 = vpop.f32.mrb[103].mxu0 }
 0x3b7   : > { %v4484_v27 = vadd.f32 %v6007_v50, %v7835_v31  ;;  %v6013_v21 = vadd.f32 %v7803_v26, %v4317_v18 }
 0x3b8   : > { %v4518_v23 = vmax.f32 %v4486_v10, 0.0  ;;  %v4487_v14 = vadd.f32 %v6010_v13, %v7835_v31 }
 0x3b9   : > { %v4516_v6 = vmax.f32 %v4484_v27, 0.0  ;;  %v4485_v33 = vadd.f32 %v6013_v21, %v7835_v31 }
 0x3ba   : > { %4550 = vst [vmem:[%s7844_s21 + $0xb0] sm:$0xff] %v4518_v23  ;;  %v4519_v47 = vmax.f32 %v4487_v14, 0.0 }
 0x3bb   : > { %4548 = vst [vmem:[%s7844_s21 + $0xa0] sm:$0xff] %v4516_v6  ;;  %v4517_v46 = vmax.f32 %v4485_v33, 0.0  ;;  %v5912_v59 = vpop.f32.mrb[104].mxu0 }
 0x3bc   : > { %4551 = vst [vmem:[%s7844_s21 + $0xb8] sm:$0xff] %v4519_v47  ;;  %v6016_v37 = vadd.f32 %v7818_v44, %v5912_v59  ;;  %v4330_v0 = vpop.f32.mrb[105].mxu0 }
 0x3bd   : > { %4549 = vst [vmem:[%s7844_s21 + $0xa8] sm:$0xff] %v4517_v46  ;;  %v6019_v26 = vadd.f32 %v7814_v63, %v4330_v0  ;;  %v5913_v22 = vpop.f32.mrb[106].mxu0 }
 0x3be   : > { %v4490_v17 = vadd.f32 %v6016_v37, %v7835_v31  ;;  %v6022_v1 = vadd.f32 %v7820_v2, %v5913_v22  ;;  %v4333_v24 = vpop.f32.mrb[107].mxu0 }
 0x3bf   : > { %v4488_v57 = vadd.f32 %v6019_v26, %v7835_v31  ;;  %v6025_v53 = vadd.f32 %v7816_v29, %v4333_v24 }
 0x3c0   : > { %v4522_v34 = vmax.f32 %v4490_v17, 0.0  ;;  %v4491_v44 = vadd.f32 %v6022_v1, %v7835_v31 }
 0x3c1   : > { %v4520_v28 = vmax.f32 %v4488_v57, 0.0  ;;  %v4489_v39 = vadd.f32 %v6025_v53, %v7835_v31 }
 0x3c2   : > { %4554 = vst [vmem:[%s7844_s21 + $0xd0] sm:$0xff] %v4522_v34  ;;  %v4523_v63 = vmax.f32 %v4491_v44, 0.0 }
 0x3c3   : > { %4552 = vst [vmem:[%s7844_s21 + $0xc0] sm:$0xff] %v4520_v28  ;;  %v4521_v52 = vmax.f32 %v4489_v39, 0.0  ;;  %v5916_v45 = vpop.f32.mrb[108].mxu0 }
 0x3c4   : > { %4555 = vst [vmem:[%s7844_s21 + $0xd8] sm:$0xff] %v4523_v63  ;;  %v6028_v2 = vadd.f32 %v7828_v62, %v5916_v45  ;;  %v4346_v35 = vpop.f32.mrb[109].mxu0 }
 0x3c5   : > { %4553 = vst [vmem:[%s7844_s21 + $0xc8] sm:$0xff] %v4521_v52  ;;  %v6031_v29 = vadd.f32 %v7822_v11, %v4346_v35  ;;  %v5917_v16 = vpop.f32.mrb[110].mxu0 }
 0x3c6   : > { %v4494_v12 = vadd.f32 %v6028_v2, %v7835_v31  ;;  %v6034_v4 = vadd.f32 %v7830_v3, %v5917_v16  ;;  %v4349_v9 = vpop.f32.mrb[111].mxu0 }
 0x3c7   : > { %v4492_v54 = vadd.f32 %v6031_v29, %v7835_v31  ;;  %v6037_v19 = vadd.f32 %v7826_v48, %v4349_v9 }
 0x3c8   : > { %v4526_v51 = vmax.f32 %v4494_v12, 0.0  ;;  %v4495_v62 = vadd.f32 %v6034_v4, %v7835_v31 }
 0x3c9   : > { %v4524_v32 = vmax.f32 %v4492_v54, 0.0  ;;  %v4493_v25 = vadd.f32 %v6037_v19, %v7835_v31 }
 0x3ca   : > { %4558 = vst [vmem:[%s7844_s21 + $0xf0] sm:$0xff] %v4526_v51  ;;  %v4527_v40 = vmax.f32 %v4495_v62, 0.0 }
 0x3cb   : > { %4556 = vst [vmem:[%s7844_s21 + $0xe0] sm:$0xff] %v4524_v32  ;;  %v4525_v11 = vmax.f32 %v4493_v25, 0.0 }
 0x3cc   : > { %4559 = vst [vmem:[%s7844_s21 + $0xf8] sm:$0xff] %v4527_v40 }
 0x3cd   : > { %4557 = vst [vmem:[%s7844_s21 + $0xe8] sm:$0xff] %v4525_v11 }
 0x3ce PF: > { %s15_s18 = sadd.s32 1, %s6280_s18  }
 0x3cf   : > { %p12_p5 = scmp.ge.s32.totalorder %s15_s18, 4  }
 0x3d1   :  { %14 = sbr.rel (!%p12_p5) target bundleno = 1 (0x1), region = 79 }

</bundles_post_ra>
